<compile_context>
chip_gen: v5e
topology: v5e:2x2
jax: 0.10.0
libtpu: 0.0.40
codegen_flags: <defaults>
</compile_context>

<pallas_src>
import functools

import jax
import jax.numpy as jnp
from jax import lax
from jax.experimental import pallas as pl
from jax.experimental.pallas import tpu as pltpu

HIGHEST = jax.lax.Precision.HIGHEST  # reference only


# ---------------------------------------------------------------------------
# Fused Pallas kernel: 2-layer BiLSTM + classifier
# ---------------------------------------------------------------------------
def _ts_bilstm_kernel(x_ref, wih0_ref, whh0_ref, b0_ref,
                      wih1_ref, whh1_ref, b1_ref,
                      clsw_ref, clsb_ref,
                      out_ref,
                      pre_scr, h0f_scr, h0b_scr, h1f_scr, h1b_scr,
                      *, hidden, seq_len):
    """Everything in VMEM.

    x_ref:    (T, B, In)        time-major input
    wih{l}:   (Fin_l, 8H)       [W_ih_f^T | W_ih_b^T]
    whh{l}:   (2H, 8H)          blockdiag([W_hh_f^T, W_hh_b^T])
    b{l}:     (1, 8H)           [b_ih_f+b_hh_f | b_ih_b+b_hh_b]
    clsw:     (2H, C), clsb: (1, C)
    out_ref:  (B, C)            logits (only HBM output)
    pre_scr:  (T, B, 8H)        hoisted input projection (reused per layer)
    h{l}f/h{l}b: (T, B, H)      per-layer forward / backward outputs
    """
    H = hidden
    T = seq_len
    B = x_ref.shape[1]
    G = 8 * H                       # fused gate width (both directions)

    def bilstm_layer(load_x, wih_ref_l, whh_ref_l, b_ref_l, outf, outb):
        # Loop-invariant weights: read once, keep in vregs.
        wih = wih_ref_l[...]                      # (Fin, 8H)
        whh = whh_ref_l[...]                      # (2H, 8H)
        bias = jnp.broadcast_to(b_ref_l[...], (B, G))   # hoisted broadcast

        # ---- input projection for all timesteps, both directions ----------
        # Independent of h, so it lives off the serial critical path.
        def pre_step(t, carry):
            pre_scr[t] = jnp.dot(load_x(t), wih,
                                 preferred_element_type=jnp.float32) + bias
            return carry
        lax.fori_loop(0, T, pre_step, 0, unroll=True)

        # ---- fused forward+backward recurrence -----------------------------
        def step(t, carry):
            h, c = carry                          # (B, 2H): [h_f | h_b]
            rt = T - 1 - t
            row_t = pre_scr[t]                    # (B, 8H)
            row_r = pre_scr[rt]
            gin = jnp.concatenate([row_t[:, :4 * H], row_r[:, 4 * H:]],
                                  axis=-1)        # (B, 8H)
            gates = gin + jnp.dot(h, whh, preferred_element_type=jnp.float32)

            i_f = jax.nn.sigmoid(gates[:, 0 * H:1 * H])
            f_f = jax.nn.sigmoid(gates[:, 1 * H:2 * H])
            g_f = jnp.tanh(gates[:, 2 * H:3 * H])
            o_f = jax.nn.sigmoid(gates[:, 3 * H:4 * H])
            i_b = jax.nn.sigmoid(gates[:, 4 * H:5 * H])
            f_b = jax.nn.sigmoid(gates[:, 5 * H:6 * H])
            g_b = jnp.tanh(gates[:, 6 * H:7 * H])
            o_b = jax.nn.sigmoid(gates[:, 7 * H:8 * H])

            c_f = f_f * c[:, :H] + i_f * g_f
            c_b = f_b * c[:, H:] + i_b * g_b
            h_f = o_f * jnp.tanh(c_f)
            h_b = o_b * jnp.tanh(c_b)

            outf[t] = h_f                         # fwd output at time t
            outb[rt] = h_b                        # bwd output at time rt
            return (jnp.concatenate([h_f, h_b], axis=-1),
                    jnp.concatenate([c_f, c_b], axis=-1))

        zeros = jnp.zeros((B, 2 * H), jnp.float32)
        lax.fori_loop(0, T, step, (zeros, zeros), unroll=True)

    # Layer 0: input is x.
    bilstm_layer(lambda t: x_ref[t], wih0_ref, whh0_ref, b0_ref,
                 h0f_scr, h0b_scr)
    # Layer 1: input is the concatenated layer-0 output, straight from VMEM.
    bilstm_layer(lambda t: jnp.concatenate([h0f_scr[t], h0b_scr[t]], axis=-1),
                 wih1_ref, whh1_ref, b1_ref, h1f_scr, h1b_scr)

    # Classifier on output[:, -1, :].
    last = jnp.concatenate([h1f_scr[T - 1], h1b_scr[T - 1]], axis=-1)  # (B,2H)
    out_ref[...] = (jnp.dot(last, clsw_ref[...],
                            preferred_element_type=jnp.float32)
                    + clsb_ref[...])


# ---------------------------------------------------------------------------
# Wrapper
# ---------------------------------------------------------------------------
_VMEM = pl.BlockSpec(memory_space=pltpu.MemorySpace.VMEM)


def pack_params(params):
    """One-time repack of PyTorch-layout params into kernel (lane-major) layout."""
    packed = {}
    for layer in range(2):
        p = params[f"l{layer}"]
        H = p["w_hh_f"].shape[1]
        wih = jnp.concatenate([p["w_ih_f"].T, p["w_ih_b"].T], axis=1)   # (In, 8H)
        zeros = jnp.zeros((H, 4 * H), jnp.float32)
        whh = jnp.concatenate(
            [jnp.concatenate([p["w_hh_f"].T, zeros], axis=1),
             jnp.concatenate([zeros, p["w_hh_b"].T], axis=1)], axis=0)  # (2H, 8H)
        b = jnp.concatenate([p["b_ih_f"] + p["b_hh_f"],
                             p["b_ih_b"] + p["b_hh_b"]]).reshape(1, 8 * H)
        packed[f"wih{layer}"] = wih
        packed[f"whh{layer}"] = whh
        packed[f"b{layer}"] = b
    packed["cls_w"] = params["cls_w"].T                                 # (2H, C)
    packed["cls_b"] = params["cls_b"].reshape(1, -1)
    return packed


def ts_bilstm_forward(x_btf, packed):
    """x_btf: (B, T, In) -> (B, num_classes); single fused pallas_call."""
    B, T, _ = x_btf.shape
    x_tbf = jnp.transpose(x_btf, (1, 0, 2))          # time-major for recurrence
    H = packed["whh0"].shape[0] // 2
    C = packed["cls_w"].shape[1]
    kernel = functools.partial(_ts_bilstm_kernel, hidden=H, seq_len=T)
    # TODO(synk): for large T/B/H this whole-array-in-VMEM design needs
    # T-blocked BlockSpecs / emit_pipeline (notably on v7x's 64 MiB VMEM).
    return pl.pallas_call(
        kernel,
        out_shape=jax.ShapeDtypeStruct((B, C), jnp.float32),
        in_specs=[_VMEM] * 9,
        out_specs=_VMEM,
        scratch_shapes=[
            pltpu.VMEM((T, B, 8 * H), jnp.float32),   # pre-projection
            pltpu.VMEM((T, B, H), jnp.float32),       # layer0 fwd out
            pltpu.VMEM((T, B, H), jnp.float32),       # layer0 bwd out
            pltpu.VMEM((T, B, H), jnp.float32),       # layer1 fwd out
            pltpu.VMEM((T, B, H), jnp.float32),       # layer1 bwd out
        ],
    )(x_tbf, packed["wih0"], packed["whh0"], packed["b0"],
      packed["wih1"], packed["whh1"], packed["b1"],
      packed["cls_w"], packed["cls_b"])


# ---------------------------------------------------------------------------
# Pure-JAX reference (same math, lax.scan) for correctness check
# ---------------------------------------------------------------------------
def _ref_lstm_dir(x_tbf, w_ih, w_hh, b_ih, b_hh):
    T, B, _ = x_tbf.shape
    H = w_hh.shape[1]

    def step(carry, x_t):
        h, c = carry
        gates = (jnp.dot(x_t, w_ih.T, precision=HIGHEST)
                 + jnp.dot(h, w_hh.T, precision=HIGHEST) + b_ih + b_hh)
        i, f, g, o = jnp.split(gates, 4, axis=-1)
        i, f, o = jax.nn.sigmoid(i), jax.nn.sigmoid(f), jax.nn.sigmoid(o)
        g = jnp.tanh(g)
        c = f * c + i * g
        h = o * jnp.tanh(c)
        return (h, c), h

    init = (jnp.zeros((B, H), jnp.float32), jnp.zeros((B, H), jnp.float32))
    _, out = lax.scan(step, init, x_tbf)
    return out


def ref_forward(x_btf, params):
    h = jnp.transpose(x_btf, (1, 0, 2))
    for layer in range(2):
        p = params[f"l{layer}"]
        out_f = _ref_lstm_dir(h, p["w_ih_f"], p["w_hh_f"],
                              p["b_ih_f"], p["b_hh_f"])
        out_b = _ref_lstm_dir(h[::-1], p["w_ih_b"], p["w_hh_b"],
                              p["b_ih_b"], p["b_hh_b"])[::-1]
        h = jnp.concatenate([out_f, out_b], axis=-1)
    last = h[-1]
    return jnp.dot(last, params["cls_w"].T, precision=HIGHEST) + params["cls_b"]


# ---------------------------------------------------------------------------
# Deterministic parameter init (PyTorch shapes, uniform(-1/sqrt(H), 1/sqrt(H)))
# ---------------------------------------------------------------------------
def init_params(key, input_dim, hidden, num_classes):
    k = 1.0 / jnp.sqrt(hidden)
    params = {}
    for layer in range(2):
        in_size = input_dim if layer == 0 else 2 * hidden
        p = {}
        for d in ("f", "b"):
            key, k1, k2, k3, k4 = jax.random.split(key, 5)
            p[f"w_ih_{d}"] = jax.random.uniform(
                k1, (4 * hidden, in_size), jnp.float32, -k, k)
            p[f"w_hh_{d}"] = jax.random.uniform(
                k2, (4 * hidden, hidden), jnp.float32, -k, k)
            p[f"b_ih_{d}"] = jax.random.uniform(
                k3, (4 * hidden,), jnp.float32, -k, k)
            p[f"b_hh_{d}"] = jax.random.uniform(
                k4, (4 * hidden,), jnp.float32, -k, k)
        params[f"l{layer}"] = p
    key, kw, kb = jax.random.split(key, 3)
    kc = 1.0 / jnp.sqrt(2 * hidden)
    params["cls_w"] = jax.random.uniform(
        kw, (num_classes, 2 * hidden), jnp.float32, -kc, kc)
    params["cls_b"] = jax.random.uniform(
        kb, (num_classes,), jnp.float32, -kc, kc)
    return params


# ---------------------------------------------------------------------------
if __name__ == "__main__":
    B, T, INPUT_DIM, HIDDEN, NUM_CLASSES = 2, 8, 15, 32, 4

    key = jax.random.PRNGKey(0)
    key, xkey = jax.random.split(key)
    x = jax.random.normal(xkey, (B, T, INPUT_DIM), jnp.float32)
    params = init_params(key, INPUT_DIM, HIDDEN, NUM_CLASSES)

    packed = pack_params(params)            # one-time weight repack (not jitted)

    out = jax.jit(ts_bilstm_forward)(x, packed)
    out = jax.block_until_ready(out)
    assert out.shape == (B, NUM_CLASSES)

    ref = jax.block_until_ready(jax.jit(ref_forward)(x, params))
    # Kernel runs single-pass MXU matmuls (no precision=HIGHEST); reference is
    # HIGHEST, so allow a slightly looser tolerance.
    assert jnp.allclose(out, ref, rtol=2e-2, atol=2e-2), (out, ref)

    print("KERNEL_OK")
</pallas_src>

<mosaic_0001>
module attributes {stable_mosaic.version = 11 : i64} {
  func.func @_ts_bilstm_kernel(%arg0: memref<8x2x15xf32, #tpu.memory_space<vmem>>, %arg1: memref<15x256xf32, #tpu.memory_space<vmem>>, %arg2: memref<64x256xf32, #tpu.memory_space<vmem>>, %arg3: memref<1x256xf32, #tpu.memory_space<vmem>>, %arg4: memref<64x256xf32, #tpu.memory_space<vmem>>, %arg5: memref<64x256xf32, #tpu.memory_space<vmem>>, %arg6: memref<1x256xf32, #tpu.memory_space<vmem>>, %arg7: memref<64x4xf32, #tpu.memory_space<vmem>>, %arg8: memref<1x4xf32, #tpu.memory_space<vmem>>, %arg9: memref<2x4xf32, #tpu.memory_space<vmem>>, %arg10: memref<8x2x256xf32, #tpu.memory_space<vmem>>, %arg11: memref<8x2x32xf32, #tpu.memory_space<vmem>>, %arg12: memref<8x2x32xf32, #tpu.memory_space<vmem>>, %arg13: memref<8x2x32xf32, #tpu.memory_space<vmem>>, %arg14: memref<8x2x32xf32, #tpu.memory_space<vmem>>) attributes {dimension_semantics = [], scalar_prefetch = 0 : i64, scratch_operands = 5 : i64, tpu.core_type = #tpu.core_type<tc>} {
    %c0 = arith.constant 0 : index
    %c0_0 = arith.constant 0 : index
    %0 = vector.load %arg1[%c0, %c0_0] : memref<15x256xf32, #tpu.memory_space<vmem>>, vector<15x256xf32>
    %c0_1 = arith.constant 0 : index
    %c0_2 = arith.constant 0 : index
    %1 = vector.load %arg2[%c0_1, %c0_2] : memref<64x256xf32, #tpu.memory_space<vmem>>, vector<64x256xf32>
    %c0_3 = arith.constant 0 : index
    %c0_4 = arith.constant 0 : index
    %2 = vector.load %arg3[%c0_3, %c0_4] : memref<1x256xf32, #tpu.memory_space<vmem>>, vector<1x256xf32>
    %3 = vector.shape_cast %2 : vector<1x256xf32> to vector<1x256xf32>
    %4 = vector.broadcast %3 : vector<1x256xf32> to vector<2x256xf32>
    %c0_i32 = arith.constant 0 : i32
    %5 = arith.index_cast %c0_i32 : i32 to index
    %c0_5 = arith.constant 0 : index
    %c0_6 = arith.constant 0 : index
    %6 = vector.load %arg0[%5, %c0_5, %c0_6] : memref<8x2x15xf32, #tpu.memory_space<vmem>>, vector<1x2x15xf32>
    %7 = vector.shape_cast %6 : vector<1x2x15xf32> to vector<2x15xf32>
    %cst = arith.constant dense<0.000000e+00> : vector<2x256xf32>
    %8 = tpu.matmul %7, %0, %cst {dimension_numbers = #tpu.dot_dimension_numbers<[1], [0], [0], [1], [0, 0, 1, 1], [], []>} : vector<2x15xf32>, vector<15x256xf32>, vector<2x256xf32> -> vector<2x256xf32>
    %9 = arith.addf %8, %4 : vector<2x256xf32>
    %10 = arith.index_cast %c0_i32 : i32 to index
    %c0_7 = arith.constant 0 : index
    %c0_8 = arith.constant 0 : index
    %11 = vector.load %arg10[%10, %c0_7, %c0_8] : memref<8x2x256xf32, #tpu.memory_space<vmem>>, vector<1x2x256xf32>
    %12 = vector.shape_cast %11 : vector<1x2x256xf32> to vector<2x256xf32>
    %13 = vector.shape_cast %9 : vector<2x256xf32> to vector<1x2x256xf32>
    tpu.vector_store %arg10[%10, %c0_7, %c0_8], %13 {strides = array<i32>} : memref<8x2x256xf32, #tpu.memory_space<vmem>>, vector<1x2x256xf32>,
    %c1_i32 = arith.constant 1 : i32
    %14 = arith.index_cast %c1_i32 : i32 to index
    %c0_9 = arith.constant 0 : index
    %c0_10 = arith.constant 0 : index
    %15 = vector.load %arg0[%14, %c0_9, %c0_10] : memref<8x2x15xf32, #tpu.memory_space<vmem>>, vector<1x2x15xf32>
    %16 = vector.shape_cast %15 : vector<1x2x15xf32> to vector<2x15xf32>
    %cst_11 = arith.constant dense<0.000000e+00> : vector<2x256xf32>
    %17 = tpu.matmul %16, %0, %cst_11 {dimension_numbers = #tpu.dot_dimension_numbers<[1], [0], [0], [1], [0, 0, 1, 1], [], []>} : vector<2x15xf32>, vector<15x256xf32>, vector<2x256xf32> -> vector<2x256xf32>
    %18 = arith.addf %17, %4 : vector<2x256xf32>
    %19 = arith.index_cast %c1_i32 : i32 to index
    %c0_12 = arith.constant 0 : index
    %c0_13 = arith.constant 0 : index
    %20 = vector.load %arg10[%19, %c0_12, %c0_13] : memref<8x2x256xf32, #tpu.memory_space<vmem>>, vector<1x2x256xf32>
    %21 = vector.shape_cast %20 : vector<1x2x256xf32> to vector<2x256xf32>
    %22 = vector.shape_cast %18 : vector<2x256xf32> to vector<1x2x256xf32>
    tpu.vector_store %arg10[%19, %c0_12, %c0_13], %22 {strides = array<i32>} : memref<8x2x256xf32, #tpu.memory_space<vmem>>, vector<1x2x256xf32>,
    %c2_i32 = arith.constant 2 : i32
    %23 = arith.index_cast %c2_i32 : i32 to index
    %c0_14 = arith.constant 0 : index
    %c0_15 = arith.constant 0 : index
    %24 = vector.load %arg0[%23, %c0_14, %c0_15] : memref<8x2x15xf32, #tpu.memory_space<vmem>>, vector<1x2x15xf32>
    %25 = vector.shape_cast %24 : vector<1x2x15xf32> to vector<2x15xf32>
    %cst_16 = arith.constant dense<0.000000e+00> : vector<2x256xf32>
    %26 = tpu.matmul %25, %0, %cst_16 {dimension_numbers = #tpu.dot_dimension_numbers<[1], [0], [0], [1], [0, 0, 1, 1], [], []>} : vector<2x15xf32>, vector<15x256xf32>, vector<2x256xf32> -> vector<2x256xf32>
    %27 = arith.addf %26, %4 : vector<2x256xf32>
    %28 = arith.index_cast %c2_i32 : i32 to index
    %c0_17 = arith.constant 0 : index
    %c0_18 = arith.constant 0 : index
    %29 = vector.load %arg10[%28, %c0_17, %c0_18] : memref<8x2x256xf32, #tpu.memory_space<vmem>>, vector<1x2x256xf32>
    %30 = vector.shape_cast %29 : vector<1x2x256xf32> to vector<2x256xf32>
    %31 = vector.shape_cast %27 : vector<2x256xf32> to vector<1x2x256xf32>
    tpu.vector_store %arg10[%28, %c0_17, %c0_18], %31 {strides = array<i32>} : memref<8x2x256xf32, #tpu.memory_space<vmem>>, vector<1x2x256xf32>,
    %c3_i32 = arith.constant 3 : i32
    %32 = arith.index_cast %c3_i32 : i32 to index
    %c0_19 = arith.constant 0 : index
    %c0_20 = arith.constant 0 : index
    %33 = vector.load %arg0[%32, %c0_19, %c0_20] : memref<8x2x15xf32, #tpu.memory_space<vmem>>, vector<1x2x15xf32>
    %34 = vector.shape_cast %33 : vector<1x2x15xf32> to vector<2x15xf32>
    %cst_21 = arith.constant dense<0.000000e+00> : vector<2x256xf32>
    %35 = tpu.matmul %34, %0, %cst_21 {dimension_numbers = #tpu.dot_dimension_numbers<[1], [0], [0], [1], [0, 0, 1, 1], [], []>} : vector<2x15xf32>, vector<15x256xf32>, vector<2x256xf32> -> vector<2x256xf32>
    %36 = arith.addf %35, %4 : vector<2x256xf32>
    %37 = arith.index_cast %c3_i32 : i32 to index
    %c0_22 = arith.constant 0 : index
    %c0_23 = arith.constant 0 : index
    %38 = vector.load %arg10[%37, %c0_22, %c0_23] : memref<8x2x256xf32, #tpu.memory_space<vmem>>, vector<1x2x256xf32>
    %39 = vector.shape_cast %38 : vector<1x2x256xf32> to vector<2x256xf32>
    %40 = vector.shape_cast %36 : vector<2x256xf32> to vector<1x2x256xf32>
    tpu.vector_store %arg10[%37, %c0_22, %c0_23], %40 {strides = array<i32>} : memref<8x2x256xf32, #tpu.memory_space<vmem>>, vector<1x2x256xf32>,
    %c4_i32 = arith.constant 4 : i32
    %41 = arith.index_cast %c4_i32 : i32 to index
    %c0_24 = arith.constant 0 : index
    %c0_25 = arith.constant 0 : index
    %42 = vector.load %arg0[%41, %c0_24, %c0_25] : memref<8x2x15xf32, #tpu.memory_space<vmem>>, vector<1x2x15xf32>
    %43 = vector.shape_cast %42 : vector<1x2x15xf32> to vector<2x15xf32>
    %cst_26 = arith.constant dense<0.000000e+00> : vector<2x256xf32>
    %44 = tpu.matmul %43, %0, %cst_26 {dimension_numbers = #tpu.dot_dimension_numbers<[1], [0], [0], [1], [0, 0, 1, 1], [], []>} : vector<2x15xf32>, vector<15x256xf32>, vector<2x256xf32> -> vector<2x256xf32>
    %45 = arith.addf %44, %4 : vector<2x256xf32>
    %46 = arith.index_cast %c4_i32 : i32 to index
    %c0_27 = arith.constant 0 : index
    %c0_28 = arith.constant 0 : index
    %47 = vector.load %arg10[%46, %c0_27, %c0_28] : memref<8x2x256xf32, #tpu.memory_space<vmem>>, vector<1x2x256xf32>
    %48 = vector.shape_cast %47 : vector<1x2x256xf32> to vector<2x256xf32>
    %49 = vector.shape_cast %45 : vector<2x256xf32> to vector<1x2x256xf32>
    tpu.vector_store %arg10[%46, %c0_27, %c0_28], %49 {strides = array<i32>} : memref<8x2x256xf32, #tpu.memory_space<vmem>>, vector<1x2x256xf32>,
    %c5_i32 = arith.constant 5 : i32
    %50 = arith.index_cast %c5_i32 : i32 to index
    %c0_29 = arith.constant 0 : index
    %c0_30 = arith.constant 0 : index
    %51 = vector.load %arg0[%50, %c0_29, %c0_30] : memref<8x2x15xf32, #tpu.memory_space<vmem>>, vector<1x2x15xf32>
    %52 = vector.shape_cast %51 : vector<1x2x15xf32> to vector<2x15xf32>
    %cst_31 = arith.constant dense<0.000000e+00> : vector<2x256xf32>
    %53 = tpu.matmul %52, %0, %cst_31 {dimension_numbers = #tpu.dot_dimension_numbers<[1], [0], [0], [1], [0, 0, 1, 1], [], []>} : vector<2x15xf32>, vector<15x256xf32>, vector<2x256xf32> -> vector<2x256xf32>
    %54 = arith.addf %53, %4 : vector<2x256xf32>
    %55 = arith.index_cast %c5_i32 : i32 to index
    %c0_32 = arith.constant 0 : index
    %c0_33 = arith.constant 0 : index
    %56 = vector.load %arg10[%55, %c0_32, %c0_33] : memref<8x2x256xf32, #tpu.memory_space<vmem>>, vector<1x2x256xf32>
    %57 = vector.shape_cast %56 : vector<1x2x256xf32> to vector<2x256xf32>
    %58 = vector.shape_cast %54 : vector<2x256xf32> to vector<1x2x256xf32>
    tpu.vector_store %arg10[%55, %c0_32, %c0_33], %58 {strides = array<i32>} : memref<8x2x256xf32, #tpu.memory_space<vmem>>, vector<1x2x256xf32>,
    %c6_i32 = arith.constant 6 : i32
    %59 = arith.index_cast %c6_i32 : i32 to index
    %c0_34 = arith.constant 0 : index
    %c0_35 = arith.constant 0 : index
    %60 = vector.load %arg0[%59, %c0_34, %c0_35] : memref<8x2x15xf32, #tpu.memory_space<vmem>>, vector<1x2x15xf32>
    %61 = vector.shape_cast %60 : vector<1x2x15xf32> to vector<2x15xf32>
    %cst_36 = arith.constant dense<0.000000e+00> : vector<2x256xf32>
    %62 = tpu.matmul %61, %0, %cst_36 {dimension_numbers = #tpu.dot_dimension_numbers<[1], [0], [0], [1], [0, 0, 1, 1], [], []>} : vector<2x15xf32>, vector<15x256xf32>, vector<2x256xf32> -> vector<2x256xf32>
    %63 = arith.addf %62, %4 : vector<2x256xf32>
    %64 = arith.index_cast %c6_i32 : i32 to index
    %c0_37 = arith.constant 0 : index
    %c0_38 = arith.constant 0 : index
    %65 = vector.load %arg10[%64, %c0_37, %c0_38] : memref<8x2x256xf32, #tpu.memory_space<vmem>>, vector<1x2x256xf32>
    %66 = vector.shape_cast %65 : vector<1x2x256xf32> to vector<2x256xf32>
    %67 = vector.shape_cast %63 : vector<2x256xf32> to vector<1x2x256xf32>
    tpu.vector_store %arg10[%64, %c0_37, %c0_38], %67 {strides = array<i32>} : memref<8x2x256xf32, #tpu.memory_space<vmem>>, vector<1x2x256xf32>,
    %c7_i32 = arith.constant 7 : i32
    %68 = arith.index_cast %c7_i32 : i32 to index
    %c0_39 = arith.constant 0 : index
    %c0_40 = arith.constant 0 : index
    %69 = vector.load %arg0[%68, %c0_39, %c0_40] : memref<8x2x15xf32, #tpu.memory_space<vmem>>, vector<1x2x15xf32>
    %70 = vector.shape_cast %69 : vector<1x2x15xf32> to vector<2x15xf32>
    %cst_41 = arith.constant dense<0.000000e+00> : vector<2x256xf32>
    %71 = tpu.matmul %70, %0, %cst_41 {dimension_numbers = #tpu.dot_dimension_numbers<[1], [0], [0], [1], [0, 0, 1, 1], [], []>} : vector<2x15xf32>, vector<15x256xf32>, vector<2x256xf32> -> vector<2x256xf32>
    %72 = arith.addf %71, %4 : vector<2x256xf32>
    %73 = arith.index_cast %c7_i32 : i32 to index
    %c0_42 = arith.constant 0 : index
    %c0_43 = arith.constant 0 : index
    %74 = vector.load %arg10[%73, %c0_42, %c0_43] : memref<8x2x256xf32, #tpu.memory_space<vmem>>, vector<1x2x256xf32>
    %75 = vector.shape_cast %74 : vector<1x2x256xf32> to vector<2x256xf32>
    %76 = vector.shape_cast %72 : vector<2x256xf32> to vector<1x2x256xf32>
    tpu.vector_store %arg10[%73, %c0_42, %c0_43], %76 {strides = array<i32>} : memref<8x2x256xf32, #tpu.memory_space<vmem>>, vector<1x2x256xf32>,
    %c8_i32 = arith.constant 8 : i32
    %cst_44 = arith.constant 0.000000e+00 : f32
    %77 = vector.broadcast %cst_44 : f32 to vector<2x64xf32>
    %c0_i32_45 = arith.constant 0 : i32
    %c7_i32_46 = arith.constant 7 : i32
    %78 = arith.subi %c7_i32_46, %c0_i32_45 : i32
    %79 = arith.index_cast %c0_i32_45 : i32 to index
    %c0_47 = arith.constant 0 : index
    %c0_48 = arith.constant 0 : index
    %80 = vector.load %arg10[%79, %c0_47, %c0_48] : memref<8x2x256xf32, #tpu.memory_space<vmem>>, vector<1x2x256xf32>
    %81 = vector.shape_cast %80 : vector<1x2x256xf32> to vector<2x256xf32>
    %82 = arith.index_cast %78 : i32 to index
    %c0_49 = arith.constant 0 : index
    %c0_50 = arith.constant 0 : index
    %83 = vector.load %arg10[%82, %c0_49, %c0_50] : memref<8x2x256xf32, #tpu.memory_space<vmem>>, vector<1x2x256xf32>
    %84 = vector.shape_cast %83 : vector<1x2x256xf32> to vector<2x256xf32>
    %85 = vector.extract_strided_slice %81 {offsets = [0, 0], sizes = [2, 128], strides = [1, 1]} : vector<2x256xf32> to vector<2x128xf32>
    %86 = vector.extract_strided_slice %84 {offsets = [0, 128], sizes = [2, 128], strides = [1, 1]} : vector<2x256xf32> to vector<2x128xf32>
    %87 = tpu.concatenate %85, %86 in 1 : vector<2x128xf32>, vector<2x128xf32> -> vector<2x256xf32>
    %cst_51 = arith.constant dense<0.000000e+00> : vector<2x256xf32>
    %88 = tpu.matmul %77, %1, %cst_51 {dimension_numbers = #tpu.dot_dimension_numbers<[1], [0], [0], [1], [0, 0, 1, 1], [], []>} : vector<2x64xf32>, vector<64x256xf32>, vector<2x256xf32> -> vector<2x256xf32>
    %89 = arith.addf %87, %88 : vector<2x256xf32>
    %90 = vector.extract_strided_slice %89 {offsets = [0, 0], sizes = [2, 32], strides = [1, 1]} : vector<2x256xf32> to vector<2x32xf32>
    %91 = arith.negf %90 : vector<2x32xf32>
    %92 = math.exp %91 : vector<2x32xf32>
    %cst_52 = arith.constant 1.000000e+00 : f32
    %93 = vector.broadcast %cst_52 : f32 to vector<2x32xf32>
    %94 = arith.addf %93, %92 : vector<2x32xf32>
    %95 = arith.divf %93, %94 : vector<2x32xf32>
    %96 = vector.extract_strided_slice %89 {offsets = [0, 32], sizes = [2, 32], strides = [1, 1]} : vector<2x256xf32> to vector<2x32xf32>
    %97 = arith.negf %96 : vector<2x32xf32>
    %98 = math.exp %97 : vector<2x32xf32>
    %cst_53 = arith.constant 1.000000e+00 : f32
    %99 = vector.broadcast %cst_53 : f32 to vector<2x32xf32>
    %100 = arith.addf %99, %98 : vector<2x32xf32>
    %101 = arith.divf %99, %100 : vector<2x32xf32>
    %102 = vector.extract_strided_slice %89 {offsets = [0, 64], sizes = [2, 32], strides = [1, 1]} : vector<2x256xf32> to vector<2x32xf32>
    %103 = math.tanh %102 : vector<2x32xf32>
    %104 = vector.extract_strided_slice %89 {offsets = [0, 96], sizes = [2, 32], strides = [1, 1]} : vector<2x256xf32> to vector<2x32xf32>
    %105 = arith.negf %104 : vector<2x32xf32>
    %106 = math.exp %105 : vector<2x32xf32>
    %cst_54 = arith.constant 1.000000e+00 : f32
    %107 = vector.broadcast %cst_54 : f32 to vector<2x32xf32>
    %108 = arith.addf %107, %106 : vector<2x32xf32>
    %109 = arith.divf %107, %108 : vector<2x32xf32>
    %110 = vector.extract_strided_slice %89 {offsets = [0, 128], sizes = [2, 32], strides = [1, 1]} : vector<2x256xf32> to vector<2x32xf32>
    %111 = arith.negf %110 : vector<2x32xf32>
    %112 = math.exp %111 : vector<2x32xf32>
    %cst_55 = arith.constant 1.000000e+00 : f32
    %113 = vector.broadcast %cst_55 : f32 to vector<2x32xf32>
    %114 = arith.addf %113, %112 : vector<2x32xf32>
    %115 = arith.divf %113, %114 : vector<2x32xf32>
    %116 = vector.extract_strided_slice %89 {offsets = [0, 160], sizes = [2, 32], strides = [1, 1]} : vector<2x256xf32> to vector<2x32xf32>
    %117 = arith.negf %116 : vector<2x32xf32>
    %118 = math.exp %117 : vector<2x32xf32>
    %cst_56 = arith.constant 1.000000e+00 : f32
    %119 = vector.broadcast %cst_56 : f32 to vector<2x32xf32>
    %120 = arith.addf %119, %118 : vector<2x32xf32>
    %121 = arith.divf %119, %120 : vector<2x32xf32>
    %122 = vector.extract_strided_slice %89 {offsets = [0, 192], sizes = [2, 32], strides = [1, 1]} : vector<2x256xf32> to vector<2x32xf32>
    %123 = math.tanh %122 : vector<2x32xf32>
    %124 = vector.extract_strided_slice %89 {offsets = [0, 224], sizes = [2, 32], strides = [1, 1]} : vector<2x256xf32> to vector<2x32xf32>
    %125 = arith.negf %124 : vector<2x32xf32>
    %126 = math.exp %125 : vector<2x32xf32>
    %cst_57 = arith.constant 1.000000e+00 : f32
    %127 = vector.broadcast %cst_57 : f32 to vector<2x32xf32>
    %128 = arith.addf %127, %126 : vector<2x32xf32>
    %129 = arith.divf %127, %128 : vector<2x32xf32>
    %130 = vector.extract_strided_slice %77 {offsets = [0, 0], sizes = [2, 32], strides = [1, 1]} : vector<2x64xf32> to vector<2x32xf32>
    %131 = arith.mulf %101, %130 : vector<2x32xf32>
    %132 = arith.mulf %95, %103 : vector<2x32xf32>
    %133 = arith.addf %131, %132 : vector<2x32xf32>
    %134 = vector.extract_strided_slice %77 {offsets = [0, 32], sizes = [2, 32], strides = [1, 1]} : vector<2x64xf32> to vector<2x32xf32>
    %135 = arith.mulf %121, %134 : vector<2x32xf32>
    %136 = arith.mulf %115, %123 : vector<2x32xf32>
    %137 = arith.addf %135, %136 : vector<2x32xf32>
    %138 = math.tanh %133 : vector<2x32xf32>
    %139 = arith.mulf %109, %138 : vector<2x32xf32>
    %140 = math.tanh %137 : vector<2x32xf32>
    %141 = arith.mulf %129, %140 : vector<2x32xf32>
    %142 = arith.index_cast %c0_i32_45 : i32 to index
    %c0_58 = arith.constant 0 : index
    %c0_59 = arith.constant 0 : index
    %143 = vector.load %arg11[%142, %c0_58, %c0_59] : memref<8x2x32xf32, #tpu.memory_space<vmem>>, vector<1x2x32xf32>
    %144 = vector.shape_cast %143 : vector<1x2x32xf32> to vector<2x32xf32>
    %145 = vector.shape_cast %139 : vector<2x32xf32> to vector<1x2x32xf32>
    tpu.vector_store %arg11[%142, %c0_58, %c0_59], %145 {strides = array<i32>} : memref<8x2x32xf32, #tpu.memory_space<vmem>>, vector<1x2x32xf32>,
    %146 = arith.index_cast %78 : i32 to index
    %c0_60 = arith.constant 0 : index
    %c0_61 = arith.constant 0 : index
    %147 = vector.load %arg12[%146, %c0_60, %c0_61] : memref<8x2x32xf32, #tpu.memory_space<vmem>>, vector<1x2x32xf32>
    %148 = vector.shape_cast %147 : vector<1x2x32xf32> to vector<2x32xf32>
    %149 = vector.shape_cast %141 : vector<2x32xf32> to vector<1x2x32xf32>
    tpu.vector_store %arg12[%146, %c0_60, %c0_61], %149 {strides = array<i32>} : memref<8x2x32xf32, #tpu.memory_space<vmem>>, vector<1x2x32xf32>,
    %150 = tpu.concatenate %139, %141 in 1 : vector<2x32xf32>, vector<2x32xf32> -> vector<2x64xf32>
    %151 = tpu.concatenate %133, %137 in 1 : vector<2x32xf32>, vector<2x32xf32> -> vector<2x64xf32>
    %c1_i32_62 = arith.constant 1 : i32
    %c7_i32_63 = arith.constant 7 : i32
    %152 = arith.subi %c7_i32_63, %c1_i32_62 : i32
    %153 = arith.index_cast %c1_i32_62 : i32 to index
    %c0_64 = arith.constant 0 : index
    %c0_65 = arith.constant 0 : index
    %154 = vector.load %arg10[%153, %c0_64, %c0_65] : memref<8x2x256xf32, #tpu.memory_space<vmem>>, vector<1x2x256xf32>
    %155 = vector.shape_cast %154 : vector<1x2x256xf32> to vector<2x256xf32>
    %156 = arith.index_cast %152 : i32 to index
    %c0_66 = arith.constant 0 : index
    %c0_67 = arith.constant 0 : index
    %157 = vector.load %arg10[%156, %c0_66, %c0_67] : memref<8x2x256xf32, #tpu.memory_space<vmem>>, vector<1x2x256xf32>
    %158 = vector.shape_cast %157 : vector<1x2x256xf32> to vector<2x256xf32>
    %159 = vector.extract_strided_slice %155 {offsets = [0, 0], sizes = [2, 128], strides = [1, 1]} : vector<2x256xf32> to vector<2x128xf32>
    %160 = vector.extract_strided_slice %158 {offsets = [0, 128], sizes = [2, 128], strides = [1, 1]} : vector<2x256xf32> to vector<2x128xf32>
    %161 = tpu.concatenate %159, %160 in 1 : vector<2x128xf32>, vector<2x128xf32> -> vector<2x256xf32>
    %cst_68 = arith.constant dense<0.000000e+00> : vector<2x256xf32>
    %162 = tpu.matmul %150, %1, %cst_68 {dimension_numbers = #tpu.dot_dimension_numbers<[1], [0], [0], [1], [0, 0, 1, 1], [], []>} : vector<2x64xf32>, vector<64x256xf32>, vector<2x256xf32> -> vector<2x256xf32>
    %163 = arith.addf %161, %162 : vector<2x256xf32>
    %164 = vector.extract_strided_slice %163 {offsets = [0, 0], sizes = [2, 32], strides = [1, 1]} : vector<2x256xf32> to vector<2x32xf32>
    %165 = arith.negf %164 : vector<2x32xf32>
    %166 = math.exp %165 : vector<2x32xf32>
    %cst_69 = arith.constant 1.000000e+00 : f32
    %167 = vector.broadcast %cst_69 : f32 to vector<2x32xf32>
    %168 = arith.addf %167, %166 : vector<2x32xf32>
    %169 = arith.divf %167, %168 : vector<2x32xf32>
    %170 = vector.extract_strided_slice %163 {offsets = [0, 32], sizes = [2, 32], strides = [1, 1]} : vector<2x256xf32> to vector<2x32xf32>
    %171 = arith.negf %170 : vector<2x32xf32>
    %172 = math.exp %171 : vector<2x32xf32>
    %cst_70 = arith.constant 1.000000e+00 : f32
    %173 = vector.broadcast %cst_70 : f32 to vector<2x32xf32>
    %174 = arith.addf %173, %172 : vector<2x32xf32>
    %175 = arith.divf %173, %174 : vector<2x32xf32>
    %176 = vector.extract_strided_slice %163 {offsets = [0, 64], sizes = [2, 32], strides = [1, 1]} : vector<2x256xf32> to vector<2x32xf32>
    %177 = math.tanh %176 : vector<2x32xf32>
    %178 = vector.extract_strided_slice %163 {offsets = [0, 96], sizes = [2, 32], strides = [1, 1]} : vector<2x256xf32> to vector<2x32xf32>
    %179 = arith.negf %178 : vector<2x32xf32>
    %180 = math.exp %179 : vector<2x32xf32>
    %cst_71 = arith.constant 1.000000e+00 : f32
    %181 = vector.broadcast %cst_71 : f32 to vector<2x32xf32>
    %182 = arith.addf %181, %180 : vector<2x32xf32>
    %183 = arith.divf %181, %182 : vector<2x32xf32>
    %184 = vector.extract_strided_slice %163 {offsets = [0, 128], sizes = [2, 32], strides = [1, 1]} : vector<2x256xf32> to vector<2x32xf32>
    %185 = arith.negf %184 : vector<2x32xf32>
    %186 = math.exp %185 : vector<2x32xf32>
    %cst_72 = arith.constant 1.000000e+00 : f32
    %187 = vector.broadcast %cst_72 : f32 to vector<2x32xf32>
    %188 = arith.addf %187, %186 : vector<2x32xf32>
    %189 = arith.divf %187, %188 : vector<2x32xf32>
    %190 = vector.extract_strided_slice %163 {offsets = [0, 160], sizes = [2, 32], strides = [1, 1]} : vector<2x256xf32> to vector<2x32xf32>
    %191 = arith.negf %190 : vector<2x32xf32>
    %192 = math.exp %191 : vector<2x32xf32>
    %cst_73 = arith.constant 1.000000e+00 : f32
    %193 = vector.broadcast %cst_73 : f32 to vector<2x32xf32>
    %194 = arith.addf %193, %192 : vector<2x32xf32>
    %195 = arith.divf %193, %194 : vector<2x32xf32>
    %196 = vector.extract_strided_slice %163 {offsets = [0, 192], sizes = [2, 32], strides = [1, 1]} : vector<2x256xf32> to vector<2x32xf32>
    %197 = math.tanh %196 : vector<2x32xf32>
    %198 = vector.extract_strided_slice %163 {offsets = [0, 224], sizes = [2, 32], strides = [1, 1]} : vector<2x256xf32> to vector<2x32xf32>
    %199 = arith.negf %198 : vector<2x32xf32>
    %200 = math.exp %199 : vector<2x32xf32>
    %cst_74 = arith.constant 1.000000e+00 : f32
    %201 = vector.broadcast %cst_74 : f32 to vector<2x32xf32>
    %202 = arith.addf %201, %200 : vector<2x32xf32>
    %203 = arith.divf %201, %202 : vector<2x32xf32>
    %204 = vector.extract_strided_slice %151 {offsets = [0, 0], sizes = [2, 32], strides = [1, 1]} : vector<2x64xf32> to vector<2x32xf32>
    %205 = arith.mulf %175, %204 : vector<2x32xf32>
    %206 = arith.mulf %169, %177 : vector<2x32xf32>
    %207 = arith.addf %205, %206 : vector<2x32xf32>
    %208 = vector.extract_strided_slice %151 {offsets = [0, 32], sizes = [2, 32], strides = [1, 1]} : vector<2x64xf32> to vector<2x32xf32>
    %209 = arith.mulf %195, %208 : vector<2x32xf32>
    %210 = arith.mulf %189, %197 : vector<2x32xf32>
    %211 = arith.addf %209, %210 : vector<2x32xf32>
    %212 = math.tanh %207 : vector<2x32xf32>
    %213 = arith.mulf %183, %212 : vector<2x32xf32>
    %214 = math.tanh %211 : vector<2x32xf32>
    %215 = arith.mulf %203, %214 : vector<2x32xf32>
    %216 = arith.index_cast %c1_i32_62 : i32 to index
    %c0_75 = arith.constant 0 : index
    %c0_76 = arith.constant 0 : index
    %217 = vector.load %arg11[%216, %c0_75, %c0_76] : memref<8x2x32xf32, #tpu.memory_space<vmem>>, vector<1x2x32xf32>
    %218 = vector.shape_cast %217 : vector<1x2x32xf32> to vector<2x32xf32>
    %219 = vector.shape_cast %213 : vector<2x32xf32> to vector<1x2x32xf32>
    tpu.vector_store %arg11[%216, %c0_75, %c0_76], %219 {strides = array<i32>} : memref<8x2x32xf32, #tpu.memory_space<vmem>>, vector<1x2x32xf32>,
    %220 = arith.index_cast %152 : i32 to index
    %c0_77 = arith.constant 0 : index
    %c0_78 = arith.constant 0 : index
    %221 = vector.load %arg12[%220, %c0_77, %c0_78] : memref<8x2x32xf32, #tpu.memory_space<vmem>>, vector<1x2x32xf32>
    %222 = vector.shape_cast %221 : vector<1x2x32xf32> to vector<2x32xf32>
    %223 = vector.shape_cast %215 : vector<2x32xf32> to vector<1x2x32xf32>
    tpu.vector_store %arg12[%220, %c0_77, %c0_78], %223 {strides = array<i32>} : memref<8x2x32xf32, #tpu.memory_space<vmem>>, vector<1x2x32xf32>,
    %224 = tpu.concatenate %213, %215 in 1 : vector<2x32xf32>, vector<2x32xf32> -> vector<2x64xf32>
    %225 = tpu.concatenate %207, %211 in 1 : vector<2x32xf32>, vector<2x32xf32> -> vector<2x64xf32>
    %c2_i32_79 = arith.constant 2 : i32
    %c7_i32_80 = arith.constant 7 : i32
    %226 = arith.subi %c7_i32_80, %c2_i32_79 : i32
    %227 = arith.index_cast %c2_i32_79 : i32 to index
    %c0_81 = arith.constant 0 : index
    %c0_82 = arith.constant 0 : index
    %228 = vector.load %arg10[%227, %c0_81, %c0_82] : memref<8x2x256xf32, #tpu.memory_space<vmem>>, vector<1x2x256xf32>
    %229 = vector.shape_cast %228 : vector<1x2x256xf32> to vector<2x256xf32>
    %230 = arith.index_cast %226 : i32 to index
    %c0_83 = arith.constant 0 : index
    %c0_84 = arith.constant 0 : index
    %231 = vector.load %arg10[%230, %c0_83, %c0_84] : memref<8x2x256xf32, #tpu.memory_space<vmem>>, vector<1x2x256xf32>
    %232 = vector.shape_cast %231 : vector<1x2x256xf32> to vector<2x256xf32>
    %233 = vector.extract_strided_slice %229 {offsets = [0, 0], sizes = [2, 128], strides = [1, 1]} : vector<2x256xf32> to vector<2x128xf32>
    %234 = vector.extract_strided_slice %232 {offsets = [0, 128], sizes = [2, 128], strides = [1, 1]} : vector<2x256xf32> to vector<2x128xf32>
    %235 = tpu.concatenate %233, %234 in 1 : vector<2x128xf32>, vector<2x128xf32> -> vector<2x256xf32>
    %cst_85 = arith.constant dense<0.000000e+00> : vector<2x256xf32>
    %236 = tpu.matmul %224, %1, %cst_85 {dimension_numbers = #tpu.dot_dimension_numbers<[1], [0], [0], [1], [0, 0, 1, 1], [], []>} : vector<2x64xf32>, vector<64x256xf32>, vector<2x256xf32> -> vector<2x256xf32>
    %237 = arith.addf %235, %236 : vector<2x256xf32>
    %238 = vector.extract_strided_slice %237 {offsets = [0, 0], sizes = [2, 32], strides = [1, 1]} : vector<2x256xf32> to vector<2x32xf32>
    %239 = arith.negf %238 : vector<2x32xf32>
    %240 = math.exp %239 : vector<2x32xf32>
    %cst_86 = arith.constant 1.000000e+00 : f32
    %241 = vector.broadcast %cst_86 : f32 to vector<2x32xf32>
    %242 = arith.addf %241, %240 : vector<2x32xf32>
    %243 = arith.divf %241, %242 : vector<2x32xf32>
    %244 = vector.extract_strided_slice %237 {offsets = [0, 32], sizes = [2, 32], strides = [1, 1]} : vector<2x256xf32> to vector<2x32xf32>
    %245 = arith.negf %244 : vector<2x32xf32>
    %246 = math.exp %245 : vector<2x32xf32>
    %cst_87 = arith.constant 1.000000e+00 : f32
    %247 = vector.broadcast %cst_87 : f32 to vector<2x32xf32>
    %248 = arith.addf %247, %246 : vector<2x32xf32>
    %249 = arith.divf %247, %248 : vector<2x32xf32>
    %250 = vector.extract_strided_slice %237 {offsets = [0, 64], sizes = [2, 32], strides = [1, 1]} : vector<2x256xf32> to vector<2x32xf32>
    %251 = math.tanh %250 : vector<2x32xf32>
    %252 = vector.extract_strided_slice %237 {offsets = [0, 96], sizes = [2, 32], strides = [1, 1]} : vector<2x256xf32> to vector<2x32xf32>
    %253 = arith.negf %252 : vector<2x32xf32>
    %254 = math.exp %253 : vector<2x32xf32>
    %cst_88 = arith.constant 1.000000e+00 : f32
    %255 = vector.broadcast %cst_88 : f32 to vector<2x32xf32>
    %256 = arith.addf %255, %254 : vector<2x32xf32>
    %257 = arith.divf %255, %256 : vector<2x32xf32>
    %258 = vector.extract_strided_slice %237 {offsets = [0, 128], sizes = [2, 32], strides = [1, 1]} : vector<2x256xf32> to vector<2x32xf32>
    %259 = arith.negf %258 : vector<2x32xf32>
    %260 = math.exp %259 : vector<2x32xf32>
    %cst_89 = arith.constant 1.000000e+00 : f32
    %261 = vector.broadcast %cst_89 : f32 to vector<2x32xf32>
    %262 = arith.addf %261, %260 : vector<2x32xf32>
    %263 = arith.divf %261, %262 : vector<2x32xf32>
    %264 = vector.extract_strided_slice %237 {offsets = [0, 160], sizes = [2, 32], strides = [1, 1]} : vector<2x256xf32> to vector<2x32xf32>
    %265 = arith.negf %264 : vector<2x32xf32>
    %266 = math.exp %265 : vector<2x32xf32>
    %cst_90 = arith.constant 1.000000e+00 : f32
    %267 = vector.broadcast %cst_90 : f32 to vector<2x32xf32>
    %268 = arith.addf %267, %266 : vector<2x32xf32>
    %269 = arith.divf %267, %268 : vector<2x32xf32>
    %270 = vector.extract_strided_slice %237 {offsets = [0, 192], sizes = [2, 32], strides = [1, 1]} : vector<2x256xf32> to vector<2x32xf32>
    %271 = math.tanh %270 : vector<2x32xf32>
    %272 = vector.extract_strided_slice %237 {offsets = [0, 224], sizes = [2, 32], strides = [1, 1]} : vector<2x256xf32> to vector<2x32xf32>
    %273 = arith.negf %272 : vector<2x32xf32>
    %274 = math.exp %273 : vector<2x32xf32>
    %cst_91 = arith.constant 1.000000e+00 : f32
    %275 = vector.broadcast %cst_91 : f32 to vector<2x32xf32>
    %276 = arith.addf %275, %274 : vector<2x32xf32>
    %277 = arith.divf %275, %276 : vector<2x32xf32>
    %278 = vector.extract_strided_slice %225 {offsets = [0, 0], sizes = [2, 32], strides = [1, 1]} : vector<2x64xf32> to vector<2x32xf32>
    %279 = arith.mulf %249, %278 : vector<2x32xf32>
    %280 = arith.mulf %243, %251 : vector<2x32xf32>
    %281 = arith.addf %279, %280 : vector<2x32xf32>
    %282 = vector.extract_strided_slice %225 {offsets = [0, 32], sizes = [2, 32], strides = [1, 1]} : vector<2x64xf32> to vector<2x32xf32>
    %283 = arith.mulf %269, %282 : vector<2x32xf32>
    %284 = arith.mulf %263, %271 : vector<2x32xf32>
    %285 = arith.addf %283, %284 : vector<2x32xf32>
    %286 = math.tanh %281 : vector<2x32xf32>
    %287 = arith.mulf %257, %286 : vector<2x32xf32>
    %288 = math.tanh %285 : vector<2x32xf32>
    %289 = arith.mulf %277, %288 : vector<2x32xf32>
    %290 = arith.index_cast %c2_i32_79 : i32 to index
    %c0_92 = arith.constant 0 : index
    %c0_93 = arith.constant 0 : index
    %291 = vector.load %arg11[%290, %c0_92, %c0_93] : memref<8x2x32xf32, #tpu.memory_space<vmem>>, vector<1x2x32xf32>
    %292 = vector.shape_cast %291 : vector<1x2x32xf32> to vector<2x32xf32>
    %293 = vector.shape_cast %287 : vector<2x32xf32> to vector<1x2x32xf32>
    tpu.vector_store %arg11[%290, %c0_92, %c0_93], %293 {strides = array<i32>} : memref<8x2x32xf32, #tpu.memory_space<vmem>>, vector<1x2x32xf32>,
    %294 = arith.index_cast %226 : i32 to index
    %c0_94 = arith.constant 0 : index
    %c0_95 = arith.constant 0 : index
    %295 = vector.load %arg12[%294, %c0_94, %c0_95] : memref<8x2x32xf32, #tpu.memory_space<vmem>>, vector<1x2x32xf32>
    %296 = vector.shape_cast %295 : vector<1x2x32xf32> to vector<2x32xf32>
    %297 = vector.shape_cast %289 : vector<2x32xf32> to vector<1x2x32xf32>
    tpu.vector_store %arg12[%294, %c0_94, %c0_95], %297 {strides = array<i32>} : memref<8x2x32xf32, #tpu.memory_space<vmem>>, vector<1x2x32xf32>,
    %298 = tpu.concatenate %287, %289 in 1 : vector<2x32xf32>, vector<2x32xf32> -> vector<2x64xf32>
    %299 = tpu.concatenate %281, %285 in 1 : vector<2x32xf32>, vector<2x32xf32> -> vector<2x64xf32>
    %c3_i32_96 = arith.constant 3 : i32
    %c7_i32_97 = arith.constant 7 : i32
    %300 = arith.subi %c7_i32_97, %c3_i32_96 : i32
    %301 = arith.index_cast %c3_i32_96 : i32 to index
    %c0_98 = arith.constant 0 : index
    %c0_99 = arith.constant 0 : index
    %302 = vector.load %arg10[%301, %c0_98, %c0_99] : memref<8x2x256xf32, #tpu.memory_space<vmem>>, vector<1x2x256xf32>
    %303 = vector.shape_cast %302 : vector<1x2x256xf32> to vector<2x256xf32>
    %304 = arith.index_cast %300 : i32 to index
    %c0_100 = arith.constant 0 : index
    %c0_101 = arith.constant 0 : index
    %305 = vector.load %arg10[%304, %c0_100, %c0_101] : memref<8x2x256xf32, #tpu.memory_space<vmem>>, vector<1x2x256xf32>
    %306 = vector.shape_cast %305 : vector<1x2x256xf32> to vector<2x256xf32>
    %307 = vector.extract_strided_slice %303 {offsets = [0, 0], sizes = [2, 128], strides = [1, 1]} : vector<2x256xf32> to vector<2x128xf32>
    %308 = vector.extract_strided_slice %306 {offsets = [0, 128], sizes = [2, 128], strides = [1, 1]} : vector<2x256xf32> to vector<2x128xf32>
    %309 = tpu.concatenate %307, %308 in 1 : vector<2x128xf32>, vector<2x128xf32> -> vector<2x256xf32>
    %cst_102 = arith.constant dense<0.000000e+00> : vector<2x256xf32>
    %310 = tpu.matmul %298, %1, %cst_102 {dimension_numbers = #tpu.dot_dimension_numbers<[1], [0], [0], [1], [0, 0, 1, 1], [], []>} : vector<2x64xf32>, vector<64x256xf32>, vector<2x256xf32> -> vector<2x256xf32>
    %311 = arith.addf %309, %310 : vector<2x256xf32>
    %312 = vector.extract_strided_slice %311 {offsets = [0, 0], sizes = [2, 32], strides = [1, 1]} : vector<2x256xf32> to vector<2x32xf32>
    %313 = arith.negf %312 : vector<2x32xf32>
    %314 = math.exp %313 : vector<2x32xf32>
    %cst_103 = arith.constant 1.000000e+00 : f32
    %315 = vector.broadcast %cst_103 : f32 to vector<2x32xf32>
    %316 = arith.addf %315, %314 : vector<2x32xf32>
    %317 = arith.divf %315, %316 : vector<2x32xf32>
    %318 = vector.extract_strided_slice %311 {offsets = [0, 32], sizes = [2, 32], strides = [1, 1]} : vector<2x256xf32> to vector<2x32xf32>
    %319 = arith.negf %318 : vector<2x32xf32>
    %320 = math.exp %319 : vector<2x32xf32>
    %cst_104 = arith.constant 1.000000e+00 : f32
    %321 = vector.broadcast %cst_104 : f32 to vector<2x32xf32>
    %322 = arith.addf %321, %320 : vector<2x32xf32>
    %323 = arith.divf %321, %322 : vector<2x32xf32>
    %324 = vector.extract_strided_slice %311 {offsets = [0, 64], sizes = [2, 32], strides = [1, 1]} : vector<2x256xf32> to vector<2x32xf32>
    %325 = math.tanh %324 : vector<2x32xf32>
    %326 = vector.extract_strided_slice %311 {offsets = [0, 96], sizes = [2, 32], strides = [1, 1]} : vector<2x256xf32> to vector<2x32xf32>
    %327 = arith.negf %326 : vector<2x32xf32>
    %328 = math.exp %327 : vector<2x32xf32>
    %cst_105 = arith.constant 1.000000e+00 : f32
    %329 = vector.broadcast %cst_105 : f32 to vector<2x32xf32>
    %330 = arith.addf %329, %328 : vector<2x32xf32>
    %331 = arith.divf %329, %330 : vector<2x32xf32>
    %332 = vector.extract_strided_slice %311 {offsets = [0, 128], sizes = [2, 32], strides = [1, 1]} : vector<2x256xf32> to vector<2x32xf32>
    %333 = arith.negf %332 : vector<2x32xf32>
    %334 = math.exp %333 : vector<2x32xf32>
    %cst_106 = arith.constant 1.000000e+00 : f32
    %335 = vector.broadcast %cst_106 : f32 to vector<2x32xf32>
    %336 = arith.addf %335, %334 : vector<2x32xf32>
    %337 = arith.divf %335, %336 : vector<2x32xf32>
    %338 = vector.extract_strided_slice %311 {offsets = [0, 160], sizes = [2, 32], strides = [1, 1]} : vector<2x256xf32> to vector<2x32xf32>
    %339 = arith.negf %338 : vector<2x32xf32>
    %340 = math.exp %339 : vector<2x32xf32>
    %cst_107 = arith.constant 1.000000e+00 : f32
    %341 = vector.broadcast %cst_107 : f32 to vector<2x32xf32>
    %342 = arith.addf %341, %340 : vector<2x32xf32>
    %343 = arith.divf %341, %342 : vector<2x32xf32>
    %344 = vector.extract_strided_slice %311 {offsets = [0, 192], sizes = [2, 32], strides = [1, 1]} : vector<2x256xf32> to vector<2x32xf32>
    %345 = math.tanh %344 : vector<2x32xf32>
    %346 = vector.extract_strided_slice %311 {offsets = [0, 224], sizes = [2, 32], strides = [1, 1]} : vector<2x256xf32> to vector<2x32xf32>
    %347 = arith.negf %346 : vector<2x32xf32>
    %348 = math.exp %347 : vector<2x32xf32>
    %cst_108 = arith.constant 1.000000e+00 : f32
    %349 = vector.broadcast %cst_108 : f32 to vector<2x32xf32>
    %350 = arith.addf %349, %348 : vector<2x32xf32>
    %351 = arith.divf %349, %350 : vector<2x32xf32>
    %352 = vector.extract_strided_slice %299 {offsets = [0, 0], sizes = [2, 32], strides = [1, 1]} : vector<2x64xf32> to vector<2x32xf32>
    %353 = arith.mulf %323, %352 : vector<2x32xf32>
    %354 = arith.mulf %317, %325 : vector<2x32xf32>
    %355 = arith.addf %353, %354 : vector<2x32xf32>
    %356 = vector.extract_strided_slice %299 {offsets = [0, 32], sizes = [2, 32], strides = [1, 1]} : vector<2x64xf32> to vector<2x32xf32>
    %357 = arith.mulf %343, %356 : vector<2x32xf32>
    %358 = arith.mulf %337, %345 : vector<2x32xf32>
    %359 = arith.addf %357, %358 : vector<2x32xf32>
    %360 = math.tanh %355 : vector<2x32xf32>
    %361 = arith.mulf %331, %360 : vector<2x32xf32>
    %362 = math.tanh %359 : vector<2x32xf32>
    %363 = arith.mulf %351, %362 : vector<2x32xf32>
    %364 = arith.index_cast %c3_i32_96 : i32 to index
    %c0_109 = arith.constant 0 : index
    %c0_110 = arith.constant 0 : index
    %365 = vector.load %arg11[%364, %c0_109, %c0_110] : memref<8x2x32xf32, #tpu.memory_space<vmem>>, vector<1x2x32xf32>
    %366 = vector.shape_cast %365 : vector<1x2x32xf32> to vector<2x32xf32>
    %367 = vector.shape_cast %361 : vector<2x32xf32> to vector<1x2x32xf32>
    tpu.vector_store %arg11[%364, %c0_109, %c0_110], %367 {strides = array<i32>} : memref<8x2x32xf32, #tpu.memory_space<vmem>>, vector<1x2x32xf32>,
    %368 = arith.index_cast %300 : i32 to index
    %c0_111 = arith.constant 0 : index
    %c0_112 = arith.constant 0 : index
    %369 = vector.load %arg12[%368, %c0_111, %c0_112] : memref<8x2x32xf32, #tpu.memory_space<vmem>>, vector<1x2x32xf32>
    %370 = vector.shape_cast %369 : vector<1x2x32xf32> to vector<2x32xf32>
    %371 = vector.shape_cast %363 : vector<2x32xf32> to vector<1x2x32xf32>
    tpu.vector_store %arg12[%368, %c0_111, %c0_112], %371 {strides = array<i32>} : memref<8x2x32xf32, #tpu.memory_space<vmem>>, vector<1x2x32xf32>,
    %372 = tpu.concatenate %361, %363 in 1 : vector<2x32xf32>, vector<2x32xf32> -> vector<2x64xf32>
    %373 = tpu.concatenate %355, %359 in 1 : vector<2x32xf32>, vector<2x32xf32> -> vector<2x64xf32>
    %c4_i32_113 = arith.constant 4 : i32
    %c7_i32_114 = arith.constant 7 : i32
    %374 = arith.subi %c7_i32_114, %c4_i32_113 : i32
    %375 = arith.index_cast %c4_i32_113 : i32 to index
    %c0_115 = arith.constant 0 : index
    %c0_116 = arith.constant 0 : index
    %376 = vector.load %arg10[%375, %c0_115, %c0_116] : memref<8x2x256xf32, #tpu.memory_space<vmem>>, vector<1x2x256xf32>
    %377 = vector.shape_cast %376 : vector<1x2x256xf32> to vector<2x256xf32>
    %378 = arith.index_cast %374 : i32 to index
    %c0_117 = arith.constant 0 : index
    %c0_118 = arith.constant 0 : index
    %379 = vector.load %arg10[%378, %c0_117, %c0_118] : memref<8x2x256xf32, #tpu.memory_space<vmem>>, vector<1x2x256xf32>
    %380 = vector.shape_cast %379 : vector<1x2x256xf32> to vector<2x256xf32>
    %381 = vector.extract_strided_slice %377 {offsets = [0, 0], sizes = [2, 128], strides = [1, 1]} : vector<2x256xf32> to vector<2x128xf32>
    %382 = vector.extract_strided_slice %380 {offsets = [0, 128], sizes = [2, 128], strides = [1, 1]} : vector<2x256xf32> to vector<2x128xf32>
    %383 = tpu.concatenate %381, %382 in 1 : vector<2x128xf32>, vector<2x128xf32> -> vector<2x256xf32>
    %cst_119 = arith.constant dense<0.000000e+00> : vector<2x256xf32>
    %384 = tpu.matmul %372, %1, %cst_119 {dimension_numbers = #tpu.dot_dimension_numbers<[1], [0], [0], [1], [0, 0, 1, 1], [], []>} : vector<2x64xf32>, vector<64x256xf32>, vector<2x256xf32> -> vector<2x256xf32>
    %385 = arith.addf %383, %384 : vector<2x256xf32>
    %386 = vector.extract_strided_slice %385 {offsets = [0, 0], sizes = [2, 32], strides = [1, 1]} : vector<2x256xf32> to vector<2x32xf32>
    %387 = arith.negf %386 : vector<2x32xf32>
    %388 = math.exp %387 : vector<2x32xf32>
    %cst_120 = arith.constant 1.000000e+00 : f32
    %389 = vector.broadcast %cst_120 : f32 to vector<2x32xf32>
    %390 = arith.addf %389, %388 : vector<2x32xf32>
    %391 = arith.divf %389, %390 : vector<2x32xf32>
    %392 = vector.extract_strided_slice %385 {offsets = [0, 32], sizes = [2, 32], strides = [1, 1]} : vector<2x256xf32> to vector<2x32xf32>
    %393 = arith.negf %392 : vector<2x32xf32>
    %394 = math.exp %393 : vector<2x32xf32>
    %cst_121 = arith.constant 1.000000e+00 : f32
    %395 = vector.broadcast %cst_121 : f32 to vector<2x32xf32>
    %396 = arith.addf %395, %394 : vector<2x32xf32>
    %397 = arith.divf %395, %396 : vector<2x32xf32>
    %398 = vector.extract_strided_slice %385 {offsets = [0, 64], sizes = [2, 32], strides = [1, 1]} : vector<2x256xf32> to vector<2x32xf32>
    %399 = math.tanh %398 : vector<2x32xf32>
    %400 = vector.extract_strided_slice %385 {offsets = [0, 96], sizes = [2, 32], strides = [1, 1]} : vector<2x256xf32> to vector<2x32xf32>
    %401 = arith.negf %400 : vector<2x32xf32>
    %402 = math.exp %401 : vector<2x32xf32>
    %cst_122 = arith.constant 1.000000e+00 : f32
    %403 = vector.broadcast %cst_122 : f32 to vector<2x32xf32>
    %404 = arith.addf %403, %402 : vector<2x32xf32>
    %405 = arith.divf %403, %404 : vector<2x32xf32>
    %406 = vector.extract_strided_slice %385 {offsets = [0, 128], sizes = [2, 32], strides = [1, 1]} : vector<2x256xf32> to vector<2x32xf32>
    %407 = arith.negf %406 : vector<2x32xf32>
    %408 = math.exp %407 : vector<2x32xf32>
    %cst_123 = arith.constant 1.000000e+00 : f32
    %409 = vector.broadcast %cst_123 : f32 to vector<2x32xf32>
    %410 = arith.addf %409, %408 : vector<2x32xf32>
    %411 = arith.divf %409, %410 : vector<2x32xf32>
    %412 = vector.extract_strided_slice %385 {offsets = [0, 160], sizes = [2, 32], strides = [1, 1]} : vector<2x256xf32> to vector<2x32xf32>
    %413 = arith.negf %412 : vector<2x32xf32>
    %414 = math.exp %413 : vector<2x32xf32>
    %cst_124 = arith.constant 1.000000e+00 : f32
    %415 = vector.broadcast %cst_124 : f32 to vector<2x32xf32>
    %416 = arith.addf %415, %414 : vector<2x32xf32>
    %417 = arith.divf %415, %416 : vector<2x32xf32>
    %418 = vector.extract_strided_slice %385 {offsets = [0, 192], sizes = [2, 32], strides = [1, 1]} : vector<2x256xf32> to vector<2x32xf32>
    %419 = math.tanh %418 : vector<2x32xf32>
    %420 = vector.extract_strided_slice %385 {offsets = [0, 224], sizes = [2, 32], strides = [1, 1]} : vector<2x256xf32> to vector<2x32xf32>
    %421 = arith.negf %420 : vector<2x32xf32>
    %422 = math.exp %421 : vector<2x32xf32>
    %cst_125 = arith.constant 1.000000e+00 : f32
    %423 = vector.broadcast %cst_125 : f32 to vector<2x32xf32>
    %424 = arith.addf %423, %422 : vector<2x32xf32>
    %425 = arith.divf %423, %424 : vector<2x32xf32>
    %426 = vector.extract_strided_slice %373 {offsets = [0, 0], sizes = [2, 32], strides = [1, 1]} : vector<2x64xf32> to vector<2x32xf32>
    %427 = arith.mulf %397, %426 : vector<2x32xf32>
    %428 = arith.mulf %391, %399 : vector<2x32xf32>
    %429 = arith.addf %427, %428 : vector<2x32xf32>
    %430 = vector.extract_strided_slice %373 {offsets = [0, 32], sizes = [2, 32], strides = [1, 1]} : vector<2x64xf32> to vector<2x32xf32>
    %431 = arith.mulf %417, %430 : vector<2x32xf32>
    %432 = arith.mulf %411, %419 : vector<2x32xf32>
    %433 = arith.addf %431, %432 : vector<2x32xf32>
    %434 = math.tanh %429 : vector<2x32xf32>
    %435 = arith.mulf %405, %434 : vector<2x32xf32>
    %436 = math.tanh %433 : vector<2x32xf32>
    %437 = arith.mulf %425, %436 : vector<2x32xf32>
    %438 = arith.index_cast %c4_i32_113 : i32 to index
    %c0_126 = arith.constant 0 : index
    %c0_127 = arith.constant 0 : index
    %439 = vector.load %arg11[%438, %c0_126, %c0_127] : memref<8x2x32xf32, #tpu.memory_space<vmem>>, vector<1x2x32xf32>
    %440 = vector.shape_cast %439 : vector<1x2x32xf32> to vector<2x32xf32>
    %441 = vector.shape_cast %435 : vector<2x32xf32> to vector<1x2x32xf32>
    tpu.vector_store %arg11[%438, %c0_126, %c0_127], %441 {strides = array<i32>} : memref<8x2x32xf32, #tpu.memory_space<vmem>>, vector<1x2x32xf32>,
    %442 = arith.index_cast %374 : i32 to index
    %c0_128 = arith.constant 0 : index
    %c0_129 = arith.constant 0 : index
    %443 = vector.load %arg12[%442, %c0_128, %c0_129] : memref<8x2x32xf32, #tpu.memory_space<vmem>>, vector<1x2x32xf32>
    %444 = vector.shape_cast %443 : vector<1x2x32xf32> to vector<2x32xf32>
    %445 = vector.shape_cast %437 : vector<2x32xf32> to vector<1x2x32xf32>
    tpu.vector_store %arg12[%442, %c0_128, %c0_129], %445 {strides = array<i32>} : memref<8x2x32xf32, #tpu.memory_space<vmem>>, vector<1x2x32xf32>,
    %446 = tpu.concatenate %435, %437 in 1 : vector<2x32xf32>, vector<2x32xf32> -> vector<2x64xf32>
    %447 = tpu.concatenate %429, %433 in 1 : vector<2x32xf32>, vector<2x32xf32> -> vector<2x64xf32>
    %c5_i32_130 = arith.constant 5 : i32
    %c7_i32_131 = arith.constant 7 : i32
    %448 = arith.subi %c7_i32_131, %c5_i32_130 : i32
    %449 = arith.index_cast %c5_i32_130 : i32 to index
    %c0_132 = arith.constant 0 : index
    %c0_133 = arith.constant 0 : index
    %450 = vector.load %arg10[%449, %c0_132, %c0_133] : memref<8x2x256xf32, #tpu.memory_space<vmem>>, vector<1x2x256xf32>
    %451 = vector.shape_cast %450 : vector<1x2x256xf32> to vector<2x256xf32>
    %452 = arith.index_cast %448 : i32 to index
    %c0_134 = arith.constant 0 : index
    %c0_135 = arith.constant 0 : index
    %453 = vector.load %arg10[%452, %c0_134, %c0_135] : memref<8x2x256xf32, #tpu.memory_space<vmem>>, vector<1x2x256xf32>
    %454 = vector.shape_cast %453 : vector<1x2x256xf32> to vector<2x256xf32>
    %455 = vector.extract_strided_slice %451 {offsets = [0, 0], sizes = [2, 128], strides = [1, 1]} : vector<2x256xf32> to vector<2x128xf32>
    %456 = vector.extract_strided_slice %454 {offsets = [0, 128], sizes = [2, 128], strides = [1, 1]} : vector<2x256xf32> to vector<2x128xf32>
    %457 = tpu.concatenate %455, %456 in 1 : vector<2x128xf32>, vector<2x128xf32> -> vector<2x256xf32>
    %cst_136 = arith.constant dense<0.000000e+00> : vector<2x256xf32>
    %458 = tpu.matmul %446, %1, %cst_136 {dimension_numbers = #tpu.dot_dimension_numbers<[1], [0], [0], [1], [0, 0, 1, 1], [], []>} : vector<2x64xf32>, vector<64x256xf32>, vector<2x256xf32> -> vector<2x256xf32>
    %459 = arith.addf %457, %458 : vector<2x256xf32>
    %460 = vector.extract_strided_slice %459 {offsets = [0, 0], sizes = [2, 32], strides = [1, 1]} : vector<2x256xf32> to vector<2x32xf32>
    %461 = arith.negf %460 : vector<2x32xf32>
    %462 = math.exp %461 : vector<2x32xf32>
    %cst_137 = arith.constant 1.000000e+00 : f32
    %463 = vector.broadcast %cst_137 : f32 to vector<2x32xf32>
    %464 = arith.addf %463, %462 : vector<2x32xf32>
    %465 = arith.divf %463, %464 : vector<2x32xf32>
    %466 = vector.extract_strided_slice %459 {offsets = [0, 32], sizes = [2, 32], strides = [1, 1]} : vector<2x256xf32> to vector<2x32xf32>
    %467 = arith.negf %466 : vector<2x32xf32>
    %468 = math.exp %467 : vector<2x32xf32>
    %cst_138 = arith.constant 1.000000e+00 : f32
    %469 = vector.broadcast %cst_138 : f32 to vector<2x32xf32>
    %470 = arith.addf %469, %468 : vector<2x32xf32>
    %471 = arith.divf %469, %470 : vector<2x32xf32>
    %472 = vector.extract_strided_slice %459 {offsets = [0, 64], sizes = [2, 32], strides = [1, 1]} : vector<2x256xf32> to vector<2x32xf32>
    %473 = math.tanh %472 : vector<2x32xf32>
    %474 = vector.extract_strided_slice %459 {offsets = [0, 96], sizes = [2, 32], strides = [1, 1]} : vector<2x256xf32> to vector<2x32xf32>
    %475 = arith.negf %474 : vector<2x32xf32>
    %476 = math.exp %475 : vector<2x32xf32>
    %cst_139 = arith.constant 1.000000e+00 : f32
    %477 = vector.broadcast %cst_139 : f32 to vector<2x32xf32>
    %478 = arith.addf %477, %476 : vector<2x32xf32>
    %479 = arith.divf %477, %478 : vector<2x32xf32>
    %480 = vector.extract_strided_slice %459 {offsets = [0, 128], sizes = [2, 32], strides = [1, 1]} : vector<2x256xf32> to vector<2x32xf32>
    %481 = arith.negf %480 : vector<2x32xf32>
    %482 = math.exp %481 : vector<2x32xf32>
    %cst_140 = arith.constant 1.000000e+00 : f32
    %483 = vector.broadcast %cst_140 : f32 to vector<2x32xf32>
    %484 = arith.addf %483, %482 : vector<2x32xf32>
    %485 = arith.divf %483, %484 : vector<2x32xf32>
    %486 = vector.extract_strided_slice %459 {offsets = [0, 160], sizes = [2, 32], strides = [1, 1]} : vector<2x256xf32> to vector<2x32xf32>
    %487 = arith.negf %486 : vector<2x32xf32>
    %488 = math.exp %487 : vector<2x32xf32>
    %cst_141 = arith.constant 1.000000e+00 : f32
    %489 = vector.broadcast %cst_141 : f32 to vector<2x32xf32>
    %490 = arith.addf %489, %488 : vector<2x32xf32>
    %491 = arith.divf %489, %490 : vector<2x32xf32>
    %492 = vector.extract_strided_slice %459 {offsets = [0, 192], sizes = [2, 32], strides = [1, 1]} : vector<2x256xf32> to vector<2x32xf32>
    %493 = math.tanh %492 : vector<2x32xf32>
    %494 = vector.extract_strided_slice %459 {offsets = [0, 224], sizes = [2, 32], strides = [1, 1]} : vector<2x256xf32> to vector<2x32xf32>
    %495 = arith.negf %494 : vector<2x32xf32>
    %496 = math.exp %495 : vector<2x32xf32>
    %cst_142 = arith.constant 1.000000e+00 : f32
    %497 = vector.broadcast %cst_142 : f32 to vector<2x32xf32>
    %498 = arith.addf %497, %496 : vector<2x32xf32>
    %499 = arith.divf %497, %498 : vector<2x32xf32>
    %500 = vector.extract_strided_slice %447 {offsets = [0, 0], sizes = [2, 32], strides = [1, 1]} : vector<2x64xf32> to vector<2x32xf32>
    %501 = arith.mulf %471, %500 : vector<2x32xf32>
    %502 = arith.mulf %465, %473 : vector<2x32xf32>
    %503 = arith.addf %501, %502 : vector<2x32xf32>
    %504 = vector.extract_strided_slice %447 {offsets = [0, 32], sizes = [2, 32], strides = [1, 1]} : vector<2x64xf32> to vector<2x32xf32>
    %505 = arith.mulf %491, %504 : vector<2x32xf32>
    %506 = arith.mulf %485, %493 : vector<2x32xf32>
    %507 = arith.addf %505, %506 : vector<2x32xf32>
    %508 = math.tanh %503 : vector<2x32xf32>
    %509 = arith.mulf %479, %508 : vector<2x32xf32>
    %510 = math.tanh %507 : vector<2x32xf32>
    %511 = arith.mulf %499, %510 : vector<2x32xf32>
    %512 = arith.index_cast %c5_i32_130 : i32 to index
    %c0_143 = arith.constant 0 : index
    %c0_144 = arith.constant 0 : index
    %513 = vector.load %arg11[%512, %c0_143, %c0_144] : memref<8x2x32xf32, #tpu.memory_space<vmem>>, vector<1x2x32xf32>
    %514 = vector.shape_cast %513 : vector<1x2x32xf32> to vector<2x32xf32>
    %515 = vector.shape_cast %509 : vector<2x32xf32> to vector<1x2x32xf32>
    tpu.vector_store %arg11[%512, %c0_143, %c0_144], %515 {strides = array<i32>} : memref<8x2x32xf32, #tpu.memory_space<vmem>>, vector<1x2x32xf32>,
    %516 = arith.index_cast %448 : i32 to index
    %c0_145 = arith.constant 0 : index
    %c0_146 = arith.constant 0 : index
    %517 = vector.load %arg12[%516, %c0_145, %c0_146] : memref<8x2x32xf32, #tpu.memory_space<vmem>>, vector<1x2x32xf32>
    %518 = vector.shape_cast %517 : vector<1x2x32xf32> to vector<2x32xf32>
    %519 = vector.shape_cast %511 : vector<2x32xf32> to vector<1x2x32xf32>
    tpu.vector_store %arg12[%516, %c0_145, %c0_146], %519 {strides = array<i32>} : memref<8x2x32xf32, #tpu.memory_space<vmem>>, vector<1x2x32xf32>,
    %520 = tpu.concatenate %509, %511 in 1 : vector<2x32xf32>, vector<2x32xf32> -> vector<2x64xf32>
    %521 = tpu.concatenate %503, %507 in 1 : vector<2x32xf32>, vector<2x32xf32> -> vector<2x64xf32>
    %c6_i32_147 = arith.constant 6 : i32
    %c7_i32_148 = arith.constant 7 : i32
    %522 = arith.subi %c7_i32_148, %c6_i32_147 : i32
    %523 = arith.index_cast %c6_i32_147 : i32 to index
    %c0_149 = arith.constant 0 : index
    %c0_150 = arith.constant 0 : index
    %524 = vector.load %arg10[%523, %c0_149, %c0_150] : memref<8x2x256xf32, #tpu.memory_space<vmem>>, vector<1x2x256xf32>
    %525 = vector.shape_cast %524 : vector<1x2x256xf32> to vector<2x256xf32>
    %526 = arith.index_cast %522 : i32 to index
    %c0_151 = arith.constant 0 : index
    %c0_152 = arith.constant 0 : index
    %527 = vector.load %arg10[%526, %c0_151, %c0_152] : memref<8x2x256xf32, #tpu.memory_space<vmem>>, vector<1x2x256xf32>
    %528 = vector.shape_cast %527 : vector<1x2x256xf32> to vector<2x256xf32>
    %529 = vector.extract_strided_slice %525 {offsets = [0, 0], sizes = [2, 128], strides = [1, 1]} : vector<2x256xf32> to vector<2x128xf32>
    %530 = vector.extract_strided_slice %528 {offsets = [0, 128], sizes = [2, 128], strides = [1, 1]} : vector<2x256xf32> to vector<2x128xf32>
    %531 = tpu.concatenate %529, %530 in 1 : vector<2x128xf32>, vector<2x128xf32> -> vector<2x256xf32>
    %cst_153 = arith.constant dense<0.000000e+00> : vector<2x256xf32>
    %532 = tpu.matmul %520, %1, %cst_153 {dimension_numbers = #tpu.dot_dimension_numbers<[1], [0], [0], [1], [0, 0, 1, 1], [], []>} : vector<2x64xf32>, vector<64x256xf32>, vector<2x256xf32> -> vector<2x256xf32>
    %533 = arith.addf %531, %532 : vector<2x256xf32>
    %534 = vector.extract_strided_slice %533 {offsets = [0, 0], sizes = [2, 32], strides = [1, 1]} : vector<2x256xf32> to vector<2x32xf32>
    %535 = arith.negf %534 : vector<2x32xf32>
    %536 = math.exp %535 : vector<2x32xf32>
    %cst_154 = arith.constant 1.000000e+00 : f32
    %537 = vector.broadcast %cst_154 : f32 to vector<2x32xf32>
    %538 = arith.addf %537, %536 : vector<2x32xf32>
    %539 = arith.divf %537, %538 : vector<2x32xf32>
    %540 = vector.extract_strided_slice %533 {offsets = [0, 32], sizes = [2, 32], strides = [1, 1]} : vector<2x256xf32> to vector<2x32xf32>
    %541 = arith.negf %540 : vector<2x32xf32>
    %542 = math.exp %541 : vector<2x32xf32>
    %cst_155 = arith.constant 1.000000e+00 : f32
    %543 = vector.broadcast %cst_155 : f32 to vector<2x32xf32>
    %544 = arith.addf %543, %542 : vector<2x32xf32>
    %545 = arith.divf %543, %544 : vector<2x32xf32>
    %546 = vector.extract_strided_slice %533 {offsets = [0, 64], sizes = [2, 32], strides = [1, 1]} : vector<2x256xf32> to vector<2x32xf32>
    %547 = math.tanh %546 : vector<2x32xf32>
    %548 = vector.extract_strided_slice %533 {offsets = [0, 96], sizes = [2, 32], strides = [1, 1]} : vector<2x256xf32> to vector<2x32xf32>
    %549 = arith.negf %548 : vector<2x32xf32>
    %550 = math.exp %549 : vector<2x32xf32>
    %cst_156 = arith.constant 1.000000e+00 : f32
    %551 = vector.broadcast %cst_156 : f32 to vector<2x32xf32>
    %552 = arith.addf %551, %550 : vector<2x32xf32>
    %553 = arith.divf %551, %552 : vector<2x32xf32>
    %554 = vector.extract_strided_slice %533 {offsets = [0, 128], sizes = [2, 32], strides = [1, 1]} : vector<2x256xf32> to vector<2x32xf32>
    %555 = arith.negf %554 : vector<2x32xf32>
    %556 = math.exp %555 : vector<2x32xf32>
    %cst_157 = arith.constant 1.000000e+00 : f32
    %557 = vector.broadcast %cst_157 : f32 to vector<2x32xf32>
    %558 = arith.addf %557, %556 : vector<2x32xf32>
    %559 = arith.divf %557, %558 : vector<2x32xf32>
    %560 = vector.extract_strided_slice %533 {offsets = [0, 160], sizes = [2, 32], strides = [1, 1]} : vector<2x256xf32> to vector<2x32xf32>
    %561 = arith.negf %560 : vector<2x32xf32>
    %562 = math.exp %561 : vector<2x32xf32>
    %cst_158 = arith.constant 1.000000e+00 : f32
    %563 = vector.broadcast %cst_158 : f32 to vector<2x32xf32>
    %564 = arith.addf %563, %562 : vector<2x32xf32>
    %565 = arith.divf %563, %564 : vector<2x32xf32>
    %566 = vector.extract_strided_slice %533 {offsets = [0, 192], sizes = [2, 32], strides = [1, 1]} : vector<2x256xf32> to vector<2x32xf32>
    %567 = math.tanh %566 : vector<2x32xf32>
    %568 = vector.extract_strided_slice %533 {offsets = [0, 224], sizes = [2, 32], strides = [1, 1]} : vector<2x256xf32> to vector<2x32xf32>
    %569 = arith.negf %568 : vector<2x32xf32>
    %570 = math.exp %569 : vector<2x32xf32>
    %cst_159 = arith.constant 1.000000e+00 : f32
    %571 = vector.broadcast %cst_159 : f32 to vector<2x32xf32>
    %572 = arith.addf %571, %570 : vector<2x32xf32>
    %573 = arith.divf %571, %572 : vector<2x32xf32>
    %574 = vector.extract_strided_slice %521 {offsets = [0, 0], sizes = [2, 32], strides = [1, 1]} : vector<2x64xf32> to vector<2x32xf32>
    %575 = arith.mulf %545, %574 : vector<2x32xf32>
    %576 = arith.mulf %539, %547 : vector<2x32xf32>
    %577 = arith.addf %575, %576 : vector<2x32xf32>
    %578 = vector.extract_strided_slice %521 {offsets = [0, 32], sizes = [2, 32], strides = [1, 1]} : vector<2x64xf32> to vector<2x32xf32>
    %579 = arith.mulf %565, %578 : vector<2x32xf32>
    %580 = arith.mulf %559, %567 : vector<2x32xf32>
    %581 = arith.addf %579, %580 : vector<2x32xf32>
    %582 = math.tanh %577 : vector<2x32xf32>
    %583 = arith.mulf %553, %582 : vector<2x32xf32>
    %584 = math.tanh %581 : vector<2x32xf32>
    %585 = arith.mulf %573, %584 : vector<2x32xf32>
    %586 = arith.index_cast %c6_i32_147 : i32 to index
    %c0_160 = arith.constant 0 : index
    %c0_161 = arith.constant 0 : index
    %587 = vector.load %arg11[%586, %c0_160, %c0_161] : memref<8x2x32xf32, #tpu.memory_space<vmem>>, vector<1x2x32xf32>
    %588 = vector.shape_cast %587 : vector<1x2x32xf32> to vector<2x32xf32>
    %589 = vector.shape_cast %583 : vector<2x32xf32> to vector<1x2x32xf32>
    tpu.vector_store %arg11[%586, %c0_160, %c0_161], %589 {strides = array<i32>} : memref<8x2x32xf32, #tpu.memory_space<vmem>>, vector<1x2x32xf32>,
    %590 = arith.index_cast %522 : i32 to index
    %c0_162 = arith.constant 0 : index
    %c0_163 = arith.constant 0 : index
    %591 = vector.load %arg12[%590, %c0_162, %c0_163] : memref<8x2x32xf32, #tpu.memory_space<vmem>>, vector<1x2x32xf32>
    %592 = vector.shape_cast %591 : vector<1x2x32xf32> to vector<2x32xf32>
    %593 = vector.shape_cast %585 : vector<2x32xf32> to vector<1x2x32xf32>
    tpu.vector_store %arg12[%590, %c0_162, %c0_163], %593 {strides = array<i32>} : memref<8x2x32xf32, #tpu.memory_space<vmem>>, vector<1x2x32xf32>,
    %594 = tpu.concatenate %583, %585 in 1 : vector<2x32xf32>, vector<2x32xf32> -> vector<2x64xf32>
    %595 = tpu.concatenate %577, %581 in 1 : vector<2x32xf32>, vector<2x32xf32> -> vector<2x64xf32>
    %c7_i32_164 = arith.constant 7 : i32
    %c7_i32_165 = arith.constant 7 : i32
    %596 = arith.subi %c7_i32_165, %c7_i32_164 : i32
    %597 = arith.index_cast %c7_i32_164 : i32 to index
    %c0_166 = arith.constant 0 : index
    %c0_167 = arith.constant 0 : index
    %598 = vector.load %arg10[%597, %c0_166, %c0_167] : memref<8x2x256xf32, #tpu.memory_space<vmem>>, vector<1x2x256xf32>
    %599 = vector.shape_cast %598 : vector<1x2x256xf32> to vector<2x256xf32>
    %600 = arith.index_cast %596 : i32 to index
    %c0_168 = arith.constant 0 : index
    %c0_169 = arith.constant 0 : index
    %601 = vector.load %arg10[%600, %c0_168, %c0_169] : memref<8x2x256xf32, #tpu.memory_space<vmem>>, vector<1x2x256xf32>
    %602 = vector.shape_cast %601 : vector<1x2x256xf32> to vector<2x256xf32>
    %603 = vector.extract_strided_slice %599 {offsets = [0, 0], sizes = [2, 128], strides = [1, 1]} : vector<2x256xf32> to vector<2x128xf32>
    %604 = vector.extract_strided_slice %602 {offsets = [0, 128], sizes = [2, 128], strides = [1, 1]} : vector<2x256xf32> to vector<2x128xf32>
    %605 = tpu.concatenate %603, %604 in 1 : vector<2x128xf32>, vector<2x128xf32> -> vector<2x256xf32>
    %cst_170 = arith.constant dense<0.000000e+00> : vector<2x256xf32>
    %606 = tpu.matmul %594, %1, %cst_170 {dimension_numbers = #tpu.dot_dimension_numbers<[1], [0], [0], [1], [0, 0, 1, 1], [], []>} : vector<2x64xf32>, vector<64x256xf32>, vector<2x256xf32> -> vector<2x256xf32>
    %607 = arith.addf %605, %606 : vector<2x256xf32>
    %608 = vector.extract_strided_slice %607 {offsets = [0, 0], sizes = [2, 32], strides = [1, 1]} : vector<2x256xf32> to vector<2x32xf32>
    %609 = arith.negf %608 : vector<2x32xf32>
    %610 = math.exp %609 : vector<2x32xf32>
    %cst_171 = arith.constant 1.000000e+00 : f32
    %611 = vector.broadcast %cst_171 : f32 to vector<2x32xf32>
    %612 = arith.addf %611, %610 : vector<2x32xf32>
    %613 = arith.divf %611, %612 : vector<2x32xf32>
    %614 = vector.extract_strided_slice %607 {offsets = [0, 32], sizes = [2, 32], strides = [1, 1]} : vector<2x256xf32> to vector<2x32xf32>
    %615 = arith.negf %614 : vector<2x32xf32>
    %616 = math.exp %615 : vector<2x32xf32>
    %cst_172 = arith.constant 1.000000e+00 : f32
    %617 = vector.broadcast %cst_172 : f32 to vector<2x32xf32>
    %618 = arith.addf %617, %616 : vector<2x32xf32>
    %619 = arith.divf %617, %618 : vector<2x32xf32>
    %620 = vector.extract_strided_slice %607 {offsets = [0, 64], sizes = [2, 32], strides = [1, 1]} : vector<2x256xf32> to vector<2x32xf32>
    %621 = math.tanh %620 : vector<2x32xf32>
    %622 = vector.extract_strided_slice %607 {offsets = [0, 96], sizes = [2, 32], strides = [1, 1]} : vector<2x256xf32> to vector<2x32xf32>
    %623 = arith.negf %622 : vector<2x32xf32>
    %624 = math.exp %623 : vector<2x32xf32>
    %cst_173 = arith.constant 1.000000e+00 : f32
    %625 = vector.broadcast %cst_173 : f32 to vector<2x32xf32>
    %626 = arith.addf %625, %624 : vector<2x32xf32>
    %627 = arith.divf %625, %626 : vector<2x32xf32>
    %628 = vector.extract_strided_slice %607 {offsets = [0, 128], sizes = [2, 32], strides = [1, 1]} : vector<2x256xf32> to vector<2x32xf32>
    %629 = arith.negf %628 : vector<2x32xf32>
    %630 = math.exp %629 : vector<2x32xf32>
    %cst_174 = arith.constant 1.000000e+00 : f32
    %631 = vector.broadcast %cst_174 : f32 to vector<2x32xf32>
    %632 = arith.addf %631, %630 : vector<2x32xf32>
    %633 = arith.divf %631, %632 : vector<2x32xf32>
    %634 = vector.extract_strided_slice %607 {offsets = [0, 160], sizes = [2, 32], strides = [1, 1]} : vector<2x256xf32> to vector<2x32xf32>
    %635 = arith.negf %634 : vector<2x32xf32>
    %636 = math.exp %635 : vector<2x32xf32>
    %cst_175 = arith.constant 1.000000e+00 : f32
    %637 = vector.broadcast %cst_175 : f32 to vector<2x32xf32>
    %638 = arith.addf %637, %636 : vector<2x32xf32>
    %639 = arith.divf %637, %638 : vector<2x32xf32>
    %640 = vector.extract_strided_slice %607 {offsets = [0, 192], sizes = [2, 32], strides = [1, 1]} : vector<2x256xf32> to vector<2x32xf32>
    %641 = math.tanh %640 : vector<2x32xf32>
    %642 = vector.extract_strided_slice %607 {offsets = [0, 224], sizes = [2, 32], strides = [1, 1]} : vector<2x256xf32> to vector<2x32xf32>
    %643 = arith.negf %642 : vector<2x32xf32>
    %644 = math.exp %643 : vector<2x32xf32>
    %cst_176 = arith.constant 1.000000e+00 : f32
    %645 = vector.broadcast %cst_176 : f32 to vector<2x32xf32>
    %646 = arith.addf %645, %644 : vector<2x32xf32>
    %647 = arith.divf %645, %646 : vector<2x32xf32>
    %648 = vector.extract_strided_slice %595 {offsets = [0, 0], sizes = [2, 32], strides = [1, 1]} : vector<2x64xf32> to vector<2x32xf32>
    %649 = arith.mulf %619, %648 : vector<2x32xf32>
    %650 = arith.mulf %613, %621 : vector<2x32xf32>
    %651 = arith.addf %649, %650 : vector<2x32xf32>
    %652 = vector.extract_strided_slice %595 {offsets = [0, 32], sizes = [2, 32], strides = [1, 1]} : vector<2x64xf32> to vector<2x32xf32>
    %653 = arith.mulf %639, %652 : vector<2x32xf32>
    %654 = arith.mulf %633, %641 : vector<2x32xf32>
    %655 = arith.addf %653, %654 : vector<2x32xf32>
    %656 = math.tanh %651 : vector<2x32xf32>
    %657 = arith.mulf %627, %656 : vector<2x32xf32>
    %658 = math.tanh %655 : vector<2x32xf32>
    %659 = arith.mulf %647, %658 : vector<2x32xf32>
    %660 = arith.index_cast %c7_i32_164 : i32 to index
    %c0_177 = arith.constant 0 : index
    %c0_178 = arith.constant 0 : index
    %661 = vector.load %arg11[%660, %c0_177, %c0_178] : memref<8x2x32xf32, #tpu.memory_space<vmem>>, vector<1x2x32xf32>
    %662 = vector.shape_cast %661 : vector<1x2x32xf32> to vector<2x32xf32>
    %663 = vector.shape_cast %657 : vector<2x32xf32> to vector<1x2x32xf32>
    tpu.vector_store %arg11[%660, %c0_177, %c0_178], %663 {strides = array<i32>} : memref<8x2x32xf32, #tpu.memory_space<vmem>>, vector<1x2x32xf32>,
    %664 = arith.index_cast %596 : i32 to index
    %c0_179 = arith.constant 0 : index
    %c0_180 = arith.constant 0 : index
    %665 = vector.load %arg12[%664, %c0_179, %c0_180] : memref<8x2x32xf32, #tpu.memory_space<vmem>>, vector<1x2x32xf32>
    %666 = vector.shape_cast %665 : vector<1x2x32xf32> to vector<2x32xf32>
    %667 = vector.shape_cast %659 : vector<2x32xf32> to vector<1x2x32xf32>
    tpu.vector_store %arg12[%664, %c0_179, %c0_180], %667 {strides = array<i32>} : memref<8x2x32xf32, #tpu.memory_space<vmem>>, vector<1x2x32xf32>,
    %668 = tpu.concatenate %657, %659 in 1 : vector<2x32xf32>, vector<2x32xf32> -> vector<2x64xf32>
    %669 = tpu.concatenate %651, %655 in 1 : vector<2x32xf32>, vector<2x32xf32> -> vector<2x64xf32>
    %c8_i32_181 = arith.constant 8 : i32
    %c0_182 = arith.constant 0 : index
    %c0_183 = arith.constant 0 : index
    %670 = vector.load %arg4[%c0_182, %c0_183] : memref<64x256xf32, #tpu.memory_space<vmem>>, vector<64x256xf32>
    %c0_184 = arith.constant 0 : index
    %c0_185 = arith.constant 0 : index
    %671 = vector.load %arg5[%c0_184, %c0_185] : memref<64x256xf32, #tpu.memory_space<vmem>>, vector<64x256xf32>
    %c0_186 = arith.constant 0 : index
    %c0_187 = arith.constant 0 : index
    %672 = vector.load %arg6[%c0_186, %c0_187] : memref<1x256xf32, #tpu.memory_space<vmem>>, vector<1x256xf32>
    %673 = vector.shape_cast %672 : vector<1x256xf32> to vector<1x256xf32>
    %674 = vector.broadcast %673 : vector<1x256xf32> to vector<2x256xf32>
    %c0_i32_188 = arith.constant 0 : i32
    %675 = arith.index_cast %c0_i32_188 : i32 to index
    %c0_189 = arith.constant 0 : index
    %c0_190 = arith.constant 0 : index
    %676 = vector.load %arg11[%675, %c0_189, %c0_190] : memref<8x2x32xf32, #tpu.memory_space<vmem>>, vector<1x2x32xf32>
    %677 = vector.shape_cast %676 : vector<1x2x32xf32> to vector<2x32xf32>
    %678 = arith.index_cast %c0_i32_188 : i32 to index
    %c0_191 = arith.constant 0 : index
    %c0_192 = arith.constant 0 : index
    %679 = vector.load %arg12[%678, %c0_191, %c0_192] : memref<8x2x32xf32, #tpu.memory_space<vmem>>, vector<1x2x32xf32>
    %680 = vector.shape_cast %679 : vector<1x2x32xf32> to vector<2x32xf32>
    %681 = tpu.concatenate %677, %680 in 1 : vector<2x32xf32>, vector<2x32xf32> -> vector<2x64xf32>
    %cst_193 = arith.constant dense<0.000000e+00> : vector<2x256xf32>
    %682 = tpu.matmul %681, %670, %cst_193 {dimension_numbers = #tpu.dot_dimension_numbers<[1], [0], [0], [1], [0, 0, 1, 1], [], []>} : vector<2x64xf32>, vector<64x256xf32>, vector<2x256xf32> -> vector<2x256xf32>
    %683 = arith.addf %682, %674 : vector<2x256xf32>
    %684 = arith.index_cast %c0_i32_188 : i32 to index
    %c0_194 = arith.constant 0 : index
    %c0_195 = arith.constant 0 : index
    %685 = vector.load %arg10[%684, %c0_194, %c0_195] : memref<8x2x256xf32, #tpu.memory_space<vmem>>, vector<1x2x256xf32>
    %686 = vector.shape_cast %685 : vector<1x2x256xf32> to vector<2x256xf32>
    %687 = vector.shape_cast %683 : vector<2x256xf32> to vector<1x2x256xf32>
    tpu.vector_store %arg10[%684, %c0_194, %c0_195], %687 {strides = array<i32>} : memref<8x2x256xf32, #tpu.memory_space<vmem>>, vector<1x2x256xf32>,
    %c1_i32_196 = arith.constant 1 : i32
    %688 = arith.index_cast %c1_i32_196 : i32 to index
    %c0_197 = arith.constant 0 : index
    %c0_198 = arith.constant 0 : index
    %689 = vector.load %arg11[%688, %c0_197, %c0_198] : memref<8x2x32xf32, #tpu.memory_space<vmem>>, vector<1x2x32xf32>
    %690 = vector.shape_cast %689 : vector<1x2x32xf32> to vector<2x32xf32>
    %691 = arith.index_cast %c1_i32_196 : i32 to index
    %c0_199 = arith.constant 0 : index
    %c0_200 = arith.constant 0 : index
    %692 = vector.load %arg12[%691, %c0_199, %c0_200] : memref<8x2x32xf32, #tpu.memory_space<vmem>>, vector<1x2x32xf32>
    %693 = vector.shape_cast %692 : vector<1x2x32xf32> to vector<2x32xf32>
    %694 = tpu.concatenate %690, %693 in 1 : vector<2x32xf32>, vector<2x32xf32> -> vector<2x64xf32>
    %cst_201 = arith.constant dense<0.000000e+00> : vector<2x256xf32>
    %695 = tpu.matmul %694, %670, %cst_201 {dimension_numbers = #tpu.dot_dimension_numbers<[1], [0], [0], [1], [0, 0, 1, 1], [], []>} : vector<2x64xf32>, vector<64x256xf32>, vector<2x256xf32> -> vector<2x256xf32>
    %696 = arith.addf %695, %674 : vector<2x256xf32>
    %697 = arith.index_cast %c1_i32_196 : i32 to index
    %c0_202 = arith.constant 0 : index
    %c0_203 = arith.constant 0 : index
    %698 = vector.load %arg10[%697, %c0_202, %c0_203] : memref<8x2x256xf32, #tpu.memory_space<vmem>>, vector<1x2x256xf32>
    %699 = vector.shape_cast %698 : vector<1x2x256xf32> to vector<2x256xf32>
    %700 = vector.shape_cast %696 : vector<2x256xf32> to vector<1x2x256xf32>
    tpu.vector_store %arg10[%697, %c0_202, %c0_203], %700 {strides = array<i32>} : memref<8x2x256xf32, #tpu.memory_space<vmem>>, vector<1x2x256xf32>,
    %c2_i32_204 = arith.constant 2 : i32
    %701 = arith.index_cast %c2_i32_204 : i32 to index
    %c0_205 = arith.constant 0 : index
    %c0_206 = arith.constant 0 : index
    %702 = vector.load %arg11[%701, %c0_205, %c0_206] : memref<8x2x32xf32, #tpu.memory_space<vmem>>, vector<1x2x32xf32>
    %703 = vector.shape_cast %702 : vector<1x2x32xf32> to vector<2x32xf32>
    %704 = arith.index_cast %c2_i32_204 : i32 to index
    %c0_207 = arith.constant 0 : index
    %c0_208 = arith.constant 0 : index
    %705 = vector.load %arg12[%704, %c0_207, %c0_208] : memref<8x2x32xf32, #tpu.memory_space<vmem>>, vector<1x2x32xf32>
    %706 = vector.shape_cast %705 : vector<1x2x32xf32> to vector<2x32xf32>
    %707 = tpu.concatenate %703, %706 in 1 : vector<2x32xf32>, vector<2x32xf32> -> vector<2x64xf32>
    %cst_209 = arith.constant dense<0.000000e+00> : vector<2x256xf32>
    %708 = tpu.matmul %707, %670, %cst_209 {dimension_numbers = #tpu.dot_dimension_numbers<[1], [0], [0], [1], [0, 0, 1, 1], [], []>} : vector<2x64xf32>, vector<64x256xf32>, vector<2x256xf32> -> vector<2x256xf32>
    %709 = arith.addf %708, %674 : vector<2x256xf32>
    %710 = arith.index_cast %c2_i32_204 : i32 to index
    %c0_210 = arith.constant 0 : index
    %c0_211 = arith.constant 0 : index
    %711 = vector.load %arg10[%710, %c0_210, %c0_211] : memref<8x2x256xf32, #tpu.memory_space<vmem>>, vector<1x2x256xf32>
    %712 = vector.shape_cast %711 : vector<1x2x256xf32> to vector<2x256xf32>
    %713 = vector.shape_cast %709 : vector<2x256xf32> to vector<1x2x256xf32>
    tpu.vector_store %arg10[%710, %c0_210, %c0_211], %713 {strides = array<i32>} : memref<8x2x256xf32, #tpu.memory_space<vmem>>, vector<1x2x256xf32>,
    %c3_i32_212 = arith.constant 3 : i32
    %714 = arith.index_cast %c3_i32_212 : i32 to index
    %c0_213 = arith.constant 0 : index
    %c0_214 = arith.constant 0 : index
    %715 = vector.load %arg11[%714, %c0_213, %c0_214] : memref<8x2x32xf32, #tpu.memory_space<vmem>>, vector<1x2x32xf32>
    %716 = vector.shape_cast %715 : vector<1x2x32xf32> to vector<2x32xf32>
    %717 = arith.index_cast %c3_i32_212 : i32 to index
    %c0_215 = arith.constant 0 : index
    %c0_216 = arith.constant 0 : index
    %718 = vector.load %arg12[%717, %c0_215, %c0_216] : memref<8x2x32xf32, #tpu.memory_space<vmem>>, vector<1x2x32xf32>
    %719 = vector.shape_cast %718 : vector<1x2x32xf32> to vector<2x32xf32>
    %720 = tpu.concatenate %716, %719 in 1 : vector<2x32xf32>, vector<2x32xf32> -> vector<2x64xf32>
    %cst_217 = arith.constant dense<0.000000e+00> : vector<2x256xf32>
    %721 = tpu.matmul %720, %670, %cst_217 {dimension_numbers = #tpu.dot_dimension_numbers<[1], [0], [0], [1], [0, 0, 1, 1], [], []>} : vector<2x64xf32>, vector<64x256xf32>, vector<2x256xf32> -> vector<2x256xf32>
    %722 = arith.addf %721, %674 : vector<2x256xf32>
    %723 = arith.index_cast %c3_i32_212 : i32 to index
    %c0_218 = arith.constant 0 : index
    %c0_219 = arith.constant 0 : index
    %724 = vector.load %arg10[%723, %c0_218, %c0_219] : memref<8x2x256xf32, #tpu.memory_space<vmem>>, vector<1x2x256xf32>
    %725 = vector.shape_cast %724 : vector<1x2x256xf32> to vector<2x256xf32>
    %726 = vector.shape_cast %722 : vector<2x256xf32> to vector<1x2x256xf32>
    tpu.vector_store %arg10[%723, %c0_218, %c0_219], %726 {strides = array<i32>} : memref<8x2x256xf32, #tpu.memory_space<vmem>>, vector<1x2x256xf32>,
    %c4_i32_220 = arith.constant 4 : i32
    %727 = arith.index_cast %c4_i32_220 : i32 to index
    %c0_221 = arith.constant 0 : index
    %c0_222 = arith.constant 0 : index
    %728 = vector.load %arg11[%727, %c0_221, %c0_222] : memref<8x2x32xf32, #tpu.memory_space<vmem>>, vector<1x2x32xf32>
    %729 = vector.shape_cast %728 : vector<1x2x32xf32> to vector<2x32xf32>
    %730 = arith.index_cast %c4_i32_220 : i32 to index
    %c0_223 = arith.constant 0 : index
    %c0_224 = arith.constant 0 : index
    %731 = vector.load %arg12[%730, %c0_223, %c0_224] : memref<8x2x32xf32, #tpu.memory_space<vmem>>, vector<1x2x32xf32>
    %732 = vector.shape_cast %731 : vector<1x2x32xf32> to vector<2x32xf32>
    %733 = tpu.concatenate %729, %732 in 1 : vector<2x32xf32>, vector<2x32xf32> -> vector<2x64xf32>
    %cst_225 = arith.constant dense<0.000000e+00> : vector<2x256xf32>
    %734 = tpu.matmul %733, %670, %cst_225 {dimension_numbers = #tpu.dot_dimension_numbers<[1], [0], [0], [1], [0, 0, 1, 1], [], []>} : vector<2x64xf32>, vector<64x256xf32>, vector<2x256xf32> -> vector<2x256xf32>
    %735 = arith.addf %734, %674 : vector<2x256xf32>
    %736 = arith.index_cast %c4_i32_220 : i32 to index
    %c0_226 = arith.constant 0 : index
    %c0_227 = arith.constant 0 : index
    %737 = vector.load %arg10[%736, %c0_226, %c0_227] : memref<8x2x256xf32, #tpu.memory_space<vmem>>, vector<1x2x256xf32>
    %738 = vector.shape_cast %737 : vector<1x2x256xf32> to vector<2x256xf32>
    %739 = vector.shape_cast %735 : vector<2x256xf32> to vector<1x2x256xf32>
    tpu.vector_store %arg10[%736, %c0_226, %c0_227], %739 {strides = array<i32>} : memref<8x2x256xf32, #tpu.memory_space<vmem>>, vector<1x2x256xf32>,
    %c5_i32_228 = arith.constant 5 : i32
    %740 = arith.index_cast %c5_i32_228 : i32 to index
    %c0_229 = arith.constant 0 : index
    %c0_230 = arith.constant 0 : index
    %741 = vector.load %arg11[%740, %c0_229, %c0_230] : memref<8x2x32xf32, #tpu.memory_space<vmem>>, vector<1x2x32xf32>
    %742 = vector.shape_cast %741 : vector<1x2x32xf32> to vector<2x32xf32>
    %743 = arith.index_cast %c5_i32_228 : i32 to index
    %c0_231 = arith.constant 0 : index
    %c0_232 = arith.constant 0 : index
    %744 = vector.load %arg12[%743, %c0_231, %c0_232] : memref<8x2x32xf32, #tpu.memory_space<vmem>>, vector<1x2x32xf32>
    %745 = vector.shape_cast %744 : vector<1x2x32xf32> to vector<2x32xf32>
    %746 = tpu.concatenate %742, %745 in 1 : vector<2x32xf32>, vector<2x32xf32> -> vector<2x64xf32>
    %cst_233 = arith.constant dense<0.000000e+00> : vector<2x256xf32>
    %747 = tpu.matmul %746, %670, %cst_233 {dimension_numbers = #tpu.dot_dimension_numbers<[1], [0], [0], [1], [0, 0, 1, 1], [], []>} : vector<2x64xf32>, vector<64x256xf32>, vector<2x256xf32> -> vector<2x256xf32>
    %748 = arith.addf %747, %674 : vector<2x256xf32>
    %749 = arith.index_cast %c5_i32_228 : i32 to index
    %c0_234 = arith.constant 0 : index
    %c0_235 = arith.constant 0 : index
    %750 = vector.load %arg10[%749, %c0_234, %c0_235] : memref<8x2x256xf32, #tpu.memory_space<vmem>>, vector<1x2x256xf32>
    %751 = vector.shape_cast %750 : vector<1x2x256xf32> to vector<2x256xf32>
    %752 = vector.shape_cast %748 : vector<2x256xf32> to vector<1x2x256xf32>
    tpu.vector_store %arg10[%749, %c0_234, %c0_235], %752 {strides = array<i32>} : memref<8x2x256xf32, #tpu.memory_space<vmem>>, vector<1x2x256xf32>,
    %c6_i32_236 = arith.constant 6 : i32
    %753 = arith.index_cast %c6_i32_236 : i32 to index
    %c0_237 = arith.constant 0 : index
    %c0_238 = arith.constant 0 : index
    %754 = vector.load %arg11[%753, %c0_237, %c0_238] : memref<8x2x32xf32, #tpu.memory_space<vmem>>, vector<1x2x32xf32>
    %755 = vector.shape_cast %754 : vector<1x2x32xf32> to vector<2x32xf32>
    %756 = arith.index_cast %c6_i32_236 : i32 to index
    %c0_239 = arith.constant 0 : index
    %c0_240 = arith.constant 0 : index
    %757 = vector.load %arg12[%756, %c0_239, %c0_240] : memref<8x2x32xf32, #tpu.memory_space<vmem>>, vector<1x2x32xf32>
    %758 = vector.shape_cast %757 : vector<1x2x32xf32> to vector<2x32xf32>
    %759 = tpu.concatenate %755, %758 in 1 : vector<2x32xf32>, vector<2x32xf32> -> vector<2x64xf32>
    %cst_241 = arith.constant dense<0.000000e+00> : vector<2x256xf32>
    %760 = tpu.matmul %759, %670, %cst_241 {dimension_numbers = #tpu.dot_dimension_numbers<[1], [0], [0], [1], [0, 0, 1, 1], [], []>} : vector<2x64xf32>, vector<64x256xf32>, vector<2x256xf32> -> vector<2x256xf32>
    %761 = arith.addf %760, %674 : vector<2x256xf32>
    %762 = arith.index_cast %c6_i32_236 : i32 to index
    %c0_242 = arith.constant 0 : index
    %c0_243 = arith.constant 0 : index
    %763 = vector.load %arg10[%762, %c0_242, %c0_243] : memref<8x2x256xf32, #tpu.memory_space<vmem>>, vector<1x2x256xf32>
    %764 = vector.shape_cast %763 : vector<1x2x256xf32> to vector<2x256xf32>
    %765 = vector.shape_cast %761 : vector<2x256xf32> to vector<1x2x256xf32>
    tpu.vector_store %arg10[%762, %c0_242, %c0_243], %765 {strides = array<i32>} : memref<8x2x256xf32, #tpu.memory_space<vmem>>, vector<1x2x256xf32>,
    %c7_i32_244 = arith.constant 7 : i32
    %766 = arith.index_cast %c7_i32_244 : i32 to index
    %c0_245 = arith.constant 0 : index
    %c0_246 = arith.constant 0 : index
    %767 = vector.load %arg11[%766, %c0_245, %c0_246] : memref<8x2x32xf32, #tpu.memory_space<vmem>>, vector<1x2x32xf32>
    %768 = vector.shape_cast %767 : vector<1x2x32xf32> to vector<2x32xf32>
    %769 = arith.index_cast %c7_i32_244 : i32 to index
    %c0_247 = arith.constant 0 : index
    %c0_248 = arith.constant 0 : index
    %770 = vector.load %arg12[%769, %c0_247, %c0_248] : memref<8x2x32xf32, #tpu.memory_space<vmem>>, vector<1x2x32xf32>
    %771 = vector.shape_cast %770 : vector<1x2x32xf32> to vector<2x32xf32>
    %772 = tpu.concatenate %768, %771 in 1 : vector<2x32xf32>, vector<2x32xf32> -> vector<2x64xf32>
    %cst_249 = arith.constant dense<0.000000e+00> : vector<2x256xf32>
    %773 = tpu.matmul %772, %670, %cst_249 {dimension_numbers = #tpu.dot_dimension_numbers<[1], [0], [0], [1], [0, 0, 1, 1], [], []>} : vector<2x64xf32>, vector<64x256xf32>, vector<2x256xf32> -> vector<2x256xf32>
    %774 = arith.addf %773, %674 : vector<2x256xf32>
    %775 = arith.index_cast %c7_i32_244 : i32 to index
    %c0_250 = arith.constant 0 : index
    %c0_251 = arith.constant 0 : index
    %776 = vector.load %arg10[%775, %c0_250, %c0_251] : memref<8x2x256xf32, #tpu.memory_space<vmem>>, vector<1x2x256xf32>
    %777 = vector.shape_cast %776 : vector<1x2x256xf32> to vector<2x256xf32>
    %778 = vector.shape_cast %774 : vector<2x256xf32> to vector<1x2x256xf32>
    tpu.vector_store %arg10[%775, %c0_250, %c0_251], %778 {strides = array<i32>} : memref<8x2x256xf32, #tpu.memory_space<vmem>>, vector<1x2x256xf32>,
    %c8_i32_252 = arith.constant 8 : i32
    %cst_253 = arith.constant 0.000000e+00 : f32
    %779 = vector.broadcast %cst_253 : f32 to vector<2x64xf32>
    %c0_i32_254 = arith.constant 0 : i32
    %c7_i32_255 = arith.constant 7 : i32
    %780 = arith.subi %c7_i32_255, %c0_i32_254 : i32
    %781 = arith.index_cast %c0_i32_254 : i32 to index
    %c0_256 = arith.constant 0 : index
    %c0_257 = arith.constant 0 : index
    %782 = vector.load %arg10[%781, %c0_256, %c0_257] : memref<8x2x256xf32, #tpu.memory_space<vmem>>, vector<1x2x256xf32>
    %783 = vector.shape_cast %782 : vector<1x2x256xf32> to vector<2x256xf32>
    %784 = arith.index_cast %780 : i32 to index
    %c0_258 = arith.constant 0 : index
    %c0_259 = arith.constant 0 : index
    %785 = vector.load %arg10[%784, %c0_258, %c0_259] : memref<8x2x256xf32, #tpu.memory_space<vmem>>, vector<1x2x256xf32>
    %786 = vector.shape_cast %785 : vector<1x2x256xf32> to vector<2x256xf32>
    %787 = vector.extract_strided_slice %783 {offsets = [0, 0], sizes = [2, 128], strides = [1, 1]} : vector<2x256xf32> to vector<2x128xf32>
    %788 = vector.extract_strided_slice %786 {offsets = [0, 128], sizes = [2, 128], strides = [1, 1]} : vector<2x256xf32> to vector<2x128xf32>
    %789 = tpu.concatenate %787, %788 in 1 : vector<2x128xf32>, vector<2x128xf32> -> vector<2x256xf32>
    %cst_260 = arith.constant dense<0.000000e+00> : vector<2x256xf32>
    %790 = tpu.matmul %779, %671, %cst_260 {dimension_numbers = #tpu.dot_dimension_numbers<[1], [0], [0], [1], [0, 0, 1, 1], [], []>} : vector<2x64xf32>, vector<64x256xf32>, vector<2x256xf32> -> vector<2x256xf32>
    %791 = arith.addf %789, %790 : vector<2x256xf32>
    %792 = vector.extract_strided_slice %791 {offsets = [0, 0], sizes = [2, 32], strides = [1, 1]} : vector<2x256xf32> to vector<2x32xf32>
    %793 = arith.negf %792 : vector<2x32xf32>
    %794 = math.exp %793 : vector<2x32xf32>
    %cst_261 = arith.constant 1.000000e+00 : f32
    %795 = vector.broadcast %cst_261 : f32 to vector<2x32xf32>
    %796 = arith.addf %795, %794 : vector<2x32xf32>
    %797 = arith.divf %795, %796 : vector<2x32xf32>
    %798 = vector.extract_strided_slice %791 {offsets = [0, 32], sizes = [2, 32], strides = [1, 1]} : vector<2x256xf32> to vector<2x32xf32>
    %799 = arith.negf %798 : vector<2x32xf32>
    %800 = math.exp %799 : vector<2x32xf32>
    %cst_262 = arith.constant 1.000000e+00 : f32
    %801 = vector.broadcast %cst_262 : f32 to vector<2x32xf32>
    %802 = arith.addf %801, %800 : vector<2x32xf32>
    %803 = arith.divf %801, %802 : vector<2x32xf32>
    %804 = vector.extract_strided_slice %791 {offsets = [0, 64], sizes = [2, 32], strides = [1, 1]} : vector<2x256xf32> to vector<2x32xf32>
    %805 = math.tanh %804 : vector<2x32xf32>
    %806 = vector.extract_strided_slice %791 {offsets = [0, 96], sizes = [2, 32], strides = [1, 1]} : vector<2x256xf32> to vector<2x32xf32>
    %807 = arith.negf %806 : vector<2x32xf32>
    %808 = math.exp %807 : vector<2x32xf32>
    %cst_263 = arith.constant 1.000000e+00 : f32
    %809 = vector.broadcast %cst_263 : f32 to vector<2x32xf32>
    %810 = arith.addf %809, %808 : vector<2x32xf32>
    %811 = arith.divf %809, %810 : vector<2x32xf32>
    %812 = vector.extract_strided_slice %791 {offsets = [0, 128], sizes = [2, 32], strides = [1, 1]} : vector<2x256xf32> to vector<2x32xf32>
    %813 = arith.negf %812 : vector<2x32xf32>
    %814 = math.exp %813 : vector<2x32xf32>
    %cst_264 = arith.constant 1.000000e+00 : f32
    %815 = vector.broadcast %cst_264 : f32 to vector<2x32xf32>
    %816 = arith.addf %815, %814 : vector<2x32xf32>
    %817 = arith.divf %815, %816 : vector<2x32xf32>
    %818 = vector.extract_strided_slice %791 {offsets = [0, 160], sizes = [2, 32], strides = [1, 1]} : vector<2x256xf32> to vector<2x32xf32>
    %819 = arith.negf %818 : vector<2x32xf32>
    %820 = math.exp %819 : vector<2x32xf32>
    %cst_265 = arith.constant 1.000000e+00 : f32
    %821 = vector.broadcast %cst_265 : f32 to vector<2x32xf32>
    %822 = arith.addf %821, %820 : vector<2x32xf32>
    %823 = arith.divf %821, %822 : vector<2x32xf32>
    %824 = vector.extract_strided_slice %791 {offsets = [0, 192], sizes = [2, 32], strides = [1, 1]} : vector<2x256xf32> to vector<2x32xf32>
    %825 = math.tanh %824 : vector<2x32xf32>
    %826 = vector.extract_strided_slice %791 {offsets = [0, 224], sizes = [2, 32], strides = [1, 1]} : vector<2x256xf32> to vector<2x32xf32>
    %827 = arith.negf %826 : vector<2x32xf32>
    %828 = math.exp %827 : vector<2x32xf32>
    %cst_266 = arith.constant 1.000000e+00 : f32
    %829 = vector.broadcast %cst_266 : f32 to vector<2x32xf32>
    %830 = arith.addf %829, %828 : vector<2x32xf32>
    %831 = arith.divf %829, %830 : vector<2x32xf32>
    %832 = vector.extract_strided_slice %779 {offsets = [0, 0], sizes = [2, 32], strides = [1, 1]} : vector<2x64xf32> to vector<2x32xf32>
    %833 = arith.mulf %803, %832 : vector<2x32xf32>
    %834 = arith.mulf %797, %805 : vector<2x32xf32>
    %835 = arith.addf %833, %834 : vector<2x32xf32>
    %836 = vector.extract_strided_slice %779 {offsets = [0, 32], sizes = [2, 32], strides = [1, 1]} : vector<2x64xf32> to vector<2x32xf32>
    %837 = arith.mulf %823, %836 : vector<2x32xf32>
    %838 = arith.mulf %817, %825 : vector<2x32xf32>
    %839 = arith.addf %837, %838 : vector<2x32xf32>
    %840 = math.tanh %835 : vector<2x32xf32>
    %841 = arith.mulf %811, %840 : vector<2x32xf32>
    %842 = math.tanh %839 : vector<2x32xf32>
    %843 = arith.mulf %831, %842 : vector<2x32xf32>
    %844 = arith.index_cast %c0_i32_254 : i32 to index
    %c0_267 = arith.constant 0 : index
    %c0_268 = arith.constant 0 : index
    %845 = vector.load %arg13[%844, %c0_267, %c0_268] : memref<8x2x32xf32, #tpu.memory_space<vmem>>, vector<1x2x32xf32>
    %846 = vector.shape_cast %845 : vector<1x2x32xf32> to vector<2x32xf32>
    %847 = vector.shape_cast %841 : vector<2x32xf32> to vector<1x2x32xf32>
    tpu.vector_store %arg13[%844, %c0_267, %c0_268], %847 {strides = array<i32>} : memref<8x2x32xf32, #tpu.memory_space<vmem>>, vector<1x2x32xf32>,
    %848 = arith.index_cast %780 : i32 to index
    %c0_269 = arith.constant 0 : index
    %c0_270 = arith.constant 0 : index
    %849 = vector.load %arg14[%848, %c0_269, %c0_270] : memref<8x2x32xf32, #tpu.memory_space<vmem>>, vector<1x2x32xf32>
    %850 = vector.shape_cast %849 : vector<1x2x32xf32> to vector<2x32xf32>
    %851 = vector.shape_cast %843 : vector<2x32xf32> to vector<1x2x32xf32>
    tpu.vector_store %arg14[%848, %c0_269, %c0_270], %851 {strides = array<i32>} : memref<8x2x32xf32, #tpu.memory_space<vmem>>, vector<1x2x32xf32>,
    %852 = tpu.concatenate %841, %843 in 1 : vector<2x32xf32>, vector<2x32xf32> -> vector<2x64xf32>
    %853 = tpu.concatenate %835, %839 in 1 : vector<2x32xf32>, vector<2x32xf32> -> vector<2x64xf32>
    %c1_i32_271 = arith.constant 1 : i32
    %c7_i32_272 = arith.constant 7 : i32
    %854 = arith.subi %c7_i32_272, %c1_i32_271 : i32
    %855 = arith.index_cast %c1_i32_271 : i32 to index
    %c0_273 = arith.constant 0 : index
    %c0_274 = arith.constant 0 : index
    %856 = vector.load %arg10[%855, %c0_273, %c0_274] : memref<8x2x256xf32, #tpu.memory_space<vmem>>, vector<1x2x256xf32>
    %857 = vector.shape_cast %856 : vector<1x2x256xf32> to vector<2x256xf32>
    %858 = arith.index_cast %854 : i32 to index
    %c0_275 = arith.constant 0 : index
    %c0_276 = arith.constant 0 : index
    %859 = vector.load %arg10[%858, %c0_275, %c0_276] : memref<8x2x256xf32, #tpu.memory_space<vmem>>, vector<1x2x256xf32>
    %860 = vector.shape_cast %859 : vector<1x2x256xf32> to vector<2x256xf32>
    %861 = vector.extract_strided_slice %857 {offsets = [0, 0], sizes = [2, 128], strides = [1, 1]} : vector<2x256xf32> to vector<2x128xf32>
    %862 = vector.extract_strided_slice %860 {offsets = [0, 128], sizes = [2, 128], strides = [1, 1]} : vector<2x256xf32> to vector<2x128xf32>
    %863 = tpu.concatenate %861, %862 in 1 : vector<2x128xf32>, vector<2x128xf32> -> vector<2x256xf32>
    %cst_277 = arith.constant dense<0.000000e+00> : vector<2x256xf32>
    %864 = tpu.matmul %852, %671, %cst_277 {dimension_numbers = #tpu.dot_dimension_numbers<[1], [0], [0], [1], [0, 0, 1, 1], [], []>} : vector<2x64xf32>, vector<64x256xf32>, vector<2x256xf32> -> vector<2x256xf32>
    %865 = arith.addf %863, %864 : vector<2x256xf32>
    %866 = vector.extract_strided_slice %865 {offsets = [0, 0], sizes = [2, 32], strides = [1, 1]} : vector<2x256xf32> to vector<2x32xf32>
    %867 = arith.negf %866 : vector<2x32xf32>
    %868 = math.exp %867 : vector<2x32xf32>
    %cst_278 = arith.constant 1.000000e+00 : f32
    %869 = vector.broadcast %cst_278 : f32 to vector<2x32xf32>
    %870 = arith.addf %869, %868 : vector<2x32xf32>
    %871 = arith.divf %869, %870 : vector<2x32xf32>
    %872 = vector.extract_strided_slice %865 {offsets = [0, 32], sizes = [2, 32], strides = [1, 1]} : vector<2x256xf32> to vector<2x32xf32>
    %873 = arith.negf %872 : vector<2x32xf32>
    %874 = math.exp %873 : vector<2x32xf32>
    %cst_279 = arith.constant 1.000000e+00 : f32
    %875 = vector.broadcast %cst_279 : f32 to vector<2x32xf32>
    %876 = arith.addf %875, %874 : vector<2x32xf32>
    %877 = arith.divf %875, %876 : vector<2x32xf32>
    %878 = vector.extract_strided_slice %865 {offsets = [0, 64], sizes = [2, 32], strides = [1, 1]} : vector<2x256xf32> to vector<2x32xf32>
    %879 = math.tanh %878 : vector<2x32xf32>
    %880 = vector.extract_strided_slice %865 {offsets = [0, 96], sizes = [2, 32], strides = [1, 1]} : vector<2x256xf32> to vector<2x32xf32>
    %881 = arith.negf %880 : vector<2x32xf32>
    %882 = math.exp %881 : vector<2x32xf32>
    %cst_280 = arith.constant 1.000000e+00 : f32
    %883 = vector.broadcast %cst_280 : f32 to vector<2x32xf32>
    %884 = arith.addf %883, %882 : vector<2x32xf32>
    %885 = arith.divf %883, %884 : vector<2x32xf32>
    %886 = vector.extract_strided_slice %865 {offsets = [0, 128], sizes = [2, 32], strides = [1, 1]} : vector<2x256xf32> to vector<2x32xf32>
    %887 = arith.negf %886 : vector<2x32xf32>
    %888 = math.exp %887 : vector<2x32xf32>
    %cst_281 = arith.constant 1.000000e+00 : f32
    %889 = vector.broadcast %cst_281 : f32 to vector<2x32xf32>
    %890 = arith.addf %889, %888 : vector<2x32xf32>
    %891 = arith.divf %889, %890 : vector<2x32xf32>
    %892 = vector.extract_strided_slice %865 {offsets = [0, 160], sizes = [2, 32], strides = [1, 1]} : vector<2x256xf32> to vector<2x32xf32>
    %893 = arith.negf %892 : vector<2x32xf32>
    %894 = math.exp %893 : vector<2x32xf32>
    %cst_282 = arith.constant 1.000000e+00 : f32
    %895 = vector.broadcast %cst_282 : f32 to vector<2x32xf32>
    %896 = arith.addf %895, %894 : vector<2x32xf32>
    %897 = arith.divf %895, %896 : vector<2x32xf32>
    %898 = vector.extract_strided_slice %865 {offsets = [0, 192], sizes = [2, 32], strides = [1, 1]} : vector<2x256xf32> to vector<2x32xf32>
    %899 = math.tanh %898 : vector<2x32xf32>
    %900 = vector.extract_strided_slice %865 {offsets = [0, 224], sizes = [2, 32], strides = [1, 1]} : vector<2x256xf32> to vector<2x32xf32>
    %901 = arith.negf %900 : vector<2x32xf32>
    %902 = math.exp %901 : vector<2x32xf32>
    %cst_283 = arith.constant 1.000000e+00 : f32
    %903 = vector.broadcast %cst_283 : f32 to vector<2x32xf32>
    %904 = arith.addf %903, %902 : vector<2x32xf32>
    %905 = arith.divf %903, %904 : vector<2x32xf32>
    %906 = vector.extract_strided_slice %853 {offsets = [0, 0], sizes = [2, 32], strides = [1, 1]} : vector<2x64xf32> to vector<2x32xf32>
    %907 = arith.mulf %877, %906 : vector<2x32xf32>
    %908 = arith.mulf %871, %879 : vector<2x32xf32>
    %909 = arith.addf %907, %908 : vector<2x32xf32>
    %910 = vector.extract_strided_slice %853 {offsets = [0, 32], sizes = [2, 32], strides = [1, 1]} : vector<2x64xf32> to vector<2x32xf32>
    %911 = arith.mulf %897, %910 : vector<2x32xf32>
    %912 = arith.mulf %891, %899 : vector<2x32xf32>
    %913 = arith.addf %911, %912 : vector<2x32xf32>
    %914 = math.tanh %909 : vector<2x32xf32>
    %915 = arith.mulf %885, %914 : vector<2x32xf32>
    %916 = math.tanh %913 : vector<2x32xf32>
    %917 = arith.mulf %905, %916 : vector<2x32xf32>
    %918 = arith.index_cast %c1_i32_271 : i32 to index
    %c0_284 = arith.constant 0 : index
    %c0_285 = arith.constant 0 : index
    %919 = vector.load %arg13[%918, %c0_284, %c0_285] : memref<8x2x32xf32, #tpu.memory_space<vmem>>, vector<1x2x32xf32>
    %920 = vector.shape_cast %919 : vector<1x2x32xf32> to vector<2x32xf32>
    %921 = vector.shape_cast %915 : vector<2x32xf32> to vector<1x2x32xf32>
    tpu.vector_store %arg13[%918, %c0_284, %c0_285], %921 {strides = array<i32>} : memref<8x2x32xf32, #tpu.memory_space<vmem>>, vector<1x2x32xf32>,
    %922 = arith.index_cast %854 : i32 to index
    %c0_286 = arith.constant 0 : index
    %c0_287 = arith.constant 0 : index
    %923 = vector.load %arg14[%922, %c0_286, %c0_287] : memref<8x2x32xf32, #tpu.memory_space<vmem>>, vector<1x2x32xf32>
    %924 = vector.shape_cast %923 : vector<1x2x32xf32> to vector<2x32xf32>
    %925 = vector.shape_cast %917 : vector<2x32xf32> to vector<1x2x32xf32>
    tpu.vector_store %arg14[%922, %c0_286, %c0_287], %925 {strides = array<i32>} : memref<8x2x32xf32, #tpu.memory_space<vmem>>, vector<1x2x32xf32>,
    %926 = tpu.concatenate %915, %917 in 1 : vector<2x32xf32>, vector<2x32xf32> -> vector<2x64xf32>
    %927 = tpu.concatenate %909, %913 in 1 : vector<2x32xf32>, vector<2x32xf32> -> vector<2x64xf32>
    %c2_i32_288 = arith.constant 2 : i32
    %c7_i32_289 = arith.constant 7 : i32
    %928 = arith.subi %c7_i32_289, %c2_i32_288 : i32
    %929 = arith.index_cast %c2_i32_288 : i32 to index
    %c0_290 = arith.constant 0 : index
    %c0_291 = arith.constant 0 : index
    %930 = vector.load %arg10[%929, %c0_290, %c0_291] : memref<8x2x256xf32, #tpu.memory_space<vmem>>, vector<1x2x256xf32>
    %931 = vector.shape_cast %930 : vector<1x2x256xf32> to vector<2x256xf32>
    %932 = arith.index_cast %928 : i32 to index
    %c0_292 = arith.constant 0 : index
    %c0_293 = arith.constant 0 : index
    %933 = vector.load %arg10[%932, %c0_292, %c0_293] : memref<8x2x256xf32, #tpu.memory_space<vmem>>, vector<1x2x256xf32>
    %934 = vector.shape_cast %933 : vector<1x2x256xf32> to vector<2x256xf32>
    %935 = vector.extract_strided_slice %931 {offsets = [0, 0], sizes = [2, 128], strides = [1, 1]} : vector<2x256xf32> to vector<2x128xf32>
    %936 = vector.extract_strided_slice %934 {offsets = [0, 128], sizes = [2, 128], strides = [1, 1]} : vector<2x256xf32> to vector<2x128xf32>
    %937 = tpu.concatenate %935, %936 in 1 : vector<2x128xf32>, vector<2x128xf32> -> vector<2x256xf32>
    %cst_294 = arith.constant dense<0.000000e+00> : vector<2x256xf32>
    %938 = tpu.matmul %926, %671, %cst_294 {dimension_numbers = #tpu.dot_dimension_numbers<[1], [0], [0], [1], [0, 0, 1, 1], [], []>} : vector<2x64xf32>, vector<64x256xf32>, vector<2x256xf32> -> vector<2x256xf32>
    %939 = arith.addf %937, %938 : vector<2x256xf32>
    %940 = vector.extract_strided_slice %939 {offsets = [0, 0], sizes = [2, 32], strides = [1, 1]} : vector<2x256xf32> to vector<2x32xf32>
    %941 = arith.negf %940 : vector<2x32xf32>
    %942 = math.exp %941 : vector<2x32xf32>
    %cst_295 = arith.constant 1.000000e+00 : f32
    %943 = vector.broadcast %cst_295 : f32 to vector<2x32xf32>
    %944 = arith.addf %943, %942 : vector<2x32xf32>
    %945 = arith.divf %943, %944 : vector<2x32xf32>
    %946 = vector.extract_strided_slice %939 {offsets = [0, 32], sizes = [2, 32], strides = [1, 1]} : vector<2x256xf32> to vector<2x32xf32>
    %947 = arith.negf %946 : vector<2x32xf32>
    %948 = math.exp %947 : vector<2x32xf32>
    %cst_296 = arith.constant 1.000000e+00 : f32
    %949 = vector.broadcast %cst_296 : f32 to vector<2x32xf32>
    %950 = arith.addf %949, %948 : vector<2x32xf32>
    %951 = arith.divf %949, %950 : vector<2x32xf32>
    %952 = vector.extract_strided_slice %939 {offsets = [0, 64], sizes = [2, 32], strides = [1, 1]} : vector<2x256xf32> to vector<2x32xf32>
    %953 = math.tanh %952 : vector<2x32xf32>
    %954 = vector.extract_strided_slice %939 {offsets = [0, 96], sizes = [2, 32], strides = [1, 1]} : vector<2x256xf32> to vector<2x32xf32>
    %955 = arith.negf %954 : vector<2x32xf32>
    %956 = math.exp %955 : vector<2x32xf32>
    %cst_297 = arith.constant 1.000000e+00 : f32
    %957 = vector.broadcast %cst_297 : f32 to vector<2x32xf32>
    %958 = arith.addf %957, %956 : vector<2x32xf32>
    %959 = arith.divf %957, %958 : vector<2x32xf32>
    %960 = vector.extract_strided_slice %939 {offsets = [0, 128], sizes = [2, 32], strides = [1, 1]} : vector<2x256xf32> to vector<2x32xf32>
    %961 = arith.negf %960 : vector<2x32xf32>
    %962 = math.exp %961 : vector<2x32xf32>
    %cst_298 = arith.constant 1.000000e+00 : f32
    %963 = vector.broadcast %cst_298 : f32 to vector<2x32xf32>
    %964 = arith.addf %963, %962 : vector<2x32xf32>
    %965 = arith.divf %963, %964 : vector<2x32xf32>
    %966 = vector.extract_strided_slice %939 {offsets = [0, 160], sizes = [2, 32], strides = [1, 1]} : vector<2x256xf32> to vector<2x32xf32>
    %967 = arith.negf %966 : vector<2x32xf32>
    %968 = math.exp %967 : vector<2x32xf32>
    %cst_299 = arith.constant 1.000000e+00 : f32
    %969 = vector.broadcast %cst_299 : f32 to vector<2x32xf32>
    %970 = arith.addf %969, %968 : vector<2x32xf32>
    %971 = arith.divf %969, %970 : vector<2x32xf32>
    %972 = vector.extract_strided_slice %939 {offsets = [0, 192], sizes = [2, 32], strides = [1, 1]} : vector<2x256xf32> to vector<2x32xf32>
    %973 = math.tanh %972 : vector<2x32xf32>
    %974 = vector.extract_strided_slice %939 {offsets = [0, 224], sizes = [2, 32], strides = [1, 1]} : vector<2x256xf32> to vector<2x32xf32>
    %975 = arith.negf %974 : vector<2x32xf32>
    %976 = math.exp %975 : vector<2x32xf32>
    %cst_300 = arith.constant 1.000000e+00 : f32
    %977 = vector.broadcast %cst_300 : f32 to vector<2x32xf32>
    %978 = arith.addf %977, %976 : vector<2x32xf32>
    %979 = arith.divf %977, %978 : vector<2x32xf32>
    %980 = vector.extract_strided_slice %927 {offsets = [0, 0], sizes = [2, 32], strides = [1, 1]} : vector<2x64xf32> to vector<2x32xf32>
    %981 = arith.mulf %951, %980 : vector<2x32xf32>
    %982 = arith.mulf %945, %953 : vector<2x32xf32>
    %983 = arith.addf %981, %982 : vector<2x32xf32>
    %984 = vector.extract_strided_slice %927 {offsets = [0, 32], sizes = [2, 32], strides = [1, 1]} : vector<2x64xf32> to vector<2x32xf32>
    %985 = arith.mulf %971, %984 : vector<2x32xf32>
    %986 = arith.mulf %965, %973 : vector<2x32xf32>
    %987 = arith.addf %985, %986 : vector<2x32xf32>
    %988 = math.tanh %983 : vector<2x32xf32>
    %989 = arith.mulf %959, %988 : vector<2x32xf32>
    %990 = math.tanh %987 : vector<2x32xf32>
    %991 = arith.mulf %979, %990 : vector<2x32xf32>
    %992 = arith.index_cast %c2_i32_288 : i32 to index
    %c0_301 = arith.constant 0 : index
    %c0_302 = arith.constant 0 : index
    %993 = vector.load %arg13[%992, %c0_301, %c0_302] : memref<8x2x32xf32, #tpu.memory_space<vmem>>, vector<1x2x32xf32>
    %994 = vector.shape_cast %993 : vector<1x2x32xf32> to vector<2x32xf32>
    %995 = vector.shape_cast %989 : vector<2x32xf32> to vector<1x2x32xf32>
    tpu.vector_store %arg13[%992, %c0_301, %c0_302], %995 {strides = array<i32>} : memref<8x2x32xf32, #tpu.memory_space<vmem>>, vector<1x2x32xf32>,
    %996 = arith.index_cast %928 : i32 to index
    %c0_303 = arith.constant 0 : index
    %c0_304 = arith.constant 0 : index
    %997 = vector.load %arg14[%996, %c0_303, %c0_304] : memref<8x2x32xf32, #tpu.memory_space<vmem>>, vector<1x2x32xf32>
    %998 = vector.shape_cast %997 : vector<1x2x32xf32> to vector<2x32xf32>
    %999 = vector.shape_cast %991 : vector<2x32xf32> to vector<1x2x32xf32>
    tpu.vector_store %arg14[%996, %c0_303, %c0_304], %999 {strides = array<i32>} : memref<8x2x32xf32, #tpu.memory_space<vmem>>, vector<1x2x32xf32>,
    %1000 = tpu.concatenate %989, %991 in 1 : vector<2x32xf32>, vector<2x32xf32> -> vector<2x64xf32>
    %1001 = tpu.concatenate %983, %987 in 1 : vector<2x32xf32>, vector<2x32xf32> -> vector<2x64xf32>
    %c3_i32_305 = arith.constant 3 : i32
    %c7_i32_306 = arith.constant 7 : i32
    %1002 = arith.subi %c7_i32_306, %c3_i32_305 : i32
    %1003 = arith.index_cast %c3_i32_305 : i32 to index
    %c0_307 = arith.constant 0 : index
    %c0_308 = arith.constant 0 : index
    %1004 = vector.load %arg10[%1003, %c0_307, %c0_308] : memref<8x2x256xf32, #tpu.memory_space<vmem>>, vector<1x2x256xf32>
    %1005 = vector.shape_cast %1004 : vector<1x2x256xf32> to vector<2x256xf32>
    %1006 = arith.index_cast %1002 : i32 to index
    %c0_309 = arith.constant 0 : index
    %c0_310 = arith.constant 0 : index
    %1007 = vector.load %arg10[%1006, %c0_309, %c0_310] : memref<8x2x256xf32, #tpu.memory_space<vmem>>, vector<1x2x256xf32>
    %1008 = vector.shape_cast %1007 : vector<1x2x256xf32> to vector<2x256xf32>
    %1009 = vector.extract_strided_slice %1005 {offsets = [0, 0], sizes = [2, 128], strides = [1, 1]} : vector<2x256xf32> to vector<2x128xf32>
    %1010 = vector.extract_strided_slice %1008 {offsets = [0, 128], sizes = [2, 128], strides = [1, 1]} : vector<2x256xf32> to vector<2x128xf32>
    %1011 = tpu.concatenate %1009, %1010 in 1 : vector<2x128xf32>, vector<2x128xf32> -> vector<2x256xf32>
    %cst_311 = arith.constant dense<0.000000e+00> : vector<2x256xf32>
    %1012 = tpu.matmul %1000, %671, %cst_311 {dimension_numbers = #tpu.dot_dimension_numbers<[1], [0], [0], [1], [0, 0, 1, 1], [], []>} : vector<2x64xf32>, vector<64x256xf32>, vector<2x256xf32> -> vector<2x256xf32>
    %1013 = arith.addf %1011, %1012 : vector<2x256xf32>
    %1014 = vector.extract_strided_slice %1013 {offsets = [0, 0], sizes = [2, 32], strides = [1, 1]} : vector<2x256xf32> to vector<2x32xf32>
    %1015 = arith.negf %1014 : vector<2x32xf32>
    %1016 = math.exp %1015 : vector<2x32xf32>
    %cst_312 = arith.constant 1.000000e+00 : f32
    %1017 = vector.broadcast %cst_312 : f32 to vector<2x32xf32>
    %1018 = arith.addf %1017, %1016 : vector<2x32xf32>
    %1019 = arith.divf %1017, %1018 : vector<2x32xf32>
    %1020 = vector.extract_strided_slice %1013 {offsets = [0, 32], sizes = [2, 32], strides = [1, 1]} : vector<2x256xf32> to vector<2x32xf32>
    %1021 = arith.negf %1020 : vector<2x32xf32>
    %1022 = math.exp %1021 : vector<2x32xf32>
    %cst_313 = arith.constant 1.000000e+00 : f32
    %1023 = vector.broadcast %cst_313 : f32 to vector<2x32xf32>
    %1024 = arith.addf %1023, %1022 : vector<2x32xf32>
    %1025 = arith.divf %1023, %1024 : vector<2x32xf32>
    %1026 = vector.extract_strided_slice %1013 {offsets = [0, 64], sizes = [2, 32], strides = [1, 1]} : vector<2x256xf32> to vector<2x32xf32>
    %1027 = math.tanh %1026 : vector<2x32xf32>
    %1028 = vector.extract_strided_slice %1013 {offsets = [0, 96], sizes = [2, 32], strides = [1, 1]} : vector<2x256xf32> to vector<2x32xf32>
    %1029 = arith.negf %1028 : vector<2x32xf32>
    %1030 = math.exp %1029 : vector<2x32xf32>
    %cst_314 = arith.constant 1.000000e+00 : f32
    %1031 = vector.broadcast %cst_314 : f32 to vector<2x32xf32>
    %1032 = arith.addf %1031, %1030 : vector<2x32xf32>
    %1033 = arith.divf %1031, %1032 : vector<2x32xf32>
    %1034 = vector.extract_strided_slice %1013 {offsets = [0, 128], sizes = [2, 32], strides = [1, 1]} : vector<2x256xf32> to vector<2x32xf32>
    %1035 = arith.negf %1034 : vector<2x32xf32>
    %1036 = math.exp %1035 : vector<2x32xf32>
    %cst_315 = arith.constant 1.000000e+00 : f32
    %1037 = vector.broadcast %cst_315 : f32 to vector<2x32xf32>
    %1038 = arith.addf %1037, %1036 : vector<2x32xf32>
    %1039 = arith.divf %1037, %1038 : vector<2x32xf32>
    %1040 = vector.extract_strided_slice %1013 {offsets = [0, 160], sizes = [2, 32], strides = [1, 1]} : vector<2x256xf32> to vector<2x32xf32>
    %1041 = arith.negf %1040 : vector<2x32xf32>
    %1042 = math.exp %1041 : vector<2x32xf32>
    %cst_316 = arith.constant 1.000000e+00 : f32
    %1043 = vector.broadcast %cst_316 : f32 to vector<2x32xf32>
    %1044 = arith.addf %1043, %1042 : vector<2x32xf32>
    %1045 = arith.divf %1043, %1044 : vector<2x32xf32>
    %1046 = vector.extract_strided_slice %1013 {offsets = [0, 192], sizes = [2, 32], strides = [1, 1]} : vector<2x256xf32> to vector<2x32xf32>
    %1047 = math.tanh %1046 : vector<2x32xf32>
    %1048 = vector.extract_strided_slice %1013 {offsets = [0, 224], sizes = [2, 32], strides = [1, 1]} : vector<2x256xf32> to vector<2x32xf32>
    %1049 = arith.negf %1048 : vector<2x32xf32>
    %1050 = math.exp %1049 : vector<2x32xf32>
    %cst_317 = arith.constant 1.000000e+00 : f32
    %1051 = vector.broadcast %cst_317 : f32 to vector<2x32xf32>
    %1052 = arith.addf %1051, %1050 : vector<2x32xf32>
    %1053 = arith.divf %1051, %1052 : vector<2x32xf32>
    %1054 = vector.extract_strided_slice %1001 {offsets = [0, 0], sizes = [2, 32], strides = [1, 1]} : vector<2x64xf32> to vector<2x32xf32>
    %1055 = arith.mulf %1025, %1054 : vector<2x32xf32>
    %1056 = arith.mulf %1019, %1027 : vector<2x32xf32>
    %1057 = arith.addf %1055, %1056 : vector<2x32xf32>
    %1058 = vector.extract_strided_slice %1001 {offsets = [0, 32], sizes = [2, 32], strides = [1, 1]} : vector<2x64xf32> to vector<2x32xf32>
    %1059 = arith.mulf %1045, %1058 : vector<2x32xf32>
    %1060 = arith.mulf %1039, %1047 : vector<2x32xf32>
    %1061 = arith.addf %1059, %1060 : vector<2x32xf32>
    %1062 = math.tanh %1057 : vector<2x32xf32>
    %1063 = arith.mulf %1033, %1062 : vector<2x32xf32>
    %1064 = math.tanh %1061 : vector<2x32xf32>
    %1065 = arith.mulf %1053, %1064 : vector<2x32xf32>
    %1066 = arith.index_cast %c3_i32_305 : i32 to index
    %c0_318 = arith.constant 0 : index
    %c0_319 = arith.constant 0 : index
    %1067 = vector.load %arg13[%1066, %c0_318, %c0_319] : memref<8x2x32xf32, #tpu.memory_space<vmem>>, vector<1x2x32xf32>
    %1068 = vector.shape_cast %1067 : vector<1x2x32xf32> to vector<2x32xf32>
    %1069 = vector.shape_cast %1063 : vector<2x32xf32> to vector<1x2x32xf32>
    tpu.vector_store %arg13[%1066, %c0_318, %c0_319], %1069 {strides = array<i32>} : memref<8x2x32xf32, #tpu.memory_space<vmem>>, vector<1x2x32xf32>,
    %1070 = arith.index_cast %1002 : i32 to index
    %c0_320 = arith.constant 0 : index
    %c0_321 = arith.constant 0 : index
    %1071 = vector.load %arg14[%1070, %c0_320, %c0_321] : memref<8x2x32xf32, #tpu.memory_space<vmem>>, vector<1x2x32xf32>
    %1072 = vector.shape_cast %1071 : vector<1x2x32xf32> to vector<2x32xf32>
    %1073 = vector.shape_cast %1065 : vector<2x32xf32> to vector<1x2x32xf32>
    tpu.vector_store %arg14[%1070, %c0_320, %c0_321], %1073 {strides = array<i32>} : memref<8x2x32xf32, #tpu.memory_space<vmem>>, vector<1x2x32xf32>,
    %1074 = tpu.concatenate %1063, %1065 in 1 : vector<2x32xf32>, vector<2x32xf32> -> vector<2x64xf32>
    %1075 = tpu.concatenate %1057, %1061 in 1 : vector<2x32xf32>, vector<2x32xf32> -> vector<2x64xf32>
    %c4_i32_322 = arith.constant 4 : i32
    %c7_i32_323 = arith.constant 7 : i32
    %1076 = arith.subi %c7_i32_323, %c4_i32_322 : i32
    %1077 = arith.index_cast %c4_i32_322 : i32 to index
    %c0_324 = arith.constant 0 : index
    %c0_325 = arith.constant 0 : index
    %1078 = vector.load %arg10[%1077, %c0_324, %c0_325] : memref<8x2x256xf32, #tpu.memory_space<vmem>>, vector<1x2x256xf32>
    %1079 = vector.shape_cast %1078 : vector<1x2x256xf32> to vector<2x256xf32>
    %1080 = arith.index_cast %1076 : i32 to index
    %c0_326 = arith.constant 0 : index
    %c0_327 = arith.constant 0 : index
    %1081 = vector.load %arg10[%1080, %c0_326, %c0_327] : memref<8x2x256xf32, #tpu.memory_space<vmem>>, vector<1x2x256xf32>
    %1082 = vector.shape_cast %1081 : vector<1x2x256xf32> to vector<2x256xf32>
    %1083 = vector.extract_strided_slice %1079 {offsets = [0, 0], sizes = [2, 128], strides = [1, 1]} : vector<2x256xf32> to vector<2x128xf32>
    %1084 = vector.extract_strided_slice %1082 {offsets = [0, 128], sizes = [2, 128], strides = [1, 1]} : vector<2x256xf32> to vector<2x128xf32>
    %1085 = tpu.concatenate %1083, %1084 in 1 : vector<2x128xf32>, vector<2x128xf32> -> vector<2x256xf32>
    %cst_328 = arith.constant dense<0.000000e+00> : vector<2x256xf32>
    %1086 = tpu.matmul %1074, %671, %cst_328 {dimension_numbers = #tpu.dot_dimension_numbers<[1], [0], [0], [1], [0, 0, 1, 1], [], []>} : vector<2x64xf32>, vector<64x256xf32>, vector<2x256xf32> -> vector<2x256xf32>
    %1087 = arith.addf %1085, %1086 : vector<2x256xf32>
    %1088 = vector.extract_strided_slice %1087 {offsets = [0, 0], sizes = [2, 32], strides = [1, 1]} : vector<2x256xf32> to vector<2x32xf32>
    %1089 = arith.negf %1088 : vector<2x32xf32>
    %1090 = math.exp %1089 : vector<2x32xf32>
    %cst_329 = arith.constant 1.000000e+00 : f32
    %1091 = vector.broadcast %cst_329 : f32 to vector<2x32xf32>
    %1092 = arith.addf %1091, %1090 : vector<2x32xf32>
    %1093 = arith.divf %1091, %1092 : vector<2x32xf32>
    %1094 = vector.extract_strided_slice %1087 {offsets = [0, 32], sizes = [2, 32], strides = [1, 1]} : vector<2x256xf32> to vector<2x32xf32>
    %1095 = arith.negf %1094 : vector<2x32xf32>
    %1096 = math.exp %1095 : vector<2x32xf32>
    %cst_330 = arith.constant 1.000000e+00 : f32
    %1097 = vector.broadcast %cst_330 : f32 to vector<2x32xf32>
    %1098 = arith.addf %1097, %1096 : vector<2x32xf32>
    %1099 = arith.divf %1097, %1098 : vector<2x32xf32>
    %1100 = vector.extract_strided_slice %1087 {offsets = [0, 64], sizes = [2, 32], strides = [1, 1]} : vector<2x256xf32> to vector<2x32xf32>
    %1101 = math.tanh %1100 : vector<2x32xf32>
    %1102 = vector.extract_strided_slice %1087 {offsets = [0, 96], sizes = [2, 32], strides = [1, 1]} : vector<2x256xf32> to vector<2x32xf32>
    %1103 = arith.negf %1102 : vector<2x32xf32>
    %1104 = math.exp %1103 : vector<2x32xf32>
    %cst_331 = arith.constant 1.000000e+00 : f32
    %1105 = vector.broadcast %cst_331 : f32 to vector<2x32xf32>
    %1106 = arith.addf %1105, %1104 : vector<2x32xf32>
    %1107 = arith.divf %1105, %1106 : vector<2x32xf32>
    %1108 = vector.extract_strided_slice %1087 {offsets = [0, 128], sizes = [2, 32], strides = [1, 1]} : vector<2x256xf32> to vector<2x32xf32>
    %1109 = arith.negf %1108 : vector<2x32xf32>
    %1110 = math.exp %1109 : vector<2x32xf32>
    %cst_332 = arith.constant 1.000000e+00 : f32
    %1111 = vector.broadcast %cst_332 : f32 to vector<2x32xf32>
    %1112 = arith.addf %1111, %1110 : vector<2x32xf32>
    %1113 = arith.divf %1111, %1112 : vector<2x32xf32>
    %1114 = vector.extract_strided_slice %1087 {offsets = [0, 160], sizes = [2, 32], strides = [1, 1]} : vector<2x256xf32> to vector<2x32xf32>
    %1115 = arith.negf %1114 : vector<2x32xf32>
    %1116 = math.exp %1115 : vector<2x32xf32>
    %cst_333 = arith.constant 1.000000e+00 : f32
    %1117 = vector.broadcast %cst_333 : f32 to vector<2x32xf32>
    %1118 = arith.addf %1117, %1116 : vector<2x32xf32>
    %1119 = arith.divf %1117, %1118 : vector<2x32xf32>
    %1120 = vector.extract_strided_slice %1087 {offsets = [0, 192], sizes = [2, 32], strides = [1, 1]} : vector<2x256xf32> to vector<2x32xf32>
    %1121 = math.tanh %1120 : vector<2x32xf32>
    %1122 = vector.extract_strided_slice %1087 {offsets = [0, 224], sizes = [2, 32], strides = [1, 1]} : vector<2x256xf32> to vector<2x32xf32>
    %1123 = arith.negf %1122 : vector<2x32xf32>
    %1124 = math.exp %1123 : vector<2x32xf32>
    %cst_334 = arith.constant 1.000000e+00 : f32
    %1125 = vector.broadcast %cst_334 : f32 to vector<2x32xf32>
    %1126 = arith.addf %1125, %1124 : vector<2x32xf32>
    %1127 = arith.divf %1125, %1126 : vector<2x32xf32>
    %1128 = vector.extract_strided_slice %1075 {offsets = [0, 0], sizes = [2, 32], strides = [1, 1]} : vector<2x64xf32> to vector<2x32xf32>
    %1129 = arith.mulf %1099, %1128 : vector<2x32xf32>
    %1130 = arith.mulf %1093, %1101 : vector<2x32xf32>
    %1131 = arith.addf %1129, %1130 : vector<2x32xf32>
    %1132 = vector.extract_strided_slice %1075 {offsets = [0, 32], sizes = [2, 32], strides = [1, 1]} : vector<2x64xf32> to vector<2x32xf32>
    %1133 = arith.mulf %1119, %1132 : vector<2x32xf32>
    %1134 = arith.mulf %1113, %1121 : vector<2x32xf32>
    %1135 = arith.addf %1133, %1134 : vector<2x32xf32>
    %1136 = math.tanh %1131 : vector<2x32xf32>
    %1137 = arith.mulf %1107, %1136 : vector<2x32xf32>
    %1138 = math.tanh %1135 : vector<2x32xf32>
    %1139 = arith.mulf %1127, %1138 : vector<2x32xf32>
    %1140 = arith.index_cast %c4_i32_322 : i32 to index
    %c0_335 = arith.constant 0 : index
    %c0_336 = arith.constant 0 : index
    %1141 = vector.load %arg13[%1140, %c0_335, %c0_336] : memref<8x2x32xf32, #tpu.memory_space<vmem>>, vector<1x2x32xf32>
    %1142 = vector.shape_cast %1141 : vector<1x2x32xf32> to vector<2x32xf32>
    %1143 = vector.shape_cast %1137 : vector<2x32xf32> to vector<1x2x32xf32>
    tpu.vector_store %arg13[%1140, %c0_335, %c0_336], %1143 {strides = array<i32>} : memref<8x2x32xf32, #tpu.memory_space<vmem>>, vector<1x2x32xf32>,
    %1144 = arith.index_cast %1076 : i32 to index
    %c0_337 = arith.constant 0 : index
    %c0_338 = arith.constant 0 : index
    %1145 = vector.load %arg14[%1144, %c0_337, %c0_338] : memref<8x2x32xf32, #tpu.memory_space<vmem>>, vector<1x2x32xf32>
    %1146 = vector.shape_cast %1145 : vector<1x2x32xf32> to vector<2x32xf32>
    %1147 = vector.shape_cast %1139 : vector<2x32xf32> to vector<1x2x32xf32>
    tpu.vector_store %arg14[%1144, %c0_337, %c0_338], %1147 {strides = array<i32>} : memref<8x2x32xf32, #tpu.memory_space<vmem>>, vector<1x2x32xf32>,
    %1148 = tpu.concatenate %1137, %1139 in 1 : vector<2x32xf32>, vector<2x32xf32> -> vector<2x64xf32>
    %1149 = tpu.concatenate %1131, %1135 in 1 : vector<2x32xf32>, vector<2x32xf32> -> vector<2x64xf32>
    %c5_i32_339 = arith.constant 5 : i32
    %c7_i32_340 = arith.constant 7 : i32
    %1150 = arith.subi %c7_i32_340, %c5_i32_339 : i32
    %1151 = arith.index_cast %c5_i32_339 : i32 to index
    %c0_341 = arith.constant 0 : index
    %c0_342 = arith.constant 0 : index
    %1152 = vector.load %arg10[%1151, %c0_341, %c0_342] : memref<8x2x256xf32, #tpu.memory_space<vmem>>, vector<1x2x256xf32>
    %1153 = vector.shape_cast %1152 : vector<1x2x256xf32> to vector<2x256xf32>
    %1154 = arith.index_cast %1150 : i32 to index
    %c0_343 = arith.constant 0 : index
    %c0_344 = arith.constant 0 : index
    %1155 = vector.load %arg10[%1154, %c0_343, %c0_344] : memref<8x2x256xf32, #tpu.memory_space<vmem>>, vector<1x2x256xf32>
    %1156 = vector.shape_cast %1155 : vector<1x2x256xf32> to vector<2x256xf32>
    %1157 = vector.extract_strided_slice %1153 {offsets = [0, 0], sizes = [2, 128], strides = [1, 1]} : vector<2x256xf32> to vector<2x128xf32>
    %1158 = vector.extract_strided_slice %1156 {offsets = [0, 128], sizes = [2, 128], strides = [1, 1]} : vector<2x256xf32> to vector<2x128xf32>
    %1159 = tpu.concatenate %1157, %1158 in 1 : vector<2x128xf32>, vector<2x128xf32> -> vector<2x256xf32>
    %cst_345 = arith.constant dense<0.000000e+00> : vector<2x256xf32>
    %1160 = tpu.matmul %1148, %671, %cst_345 {dimension_numbers = #tpu.dot_dimension_numbers<[1], [0], [0], [1], [0, 0, 1, 1], [], []>} : vector<2x64xf32>, vector<64x256xf32>, vector<2x256xf32> -> vector<2x256xf32>
    %1161 = arith.addf %1159, %1160 : vector<2x256xf32>
    %1162 = vector.extract_strided_slice %1161 {offsets = [0, 0], sizes = [2, 32], strides = [1, 1]} : vector<2x256xf32> to vector<2x32xf32>
    %1163 = arith.negf %1162 : vector<2x32xf32>
    %1164 = math.exp %1163 : vector<2x32xf32>
    %cst_346 = arith.constant 1.000000e+00 : f32
    %1165 = vector.broadcast %cst_346 : f32 to vector<2x32xf32>
    %1166 = arith.addf %1165, %1164 : vector<2x32xf32>
    %1167 = arith.divf %1165, %1166 : vector<2x32xf32>
    %1168 = vector.extract_strided_slice %1161 {offsets = [0, 32], sizes = [2, 32], strides = [1, 1]} : vector<2x256xf32> to vector<2x32xf32>
    %1169 = arith.negf %1168 : vector<2x32xf32>
    %1170 = math.exp %1169 : vector<2x32xf32>
    %cst_347 = arith.constant 1.000000e+00 : f32
    %1171 = vector.broadcast %cst_347 : f32 to vector<2x32xf32>
    %1172 = arith.addf %1171, %1170 : vector<2x32xf32>
    %1173 = arith.divf %1171, %1172 : vector<2x32xf32>
    %1174 = vector.extract_strided_slice %1161 {offsets = [0, 64], sizes = [2, 32], strides = [1, 1]} : vector<2x256xf32> to vector<2x32xf32>
    %1175 = math.tanh %1174 : vector<2x32xf32>
    %1176 = vector.extract_strided_slice %1161 {offsets = [0, 96], sizes = [2, 32], strides = [1, 1]} : vector<2x256xf32> to vector<2x32xf32>
    %1177 = arith.negf %1176 : vector<2x32xf32>
    %1178 = math.exp %1177 : vector<2x32xf32>
    %cst_348 = arith.constant 1.000000e+00 : f32
    %1179 = vector.broadcast %cst_348 : f32 to vector<2x32xf32>
    %1180 = arith.addf %1179, %1178 : vector<2x32xf32>
    %1181 = arith.divf %1179, %1180 : vector<2x32xf32>
    %1182 = vector.extract_strided_slice %1161 {offsets = [0, 128], sizes = [2, 32], strides = [1, 1]} : vector<2x256xf32> to vector<2x32xf32>
    %1183 = arith.negf %1182 : vector<2x32xf32>
    %1184 = math.exp %1183 : vector<2x32xf32>
    %cst_349 = arith.constant 1.000000e+00 : f32
    %1185 = vector.broadcast %cst_349 : f32 to vector<2x32xf32>
    %1186 = arith.addf %1185, %1184 : vector<2x32xf32>
    %1187 = arith.divf %1185, %1186 : vector<2x32xf32>
    %1188 = vector.extract_strided_slice %1161 {offsets = [0, 160], sizes = [2, 32], strides = [1, 1]} : vector<2x256xf32> to vector<2x32xf32>
    %1189 = arith.negf %1188 : vector<2x32xf32>
    %1190 = math.exp %1189 : vector<2x32xf32>
    %cst_350 = arith.constant 1.000000e+00 : f32
    %1191 = vector.broadcast %cst_350 : f32 to vector<2x32xf32>
    %1192 = arith.addf %1191, %1190 : vector<2x32xf32>
    %1193 = arith.divf %1191, %1192 : vector<2x32xf32>
    %1194 = vector.extract_strided_slice %1161 {offsets = [0, 192], sizes = [2, 32], strides = [1, 1]} : vector<2x256xf32> to vector<2x32xf32>
    %1195 = math.tanh %1194 : vector<2x32xf32>
    %1196 = vector.extract_strided_slice %1161 {offsets = [0, 224], sizes = [2, 32], strides = [1, 1]} : vector<2x256xf32> to vector<2x32xf32>
    %1197 = arith.negf %1196 : vector<2x32xf32>
    %1198 = math.exp %1197 : vector<2x32xf32>
    %cst_351 = arith.constant 1.000000e+00 : f32
    %1199 = vector.broadcast %cst_351 : f32 to vector<2x32xf32>
    %1200 = arith.addf %1199, %1198 : vector<2x32xf32>
    %1201 = arith.divf %1199, %1200 : vector<2x32xf32>
    %1202 = vector.extract_strided_slice %1149 {offsets = [0, 0], sizes = [2, 32], strides = [1, 1]} : vector<2x64xf32> to vector<2x32xf32>
    %1203 = arith.mulf %1173, %1202 : vector<2x32xf32>
    %1204 = arith.mulf %1167, %1175 : vector<2x32xf32>
    %1205 = arith.addf %1203, %1204 : vector<2x32xf32>
    %1206 = vector.extract_strided_slice %1149 {offsets = [0, 32], sizes = [2, 32], strides = [1, 1]} : vector<2x64xf32> to vector<2x32xf32>
    %1207 = arith.mulf %1193, %1206 : vector<2x32xf32>
    %1208 = arith.mulf %1187, %1195 : vector<2x32xf32>
    %1209 = arith.addf %1207, %1208 : vector<2x32xf32>
    %1210 = math.tanh %1205 : vector<2x32xf32>
    %1211 = arith.mulf %1181, %1210 : vector<2x32xf32>
    %1212 = math.tanh %1209 : vector<2x32xf32>
    %1213 = arith.mulf %1201, %1212 : vector<2x32xf32>
    %1214 = arith.index_cast %c5_i32_339 : i32 to index
    %c0_352 = arith.constant 0 : index
    %c0_353 = arith.constant 0 : index
    %1215 = vector.load %arg13[%1214, %c0_352, %c0_353] : memref<8x2x32xf32, #tpu.memory_space<vmem>>, vector<1x2x32xf32>
    %1216 = vector.shape_cast %1215 : vector<1x2x32xf32> to vector<2x32xf32>
    %1217 = vector.shape_cast %1211 : vector<2x32xf32> to vector<1x2x32xf32>
    tpu.vector_store %arg13[%1214, %c0_352, %c0_353], %1217 {strides = array<i32>} : memref<8x2x32xf32, #tpu.memory_space<vmem>>, vector<1x2x32xf32>,
    %1218 = arith.index_cast %1150 : i32 to index
    %c0_354 = arith.constant 0 : index
    %c0_355 = arith.constant 0 : index
    %1219 = vector.load %arg14[%1218, %c0_354, %c0_355] : memref<8x2x32xf32, #tpu.memory_space<vmem>>, vector<1x2x32xf32>
    %1220 = vector.shape_cast %1219 : vector<1x2x32xf32> to vector<2x32xf32>
    %1221 = vector.shape_cast %1213 : vector<2x32xf32> to vector<1x2x32xf32>
    tpu.vector_store %arg14[%1218, %c0_354, %c0_355], %1221 {strides = array<i32>} : memref<8x2x32xf32, #tpu.memory_space<vmem>>, vector<1x2x32xf32>,
    %1222 = tpu.concatenate %1211, %1213 in 1 : vector<2x32xf32>, vector<2x32xf32> -> vector<2x64xf32>
    %1223 = tpu.concatenate %1205, %1209 in 1 : vector<2x32xf32>, vector<2x32xf32> -> vector<2x64xf32>
    %c6_i32_356 = arith.constant 6 : i32
    %c7_i32_357 = arith.constant 7 : i32
    %1224 = arith.subi %c7_i32_357, %c6_i32_356 : i32
    %1225 = arith.index_cast %c6_i32_356 : i32 to index
    %c0_358 = arith.constant 0 : index
    %c0_359 = arith.constant 0 : index
    %1226 = vector.load %arg10[%1225, %c0_358, %c0_359] : memref<8x2x256xf32, #tpu.memory_space<vmem>>, vector<1x2x256xf32>
    %1227 = vector.shape_cast %1226 : vector<1x2x256xf32> to vector<2x256xf32>
    %1228 = arith.index_cast %1224 : i32 to index
    %c0_360 = arith.constant 0 : index
    %c0_361 = arith.constant 0 : index
    %1229 = vector.load %arg10[%1228, %c0_360, %c0_361] : memref<8x2x256xf32, #tpu.memory_space<vmem>>, vector<1x2x256xf32>
    %1230 = vector.shape_cast %1229 : vector<1x2x256xf32> to vector<2x256xf32>
    %1231 = vector.extract_strided_slice %1227 {offsets = [0, 0], sizes = [2, 128], strides = [1, 1]} : vector<2x256xf32> to vector<2x128xf32>
    %1232 = vector.extract_strided_slice %1230 {offsets = [0, 128], sizes = [2, 128], strides = [1, 1]} : vector<2x256xf32> to vector<2x128xf32>
    %1233 = tpu.concatenate %1231, %1232 in 1 : vector<2x128xf32>, vector<2x128xf32> -> vector<2x256xf32>
    %cst_362 = arith.constant dense<0.000000e+00> : vector<2x256xf32>
    %1234 = tpu.matmul %1222, %671, %cst_362 {dimension_numbers = #tpu.dot_dimension_numbers<[1], [0], [0], [1], [0, 0, 1, 1], [], []>} : vector<2x64xf32>, vector<64x256xf32>, vector<2x256xf32> -> vector<2x256xf32>
    %1235 = arith.addf %1233, %1234 : vector<2x256xf32>
    %1236 = vector.extract_strided_slice %1235 {offsets = [0, 0], sizes = [2, 32], strides = [1, 1]} : vector<2x256xf32> to vector<2x32xf32>
    %1237 = arith.negf %1236 : vector<2x32xf32>
    %1238 = math.exp %1237 : vector<2x32xf32>
    %cst_363 = arith.constant 1.000000e+00 : f32
    %1239 = vector.broadcast %cst_363 : f32 to vector<2x32xf32>
    %1240 = arith.addf %1239, %1238 : vector<2x32xf32>
    %1241 = arith.divf %1239, %1240 : vector<2x32xf32>
    %1242 = vector.extract_strided_slice %1235 {offsets = [0, 32], sizes = [2, 32], strides = [1, 1]} : vector<2x256xf32> to vector<2x32xf32>
    %1243 = arith.negf %1242 : vector<2x32xf32>
    %1244 = math.exp %1243 : vector<2x32xf32>
    %cst_364 = arith.constant 1.000000e+00 : f32
    %1245 = vector.broadcast %cst_364 : f32 to vector<2x32xf32>
    %1246 = arith.addf %1245, %1244 : vector<2x32xf32>
    %1247 = arith.divf %1245, %1246 : vector<2x32xf32>
    %1248 = vector.extract_strided_slice %1235 {offsets = [0, 64], sizes = [2, 32], strides = [1, 1]} : vector<2x256xf32> to vector<2x32xf32>
    %1249 = math.tanh %1248 : vector<2x32xf32>
    %1250 = vector.extract_strided_slice %1235 {offsets = [0, 96], sizes = [2, 32], strides = [1, 1]} : vector<2x256xf32> to vector<2x32xf32>
    %1251 = arith.negf %1250 : vector<2x32xf32>
    %1252 = math.exp %1251 : vector<2x32xf32>
    %cst_365 = arith.constant 1.000000e+00 : f32
    %1253 = vector.broadcast %cst_365 : f32 to vector<2x32xf32>
    %1254 = arith.addf %1253, %1252 : vector<2x32xf32>
    %1255 = arith.divf %1253, %1254 : vector<2x32xf32>
    %1256 = vector.extract_strided_slice %1235 {offsets = [0, 128], sizes = [2, 32], strides = [1, 1]} : vector<2x256xf32> to vector<2x32xf32>
    %1257 = arith.negf %1256 : vector<2x32xf32>
    %1258 = math.exp %1257 : vector<2x32xf32>
    %cst_366 = arith.constant 1.000000e+00 : f32
    %1259 = vector.broadcast %cst_366 : f32 to vector<2x32xf32>
    %1260 = arith.addf %1259, %1258 : vector<2x32xf32>
    %1261 = arith.divf %1259, %1260 : vector<2x32xf32>
    %1262 = vector.extract_strided_slice %1235 {offsets = [0, 160], sizes = [2, 32], strides = [1, 1]} : vector<2x256xf32> to vector<2x32xf32>
    %1263 = arith.negf %1262 : vector<2x32xf32>
    %1264 = math.exp %1263 : vector<2x32xf32>
    %cst_367 = arith.constant 1.000000e+00 : f32
    %1265 = vector.broadcast %cst_367 : f32 to vector<2x32xf32>
    %1266 = arith.addf %1265, %1264 : vector<2x32xf32>
    %1267 = arith.divf %1265, %1266 : vector<2x32xf32>
    %1268 = vector.extract_strided_slice %1235 {offsets = [0, 192], sizes = [2, 32], strides = [1, 1]} : vector<2x256xf32> to vector<2x32xf32>
    %1269 = math.tanh %1268 : vector<2x32xf32>
    %1270 = vector.extract_strided_slice %1235 {offsets = [0, 224], sizes = [2, 32], strides = [1, 1]} : vector<2x256xf32> to vector<2x32xf32>
    %1271 = arith.negf %1270 : vector<2x32xf32>
    %1272 = math.exp %1271 : vector<2x32xf32>
    %cst_368 = arith.constant 1.000000e+00 : f32
    %1273 = vector.broadcast %cst_368 : f32 to vector<2x32xf32>
    %1274 = arith.addf %1273, %1272 : vector<2x32xf32>
    %1275 = arith.divf %1273, %1274 : vector<2x32xf32>
    %1276 = vector.extract_strided_slice %1223 {offsets = [0, 0], sizes = [2, 32], strides = [1, 1]} : vector<2x64xf32> to vector<2x32xf32>
    %1277 = arith.mulf %1247, %1276 : vector<2x32xf32>
    %1278 = arith.mulf %1241, %1249 : vector<2x32xf32>
    %1279 = arith.addf %1277, %1278 : vector<2x32xf32>
    %1280 = vector.extract_strided_slice %1223 {offsets = [0, 32], sizes = [2, 32], strides = [1, 1]} : vector<2x64xf32> to vector<2x32xf32>
    %1281 = arith.mulf %1267, %1280 : vector<2x32xf32>
    %1282 = arith.mulf %1261, %1269 : vector<2x32xf32>
    %1283 = arith.addf %1281, %1282 : vector<2x32xf32>
    %1284 = math.tanh %1279 : vector<2x32xf32>
    %1285 = arith.mulf %1255, %1284 : vector<2x32xf32>
    %1286 = math.tanh %1283 : vector<2x32xf32>
    %1287 = arith.mulf %1275, %1286 : vector<2x32xf32>
    %1288 = arith.index_cast %c6_i32_356 : i32 to index
    %c0_369 = arith.constant 0 : index
    %c0_370 = arith.constant 0 : index
    %1289 = vector.load %arg13[%1288, %c0_369, %c0_370] : memref<8x2x32xf32, #tpu.memory_space<vmem>>, vector<1x2x32xf32>
    %1290 = vector.shape_cast %1289 : vector<1x2x32xf32> to vector<2x32xf32>
    %1291 = vector.shape_cast %1285 : vector<2x32xf32> to vector<1x2x32xf32>
    tpu.vector_store %arg13[%1288, %c0_369, %c0_370], %1291 {strides = array<i32>} : memref<8x2x32xf32, #tpu.memory_space<vmem>>, vector<1x2x32xf32>,
    %1292 = arith.index_cast %1224 : i32 to index
    %c0_371 = arith.constant 0 : index
    %c0_372 = arith.constant 0 : index
    %1293 = vector.load %arg14[%1292, %c0_371, %c0_372] : memref<8x2x32xf32, #tpu.memory_space<vmem>>, vector<1x2x32xf32>
    %1294 = vector.shape_cast %1293 : vector<1x2x32xf32> to vector<2x32xf32>
    %1295 = vector.shape_cast %1287 : vector<2x32xf32> to vector<1x2x32xf32>
    tpu.vector_store %arg14[%1292, %c0_371, %c0_372], %1295 {strides = array<i32>} : memref<8x2x32xf32, #tpu.memory_space<vmem>>, vector<1x2x32xf32>,
    %1296 = tpu.concatenate %1285, %1287 in 1 : vector<2x32xf32>, vector<2x32xf32> -> vector<2x64xf32>
    %1297 = tpu.concatenate %1279, %1283 in 1 : vector<2x32xf32>, vector<2x32xf32> -> vector<2x64xf32>
    %c7_i32_373 = arith.constant 7 : i32
    %c7_i32_374 = arith.constant 7 : i32
    %1298 = arith.subi %c7_i32_374, %c7_i32_373 : i32
    %1299 = arith.index_cast %c7_i32_373 : i32 to index
    %c0_375 = arith.constant 0 : index
    %c0_376 = arith.constant 0 : index
    %1300 = vector.load %arg10[%1299, %c0_375, %c0_376] : memref<8x2x256xf32, #tpu.memory_space<vmem>>, vector<1x2x256xf32>
    %1301 = vector.shape_cast %1300 : vector<1x2x256xf32> to vector<2x256xf32>
    %1302 = arith.index_cast %1298 : i32 to index
    %c0_377 = arith.constant 0 : index
    %c0_378 = arith.constant 0 : index
    %1303 = vector.load %arg10[%1302, %c0_377, %c0_378] : memref<8x2x256xf32, #tpu.memory_space<vmem>>, vector<1x2x256xf32>
    %1304 = vector.shape_cast %1303 : vector<1x2x256xf32> to vector<2x256xf32>
    %1305 = vector.extract_strided_slice %1301 {offsets = [0, 0], sizes = [2, 128], strides = [1, 1]} : vector<2x256xf32> to vector<2x128xf32>
    %1306 = vector.extract_strided_slice %1304 {offsets = [0, 128], sizes = [2, 128], strides = [1, 1]} : vector<2x256xf32> to vector<2x128xf32>
    %1307 = tpu.concatenate %1305, %1306 in 1 : vector<2x128xf32>, vector<2x128xf32> -> vector<2x256xf32>
    %cst_379 = arith.constant dense<0.000000e+00> : vector<2x256xf32>
    %1308 = tpu.matmul %1296, %671, %cst_379 {dimension_numbers = #tpu.dot_dimension_numbers<[1], [0], [0], [1], [0, 0, 1, 1], [], []>} : vector<2x64xf32>, vector<64x256xf32>, vector<2x256xf32> -> vector<2x256xf32>
    %1309 = arith.addf %1307, %1308 : vector<2x256xf32>
    %1310 = vector.extract_strided_slice %1309 {offsets = [0, 0], sizes = [2, 32], strides = [1, 1]} : vector<2x256xf32> to vector<2x32xf32>
    %1311 = arith.negf %1310 : vector<2x32xf32>
    %1312 = math.exp %1311 : vector<2x32xf32>
    %cst_380 = arith.constant 1.000000e+00 : f32
    %1313 = vector.broadcast %cst_380 : f32 to vector<2x32xf32>
    %1314 = arith.addf %1313, %1312 : vector<2x32xf32>
    %1315 = arith.divf %1313, %1314 : vector<2x32xf32>
    %1316 = vector.extract_strided_slice %1309 {offsets = [0, 32], sizes = [2, 32], strides = [1, 1]} : vector<2x256xf32> to vector<2x32xf32>
    %1317 = arith.negf %1316 : vector<2x32xf32>
    %1318 = math.exp %1317 : vector<2x32xf32>
    %cst_381 = arith.constant 1.000000e+00 : f32
    %1319 = vector.broadcast %cst_381 : f32 to vector<2x32xf32>
    %1320 = arith.addf %1319, %1318 : vector<2x32xf32>
    %1321 = arith.divf %1319, %1320 : vector<2x32xf32>
    %1322 = vector.extract_strided_slice %1309 {offsets = [0, 64], sizes = [2, 32], strides = [1, 1]} : vector<2x256xf32> to vector<2x32xf32>
    %1323 = math.tanh %1322 : vector<2x32xf32>
    %1324 = vector.extract_strided_slice %1309 {offsets = [0, 96], sizes = [2, 32], strides = [1, 1]} : vector<2x256xf32> to vector<2x32xf32>
    %1325 = arith.negf %1324 : vector<2x32xf32>
    %1326 = math.exp %1325 : vector<2x32xf32>
    %cst_382 = arith.constant 1.000000e+00 : f32
    %1327 = vector.broadcast %cst_382 : f32 to vector<2x32xf32>
    %1328 = arith.addf %1327, %1326 : vector<2x32xf32>
    %1329 = arith.divf %1327, %1328 : vector<2x32xf32>
    %1330 = vector.extract_strided_slice %1309 {offsets = [0, 128], sizes = [2, 32], strides = [1, 1]} : vector<2x256xf32> to vector<2x32xf32>
    %1331 = arith.negf %1330 : vector<2x32xf32>
    %1332 = math.exp %1331 : vector<2x32xf32>
    %cst_383 = arith.constant 1.000000e+00 : f32
    %1333 = vector.broadcast %cst_383 : f32 to vector<2x32xf32>
    %1334 = arith.addf %1333, %1332 : vector<2x32xf32>
    %1335 = arith.divf %1333, %1334 : vector<2x32xf32>
    %1336 = vector.extract_strided_slice %1309 {offsets = [0, 160], sizes = [2, 32], strides = [1, 1]} : vector<2x256xf32> to vector<2x32xf32>
    %1337 = arith.negf %1336 : vector<2x32xf32>
    %1338 = math.exp %1337 : vector<2x32xf32>
    %cst_384 = arith.constant 1.000000e+00 : f32
    %1339 = vector.broadcast %cst_384 : f32 to vector<2x32xf32>
    %1340 = arith.addf %1339, %1338 : vector<2x32xf32>
    %1341 = arith.divf %1339, %1340 : vector<2x32xf32>
    %1342 = vector.extract_strided_slice %1309 {offsets = [0, 192], sizes = [2, 32], strides = [1, 1]} : vector<2x256xf32> to vector<2x32xf32>
    %1343 = math.tanh %1342 : vector<2x32xf32>
    %1344 = vector.extract_strided_slice %1309 {offsets = [0, 224], sizes = [2, 32], strides = [1, 1]} : vector<2x256xf32> to vector<2x32xf32>
    %1345 = arith.negf %1344 : vector<2x32xf32>
    %1346 = math.exp %1345 : vector<2x32xf32>
    %cst_385 = arith.constant 1.000000e+00 : f32
    %1347 = vector.broadcast %cst_385 : f32 to vector<2x32xf32>
    %1348 = arith.addf %1347, %1346 : vector<2x32xf32>
    %1349 = arith.divf %1347, %1348 : vector<2x32xf32>
    %1350 = vector.extract_strided_slice %1297 {offsets = [0, 0], sizes = [2, 32], strides = [1, 1]} : vector<2x64xf32> to vector<2x32xf32>
    %1351 = arith.mulf %1321, %1350 : vector<2x32xf32>
    %1352 = arith.mulf %1315, %1323 : vector<2x32xf32>
    %1353 = arith.addf %1351, %1352 : vector<2x32xf32>
    %1354 = vector.extract_strided_slice %1297 {offsets = [0, 32], sizes = [2, 32], strides = [1, 1]} : vector<2x64xf32> to vector<2x32xf32>
    %1355 = arith.mulf %1341, %1354 : vector<2x32xf32>
    %1356 = arith.mulf %1335, %1343 : vector<2x32xf32>
    %1357 = arith.addf %1355, %1356 : vector<2x32xf32>
    %1358 = math.tanh %1353 : vector<2x32xf32>
    %1359 = arith.mulf %1329, %1358 : vector<2x32xf32>
    %1360 = math.tanh %1357 : vector<2x32xf32>
    %1361 = arith.mulf %1349, %1360 : vector<2x32xf32>
    %1362 = arith.index_cast %c7_i32_373 : i32 to index
    %c0_386 = arith.constant 0 : index
    %c0_387 = arith.constant 0 : index
    %1363 = vector.load %arg13[%1362, %c0_386, %c0_387] : memref<8x2x32xf32, #tpu.memory_space<vmem>>, vector<1x2x32xf32>
    %1364 = vector.shape_cast %1363 : vector<1x2x32xf32> to vector<2x32xf32>
    %1365 = vector.shape_cast %1359 : vector<2x32xf32> to vector<1x2x32xf32>
    tpu.vector_store %arg13[%1362, %c0_386, %c0_387], %1365 {strides = array<i32>} : memref<8x2x32xf32, #tpu.memory_space<vmem>>, vector<1x2x32xf32>,
    %1366 = arith.index_cast %1298 : i32 to index
    %c0_388 = arith.constant 0 : index
    %c0_389 = arith.constant 0 : index
    %1367 = vector.load %arg14[%1366, %c0_388, %c0_389] : memref<8x2x32xf32, #tpu.memory_space<vmem>>, vector<1x2x32xf32>
    %1368 = vector.shape_cast %1367 : vector<1x2x32xf32> to vector<2x32xf32>
    %1369 = vector.shape_cast %1361 : vector<2x32xf32> to vector<1x2x32xf32>
    tpu.vector_store %arg14[%1366, %c0_388, %c0_389], %1369 {strides = array<i32>} : memref<8x2x32xf32, #tpu.memory_space<vmem>>, vector<1x2x32xf32>,
    %1370 = tpu.concatenate %1359, %1361 in 1 : vector<2x32xf32>, vector<2x32xf32> -> vector<2x64xf32>
    %1371 = tpu.concatenate %1353, %1357 in 1 : vector<2x32xf32>, vector<2x32xf32> -> vector<2x64xf32>
    %c8_i32_390 = arith.constant 8 : i32
    %c7 = arith.constant 7 : index
    %c0_391 = arith.constant 0 : index
    %c0_392 = arith.constant 0 : index
    %1372 = vector.load %arg13[%c7, %c0_391, %c0_392] : memref<8x2x32xf32, #tpu.memory_space<vmem>>, vector<1x2x32xf32>
    %1373 = vector.shape_cast %1372 : vector<1x2x32xf32> to vector<2x32xf32>
    %c7_393 = arith.constant 7 : index
    %c0_394 = arith.constant 0 : index
    %c0_395 = arith.constant 0 : index
    %1374 = vector.load %arg14[%c7_393, %c0_394, %c0_395] : memref<8x2x32xf32, #tpu.memory_space<vmem>>, vector<1x2x32xf32>
    %1375 = vector.shape_cast %1374 : vector<1x2x32xf32> to vector<2x32xf32>
    %1376 = tpu.concatenate %1373, %1375 in 1 : vector<2x32xf32>, vector<2x32xf32> -> vector<2x64xf32>
    %c0_396 = arith.constant 0 : index
    %c0_397 = arith.constant 0 : index
    %1377 = vector.load %arg7[%c0_396, %c0_397] : memref<64x4xf32, #tpu.memory_space<vmem>>, vector<64x4xf32>
    %cst_398 = arith.constant dense<0.000000e+00> : vector<2x4xf32>
    %1378 = tpu.matmul %1376, %1377, %cst_398 {dimension_numbers = #tpu.dot_dimension_numbers<[1], [0], [0], [1], [0, 0, 1, 1], [], []>} : vector<2x64xf32>, vector<64x4xf32>, vector<2x4xf32> -> vector<2x4xf32>
    %c0_399 = arith.constant 0 : index
    %c0_400 = arith.constant 0 : index
    %1379 = vector.load %arg8[%c0_399, %c0_400] : memref<1x4xf32, #tpu.memory_space<vmem>>, vector<1x4xf32>
    %1380 = vector.broadcast %1379 : vector<1x4xf32> to vector<2x4xf32>
    %1381 = arith.addf %1378, %1380 : vector<2x4xf32>
    %c0_401 = arith.constant 0 : index
    %c0_402 = arith.constant 0 : index
    %1382 = vector.load %arg9[%c0_401, %c0_402] : memref<2x4xf32, #tpu.memory_space<vmem>>, vector<2x4xf32>
    tpu.vector_store %arg9[%c0_401, %c0_402], %1381 {strides = array<i32>} : memref<2x4xf32, #tpu.memory_space<vmem>>, vector<2x4xf32>,
    return
  }
}

</mosaic_0001>

<bundles_post_ra>
// kernel: ts_bilstm_forward.1
= control target key start
LH: loop header
LB: loop body
LE: loop exit
PB: predicated region body
PF: predicated region fallthrough
CT: control target
= control target key end

     0   :  { %14 = vsyncpa [#allocation8], 0  ;;  %s5075_s0 = inlined_call_operand.vmem [shape: f32[8,2,15], index: 0, kind: input, shape index: {}]   ;;  %s5076_s1 = inlined_call_operand.vmem [shape: f32[15,256], index: 1, kind: input, shape index: {}]   ;;  %s5077_s2 = inlined_call_operand.hbm [shape: f32[64,256], index: 2, kind: input, shape index: {}]   ;;  %s5078_s3 = inlined_call_operand.vmem [shape: f32[1,256], index: 3, kind: input, shape index: {}]   ;;  %s5079_s4 = inlined_call_operand.hbm [shape: f32[64,256], index: 4, kind: input, shape index: {}]   ;;  %s5080_s5 = inlined_call_operand.hbm [shape: f32[64,256], index: 5, kind: input, shape index: {}]   ;;  %s5081_s6 = inlined_call_operand.vmem [shape: f32[1,256], index: 6, kind: input, shape index: {}]   ;;  %s5082_s7 = inlined_call_operand.vmem [shape: f32[64,4], index: 7, kind: input, shape index: {}]   ;;  %s5083_s8 = inlined_call_operand.vmem [shape: f32[1,4], index: 8, kind: input, shape index: {}]   ;;  %s5084_s9 = inlined_call_operand.hbm [shape: f32[2,4], index: 9, kind: output, shape index: {}]  }
   0x1   :  { %15 = vsyncpa [#allocation11], 0 }
   0x2   :  { %16 = vsyncpa [#allocation9], 0  ;;  %s40_s11 = sshll.u32 %s5079_s4, 4  ;;  %s3933_s12 = smov [#allocation10]   ;;  %s41_s11 = int_to_ptr.hbm [resolvable:$true] %s40_s11 }
   0x3   :  { %s42_s13 = sshll.u32 %s3933_s12, 4  ;;  %s25_s16 = sshll.u32 %s5077_s2, 4  ;;  %s43_s13 = int_to_ptr.vmem [resolvable:$true] %s42_s13  ;;  %s26_s16 = int_to_ptr.hbm [resolvable:$true] %s25_s16 }
   0x4   :  { %s3934_s17 = smov 256   ;;  %s3935_s18 = smov 16  }
   0x5   :  { %48 = dma.hbm_to_vmem [thread:$0]  %s41_s11, 2048, %s43_s13, [#allocation11], %s3934_s17, %s3934_s17, %s3935_s18  }
   0x6   :  { %s3936_s19 = smov [#allocation7]   ;;  %s53_s23 = sshll.u32 %s5080_s5, 4  ;;  %s54_s23 = int_to_ptr.hbm [resolvable:$true] %s53_s23 }
   0x7   :  { %s27_s20 = sshll.u32 %s3936_s19, 4  ;;  %s3937_s4 = smov [#allocation12]   ;;  %s28_s20 = int_to_ptr.vmem [resolvable:$true] %s27_s20 }
   0x8   :  { %33 = dma.hbm_to_vmem [thread:$0]  %s26_s16, 2048, %s28_s20, [#allocation8], %s3934_s17, %s3934_s17, %s3935_s18  }
   0x9   :  { %s55_s24 = sshll.u32 %s3937_s4, 4  ;;  %s56_s24 = int_to_ptr.vmem [resolvable:$true] %s55_s24 }
   0xa   :  { %61 = dma.hbm_to_vmem [thread:$0]  %s54_s23, 2048, %s56_s24, [#allocation11], %s3934_s17, %s3934_s17, %s3935_s18  }
   0xb   :  { %3927 = dma.done.wait [#allocation8], 2048  }
   0xc   :  { %3928 = vsyncadd [#allocation8], 4294965248 }
   0xd   :  { %3929 = dma.done.wait [#allocation11], 4096  }
   0xe   :  { %3930 = vsyncadd [#allocation11], 4294963200  ;;  %vm111_vm0 = vcmask 1046528   ;;  %v4005_v0 = vld [vmem:[%s5076_s1 + $0x18] sm:$0x7f]  ;;  %v4013_v2 = vld [vmem:[%s5076_s1 + $0x8] sm:$0xff] }
   0xf   :  { %v82_v1 = vld [vmem:[%s5076_s1 + $0x10] sm:$0x7f]  ;;  %3454 = vmatpush.msk.msra.mxu3 %vm111_vm0, %v4005_v0  ;;  %v80_v3 = vld [vmem:[%s5076_s1] sm:$0xff]  ;;  %vm107_vm1 = vcmask 121856   ;;  %v3466_v8 = vld [vmem:[%s5075_s0 + $0x8] sm:$0x3] }
  0x10   :  { %3457 = vmatpush.msk.msra.mxu0 %vm111_vm0, %v82_v1  ;;  %v3451_v4 = vld [vmem:[%s5075_s0 + $0x2] sm:$0x3]  ;;  %3447 = vmatpush.msk.msra.mxu1 %vm111_vm0, %v82_v1  ;;  %v3456_v5 = vld [vmem:[%s5075_s0 + $0x4] sm:$0x3]  ;;  %v106_v6 = vld [vmem:[%s5075_s0] sm:$0x3] }
  0x11   :  { %3452 = vmatpush.msk.msra.mxu2 %vm111_vm0, %v82_v1  ;;  %205 = vmatpush.msra.mxu3 %v4013_v2  ;;  %v3461_v7 = vld [vmem:[%s5075_s0 + $0x6] sm:$0x3]  ;;  %v4052_v9 = vld [vmem:[#allocation7 + $0x70] sm:$0xff]  ;;  %v4059_v10 = vld [vmem:[#allocation7 + $0x60] sm:$0xff]  ;;  %v3938_v21 = vmov 0.0   ;;  %vm161_vm2 = vcmask 1041408  }
  0x12   :  { %237 = vmatpush.msra.mxu0 %v80_v3  ;;  %133 = vmatpush.msra.mxu1 %v80_v3  ;;  %v4065_v11 = vld [vmem:[#allocation7 + $0x50] sm:$0xff]  ;;  %v4071_v12 = vld [vmem:[#allocation7 + $0x40] sm:$0xff]  ;;  %v4107_v20 = vld [vmem:[#allocation7 + $0x78] sm:$0xff]  ;;  %s3940_s2 = smov 32   ;;  %s3941_s25 = smov 96   ;;  %vm670_vm11 = vcmask 261120  }
  0x13   :  { %3455 = vmatmul.msk.f32.vlgmr.msra.gmra.mxu3 %vm107_vm1, %v3451_v4  ;;  %3458 = vmatmul.msk.f32.vlgmr.msra.gmra.mxu0 %vm107_vm1, %v3456_v5  ;;  %v3471_v13 = vld [vmem:[%s5075_s0 + $0xa] sm:$0x3]  ;;  %v3476_v14 = vld [vmem:[%s5075_s0 + $0xc] sm:$0x3]  ;;  %v4082_v15 = vld [vmem:[#allocation7 + $0x30] sm:$0xff]  ;;  %vm659_vm12 = vcmask 254976  }
  0x14   :  { %3448 = vmatmul.msk.f32.vlgmr.msra.gmra.mxu1 %vm107_vm1, %v106_v6  ;;  %185 = vmatpush.msra.mxu2 %v80_v3  ;;  %v4091_v16 = vld [vmem:[#allocation7 + $0x20] sm:$0xff]  ;;  %v4096_v17 = vld [vmem:[#allocation7 + $0x10] sm:$0xff]  ;;  %v4118_v22 = vld [vmem:[#allocation7 + $0x68] sm:$0xff]  ;;  %vm535_vm13 = vcmask 523264   ;;  %s3942_s21 = smov [#allocation13]  }
  0x15   :  { %3467 = vmatpush.msk.msrb.mxu0 %vm111_vm0, %v82_v1  ;;  %3453 = vmatmul.msk.f32.vlgmr.msra.gmra.mxu2 %vm107_vm1, %v3451_v4  ;;  %v4100_v18 = vld [vmem:[#allocation7] sm:$0xff]  ;;  %v4123_v23 = vld [vmem:[#allocation7 + $0x58] sm:$0xff]  ;;  %v4128_v24 = vld [vmem:[#allocation7 + $0x48] sm:$0xff]  ;;  %s3434_s22 = sshll.u32 %s3942_s21, 4  ;;  %s3435_s22 = int_to_ptr.vmem [resolvable:$true] %s3434_s22 }
  0x16   :  { %3464 = vmatpush.msk.msrb.mxu3 %vm111_vm0, %v4005_v0  ;;  %3449 = vmatpush.msk.msrb.mxu1 %vm111_vm0, %v4005_v0  ;;  %v3481_v19 = vld [vmem:[%s5075_s0 + $0xe] sm:$0x3]  ;;  %v4134_v25 = vld [vmem:[#allocation7 + $0x38] sm:$0xff]  ;;  %v4141_v26 = vld [vmem:[#allocation7 + $0x28] sm:$0xff]  ;;  %s3436_s0 = sshll.u32 %s5084_s9, 4  ;;  %s3437_s0 = int_to_ptr.hbm [resolvable:$true] %s3436_s0 }
  0x17   :  { %341 = vmatpush.msrb.mxu0 %v80_v3  ;;  %3462 = vmatpush.msk.msrb.mxu2 %vm111_vm0, %v82_v1  ;;  %v4146_v27 = vld [vmem:[#allocation7 + $0x18] sm:$0xff]  ;;  %v4152_v28 = vld [vmem:[#allocation7 + $0x8] sm:$0xff] }
  0x18   :  { %309 = vmatpush.msrb.mxu3 %v4013_v2  ;;  %153 = vmatpush.msrb.mxu1 %v4013_v2  ;;  %v100_v29 = vld [vmem:[%s5078_s3] sm:$0x3]  ;;  %s3939_s3 = smov 64  }
  0x19   :  { %3477 = vmatpush.msk.msra.mxu0 %vm111_vm0, %v82_v1  ;;  %289 = vmatpush.msrb.mxu2 %v80_v3  ;;  %v103_v32 = vperm.slane %v100_v29, 1  ;;  %v102_v33 = vperm.slane %v100_v29, 0 }
  0x1a   :  { %3459 = vmatpush.msk.msra.mxu1 %vm111_vm0, %v4005_v0  ;;  %3474 = vmatpush.msk.msra.mxu3 %vm111_vm0, %v4005_v0 }
  0x1b   :  { %445 = vmatpush.msra.mxu0 %v80_v3  ;;  %3465 = vmatmul.msk.f32.vlgmr.msrb.gmra.mxu3 %vm107_vm1, %v3461_v7 }
  0x1c   :  { %3468 = vmatmul.msk.f32.vlgmr.msrb.gmra.mxu0 %vm107_vm1, %v3466_v8  ;;  %3450 = vmatmul.msk.f32.vlgmr.msrb.gmra.mxu1 %vm107_vm1, %v106_v6 }
  0x1d   :  { %547 = vmatpush.msrb.mxu0 %v4052_v9  ;;  %3463 = vmatmul.msk.f32.vlgmr.msrb.gmra.mxu2 %vm107_vm1, %v3461_v7 }
  0x1e   :  { %257 = vmatpush.msra.mxu1 %v4013_v2  ;;  %3472 = vmatpush.msk.msra.mxu2 %vm111_vm0, %v82_v1 }
  0x1f   :  { %548 = vmatpush.msrb.mxu0 %v4059_v10  ;;  %413 = vmatpush.msra.mxu3 %v4013_v2 }
  0x20   :  { %3469 = vmatpush.msk.msrb.mxu1 %vm111_vm0, %v4005_v0  ;;  %393 = vmatpush.msra.mxu2 %v80_v3 }
  0x21   :  { %549 = vmatpush.msrb.mxu0 %v4065_v11  ;;  %3484 = vmatpush.msk.msrb.mxu3 %vm111_vm0, %v4005_v0 }
  0x22   :  { %3482 = vmatpush.msk.msrb.mxu2 %vm111_vm0, %v82_v1  ;;  %361 = vmatpush.msrb.mxu1 %v4013_v2 }
  0x23   :  { %550 = vmatpush.msrb.mxu0 %v4071_v12  ;;  %3475 = vmatmul.msk.f32.vlgmr.msra.gmra.mxu3 %vm107_vm1, %v3471_v13 }
  0x24   :  { %3478 = vmatmul.msk.f32.vlgmr.msra.gmra.mxu0 %vm107_vm1, %v3476_v14  ;;  %3460 = vmatmul.msk.f32.vlgmr.msra.gmra.mxu1 %vm107_vm1, %v3456_v5 }
  0x25   :  { %551 = vmatpush.msrb.mxu0 %v4082_v15  ;;  %517 = vmatpush.msrb.mxu3 %v4013_v2 }
  0x26   :  { %3473 = vmatmul.msk.f32.vlgmr.msra.gmra.mxu2 %vm107_vm1, %v3471_v13  ;;  %3479 = vmatpush.msk.msra.mxu1 %vm111_vm0, %v4005_v0 }
  0x27   :  { %552 = vmatpush.msrb.mxu0 %v4091_v16  ;;  %497 = vmatpush.msrb.mxu2 %v80_v3 }
  0x28   :  { %714 = vmatpush.msra.mxu3 %v4107_v20  ;;  %465 = vmatpush.msra.mxu1 %v4013_v2 }
  0x29   :  { %694 = vmatpush.msra.mxu2 %v4052_v9  ;;  %553 = vmatpush.msrb.mxu0 %v4096_v17 }
  0x2a   :  { %715 = vmatpush.msra.mxu3 %v4118_v22 }
  0x2b   :  { %695 = vmatpush.msra.mxu2 %v4059_v10  ;;  %554 = vmatpush.msrb.mxu0 %v4100_v18 }
  0x2c   :  { %3485 = vmatmul.msk.f32.vlgmr.msrb.gmra.mxu3 %vm107_vm1, %v3481_v19  ;;  %555 = vmatmul.f32.vlgmr.msrb.gmra.mxu0 %v3938_v21 }
  0x2d   :  { %3470 = vmatmul.msk.f32.vlgmr.msrb.gmra.mxu1 %vm107_vm1, %v3466_v8  ;;  %844 = vmatpush.msra.mxu0 %v4052_v9 }
  0x2e   :  { %567 = vmatpush.msrb.mxu1 %v4107_v20  ;;  %3483 = vmatmul.msk.f32.vlgmr.msrb.gmra.mxu2 %vm107_vm1, %v3481_v19 }
  0x2f   :  { %696 = vmatpush.msra.mxu2 %v4065_v11  ;;  %716 = vmatpush.msra.mxu3 %v4123_v23 }
  0x30   :  { %568 = vmatpush.msrb.mxu1 %v4118_v22  ;;  %845 = vmatpush.msra.mxu0 %v4059_v10 }
  0x31   :  { %697 = vmatpush.msra.mxu2 %v4071_v12  ;;  %717 = vmatpush.msra.mxu3 %v4128_v24 }
  0x32   :  { %569 = vmatpush.msrb.mxu1 %v4123_v23  ;;  %846 = vmatpush.msra.mxu0 %v4065_v11 }
  0x33   :  { %698 = vmatpush.msra.mxu2 %v4082_v15  ;;  %718 = vmatpush.msra.mxu3 %v4134_v25 }
  0x34   :  { %570 = vmatpush.msrb.mxu1 %v4128_v24  ;;  %847 = vmatpush.msra.mxu0 %v4071_v12 }
  0x35   :  { %3480 = vmatmul.msk.f32.vlgmr.msra.gmra.mxu1 %vm107_vm1, %v3476_v14  ;;  %699 = vmatpush.msra.mxu2 %v4091_v16 }
  0x36   :  { %571 = vmatpush.msrb.mxu1 %v4134_v25  ;;  %719 = vmatpush.msra.mxu3 %v4141_v26 }
  0x37   :  { %700 = vmatpush.msra.mxu2 %v4096_v17  ;;  %848 = vmatpush.msra.mxu0 %v4082_v15 }
  0x38   :  { %572 = vmatpush.msrb.mxu1 %v4141_v26  ;;  %720 = vmatpush.msra.mxu3 %v4146_v27 }
  0x39   :  { %701 = vmatpush.msra.mxu2 %v4100_v18  ;;  %849 = vmatpush.msra.mxu0 %v4091_v16 }
  0x3a   :  { %573 = vmatpush.msrb.mxu1 %v4146_v27  ;;  %721 = vmatpush.msra.mxu3 %v4152_v28 }
  0x3b   :  { %994 = vmatpush.msrb.mxu2 %v4052_v9  ;;  %850 = vmatpush.msra.mxu0 %v4096_v17 }
  0x3c   :  { %574 = vmatpush.msrb.mxu1 %v4152_v28  ;;  %1014 = vmatpush.msrb.mxu3 %v4107_v20 }
  0x3d   :  { %575 = vmatmul.f32.vlgmr.msrb.gmra.mxu1 %v3938_v21  ;;  %851 = vmatpush.msra.mxu0 %v4100_v18 }
  0x3e   :  { %864 = vmatpush.msra.mxu1 %v4107_v20  ;;  %995 = vmatpush.msrb.mxu2 %v4059_v10 }
  0x3f   :  { %1015 = vmatpush.msrb.mxu3 %v4118_v22  ;;  %1144 = vmatpush.msrb.mxu0 %v4052_v9 }
  0x40   :  { %865 = vmatpush.msra.mxu1 %v4118_v22  ;;  %996 = vmatpush.msrb.mxu2 %v4065_v11 }
  0x41   :  { %1016 = vmatpush.msrb.mxu3 %v4123_v23  ;;  %1145 = vmatpush.msrb.mxu0 %v4059_v10 }
  0x42   :  { %866 = vmatpush.msra.mxu1 %v4123_v23  ;;  %997 = vmatpush.msrb.mxu2 %v4071_v12 }
  0x43   :  { %1017 = vmatpush.msrb.mxu3 %v4128_v24  ;;  %1146 = vmatpush.msrb.mxu0 %v4065_v11 }
  0x44   :  { %867 = vmatpush.msra.mxu1 %v4128_v24  ;;  %998 = vmatpush.msrb.mxu2 %v4082_v15 }
  0x45   :  { %1018 = vmatpush.msrb.mxu3 %v4134_v25  ;;  %1147 = vmatpush.msrb.mxu0 %v4071_v12 }
  0x46   :  { %868 = vmatpush.msra.mxu1 %v4134_v25  ;;  %999 = vmatpush.msrb.mxu2 %v4091_v16 }
  0x47   :  { %1019 = vmatpush.msrb.mxu3 %v4141_v26  ;;  %1148 = vmatpush.msrb.mxu0 %v4082_v15 }
  0x48   :  { %869 = vmatpush.msra.mxu1 %v4141_v26  ;;  %1000 = vmatpush.msrb.mxu2 %v4096_v17 }
  0x49   :  { %1020 = vmatpush.msrb.mxu3 %v4146_v27  ;;  %1149 = vmatpush.msrb.mxu0 %v4091_v16 }
  0x4a   :  { %870 = vmatpush.msra.mxu1 %v4146_v27  ;;  %1001 = vmatpush.msrb.mxu2 %v4100_v18 }
  0x4b   :  { %1021 = vmatpush.msrb.mxu3 %v4152_v28  ;;  %1150 = vmatpush.msrb.mxu0 %v4096_v17 }
  0x4c   :  { %871 = vmatpush.msra.mxu1 %v4152_v28 }
  0x4d   :  { %1151 = vmatpush.msrb.mxu0 %v4100_v18 }
  0x4e   :  { %1164 = vmatpush.msrb.mxu1 %v4107_v20 }
  0x50   :  { %1165 = vmatpush.msrb.mxu1 %v4118_v22 }
  0x52   :  { %1166 = vmatpush.msrb.mxu1 %v4123_v23 }
  0x54   :  { %1167 = vmatpush.msrb.mxu1 %v4128_v24 }
  0x56   :  { %1168 = vmatpush.msrb.mxu1 %v4134_v25 }
  0x58   :  { %1169 = vmatpush.msrb.mxu1 %v4141_v26 }
  0x5a   :  { %1170 = vmatpush.msrb.mxu1 %v4146_v27 }
  0x5c   :  { %1171 = vmatpush.msrb.mxu1 %v4152_v28 }
  0x90   :  { %v239_v30 = vpop.f32.mrf.mxu0 }
  0x91   :  { %v135_v31 = vpop.f32.mrf.mxu1  ;;  %v240_v53 = vadd.f32 %v239_v30, %v102_v33 }
  0x92   :  { %v136_v41 = vadd.f32 %v135_v31, %v102_v33 }
  0x96   :  { %v207_v34 = vpop.f32.mrf.mxu3 }
  0x97   :  { %v208_v35 = vadd.f32 %v207_v34, %v103_v32 }
  0x98   :  { %v187_v37 = vpop.f32.mrf.mxu2 }
  0x99   :  { %v212_v36 = vrot.slane %v208_v35, 6  ;;  %v343_v38 = vpop.f32.mrf.mxu0  ;;  %v188_v39 = vadd.f32 %v187_v37, %v102_v33  ;;  %v155_v40 = vpop.f32.mrf.mxu1 }
  0x9a   :  { %v156_v42 = vadd.f32 %v155_v40, %v103_v32  ;;  %v344_v3 = vadd.f32 %v343_v38, %v102_v33 }
  0x9b   :  { %v213_v43 = vsel %vm161_vm2, %v188_v39, %v212_v36 }
  0x9c   :  { %216 = vst [vmem:[#allocation2 + $0x4] sm:$0xf] %v213_v43  ;;  %v160_v44 = vrot.slane %v156_v42, 6 }
  0x9e   :  { %v311_v45 = vpop.f32.mrf.mxu3  ;;  %v162_v46 = vsel %vm161_vm2, %v136_v41, %v160_v44 }
  0x9f   :  { %v312_v47 = vadd.f32 %v311_v45, %v103_v32  ;;  %164 = vst [vmem:[#allocation2] sm:$0xf] %v162_v46 }
  0xa0   :  { %v291_v49 = vpop.f32.mrf.mxu2 }
  0xa1   :  { %v316_v48 = vrot.slane %v312_v47, 6  ;;  %v447_v50 = vpop.f32.mrf.mxu0  ;;  %v292_v51 = vadd.f32 %v291_v49, %v102_v33  ;;  %v259_v52 = vpop.f32.mrf.mxu1 }
  0xa2   :  { %v260_v54 = vadd.f32 %v259_v52, %v103_v32  ;;  %v448_v34 = vadd.f32 %v447_v50, %v102_v33 }
  0xa3   :  { %v317_v55 = vsel %vm161_vm2, %v292_v51, %v316_v48  ;;  %v1428_v51 = vld [vmem:[#allocation2 + $0x4] sm:$0xf] }
  0xa4   :  { %320 = vst [vmem:[#allocation2 + $0xc] sm:$0xf] %v317_v55  ;;  %v264_v56 = vrot.slane %v260_v54, 6 }
  0xa6   :  { %v415_v57 = vpop.f32.mrf.mxu3  ;;  %v265_v58 = vsel %vm161_vm2, %v240_v53, %v264_v56  ;;  %v529_v62 = vld [vmem:[#allocation2] sm:$0xf] }
  0xa7   :  { %v416_v59 = vadd.f32 %v415_v57, %v103_v32  ;;  %268 = vst [vmem:[#allocation2 + $0x8] sm:$0xf] %v265_v58  ;;  %v1578_v53 = vld [vmem:[#allocation2] sm:$0xf] }
  0xa9   :  { %v420_v60 = vrot.slane %v416_v59, 6  ;;  %v395_v61 = vpop.f32.mrf.mxu2  ;;  %v556_v63 = vpop.f32.mrf.mxu0 }
  0xaa   :  { %v396_v0 = vadd.f32 %v395_v61, %v102_v33  ;;  %v579_v1 = vadd.f32 %v556_v63, %v529_v62  ;;  %v363_v2 = vpop.f32.mrf.mxu1 }
  0xab   :  { %v364_v4 = vadd.f32 %v363_v2, %v103_v32  ;;  %v1128_v47 = vld [vmem:[#allocation2 + $0xc] sm:$0xf] }
  0xac   :  { %v421_v5 = vsel %vm161_vm2, %v396_v0, %v420_v60  ;;  %3574 = vtanh.f32 %v579_v1  ;;  %v3486_v55 = vmul.f32 -1.442695, %v579_v1 }
  0xad   :  { %424 = vst [vmem:[#allocation2 + $0x14] sm:$0xf] %v421_v5  ;;  %v368_v6 = vrot.slane %v364_v4, 6 }
  0xae   :  { %v1278_v49 = vld [vmem:[#allocation2 + $0x8] sm:$0xf] }
  0xaf   :  { %v519_v7 = vpop.f32.mrf.mxu3  ;;  %v369_v8 = vsel %vm161_vm2, %v344_v3, %v368_v6 }
  0xb0   :  { %v520_v13 = vadd.f32 %v519_v7, %v103_v32  ;;  %372 = vst [vmem:[#allocation2 + $0x10] sm:$0xf] %v369_v8 }
  0xb1   :  { %v499_v19 = vpop.f32.mrf.mxu2 }
  0xb2   :  { %v524_v14 = vrot.slane %v520_v13, 6  ;;  %v3575_v29 = vpop.eup %3574  ;;  %v500_v30 = vadd.f32 %v499_v19, %v102_v33  ;;  %v467_v31 = vpop.f32.mrf.mxu1 }
  0xb3   :  { %v468_v35 = vadd.f32 %v467_v31, %v103_v32  ;;  %623 = vrot.lane.b32.xlu0 %v3575_v29, %s3939_s3 }
  0xb4   :  { %v525_v36 = vsel %vm161_vm2, %v500_v30, %v524_v14  ;;  %v828_v33 = vld [vmem:[#allocation2 + $0x14] sm:$0xf] }
  0xb5   :  { %528 = vst [vmem:[#allocation2 + $0x1c] sm:$0xf] %v525_v36  ;;  %v472_v37 = vrot.slane %v468_v35, 6 }
  0xb7   :  { %v473_v38 = vsel %vm161_vm2, %v448_v34, %v472_v37  ;;  %v978_v45 = vld [vmem:[#allocation2 + $0x10] sm:$0xf] }
  0xb8   :  { %476 = vst [vmem:[#allocation2 + $0x18] sm:$0xf] %v473_v38 }
  0xba   :  { %v576_v40 = vpop.f32.mrf.mxu1 }
  0xbc   :  { %v530_v39 = vld [vmem:[#allocation2 + $0x1c] sm:$0xf] }
  0xbd   :  { %532 = vst [vmem:[#allocation1] ss:$4 sm:$0xff] %v530_v39 }
  0xbf   :  { %v678_v42 = vld [vmem:[#allocation2 + $0x18] sm:$0xf] }
  0xc4   :  { %v533_v41 = vld.sshfl [vmem:[#allocation1 + $0x8] sm:$0xff pattern:$0x73625140] }
  0xc5   :  { %680 = vst [vmem:[#allocation1] ss:$4 sm:$0xff] %v678_v42  ;;  %v580_v43 = vadd.f32 %v576_v40, %v533_v41 }
  0xc7   :  { %3576 = vtanh.f32 %v580_v43  ;;  %v3487_v60 = vmul.f32 -1.442695, %v580_v43 }
  0xc8   :  { %3578 = vpow2.f32 %v3486_v55 }
  0xcc   :  { %v4216_v32 = vld.sshfl [vmem:[#allocation1 + $0x8] sm:$0xff pattern:$0x73625140] }
  0xcd   :  { %v3577_v44 = vpop.eup %3576  ;;  %830 = vst [vmem:[#allocation1] ss:$4 sm:$0xff] %v828_v33 }
  0xce   :  { %634 = vrot.lane.b32.xlu0 %v3577_v44, %s3939_s3  ;;  %v3579_v56 = vpop.eup %3578 }
  0xcf   :  { %v584_v57 = vadd.f32 1.0, %v3579_v56 }
  0xd1   :  { %3580 = vrcp.f32 %v584_v57  ;;  %v596_v2 = vand.u32 2147483648, %v584_v57  ;;  %vm590_vm4 = vweird.f32 %v584_v57  ;;  %v594_v4 = vand.u32 2147483647, %v584_v57 }
  0xd2   :  { %3582 = vpow2.f32 %v3487_v60 }
  0xd3   :  { %v597_v1 = vor.u32 1.1754944e-38, %v596_v2  ;;  %vm595_vm6 = vcmp.eq.f32.partialorder %v594_v4, 8.507059e+37 }
  0xd4   :  { %v4219_v46 = vld.sshfl [vmem:[#allocation1 + $0x8] sm:$0xff pattern:$0x73625140] }
  0xd5   :  { %980 = vst [vmem:[#allocation1] ss:$4 sm:$0xff] %v978_v45 }
  0xd7   :  { %v3581_v58 = vpop.eup %3580 }
  0xd8   :  { %v586_v59 = vmul.f32 %v3581_v58, %v584_v57  ;;  %v3583_v63 = vpop.eup %3582  ;;  %vm591_vm3 = vweird.f32 %v3581_v58 }
  0xd9   :  { %v604_v3 = vadd.f32 1.0, %v3583_v63  ;;  %vm592_vm5 = vmor %vm590_vm4, %vm591_vm3 }
  0xda   :  { %v587_v61 = vsub.f32 1.0, %v586_v59 }
  0xdb   :  { %3584 = vrcp.f32 %v604_v3  ;;  %v616_v31 = vand.u32 2147483648, %v604_v3  ;;  %vm610_vm8 = vweird.f32 %v604_v3  ;;  %v614_v34 = vand.u32 2147483647, %v604_v3 }
  0xdc   :  { %v4221_v48 = vld.sshfl [vmem:[#allocation1 + $0x8] sm:$0xff pattern:$0x73625140]  ;;  %v588_v62 = vmul.f32 %v3581_v58, %v587_v61 }
  0xdd   :  { %1130 = vst [vmem:[#allocation1] ss:$4 sm:$0xff] %v1128_v47  ;;  %v617_v36 = vor.u32 1.1754944e-38, %v616_v31  ;;  %vm615_vm10 = vcmp.eq.f32.partialorder %v614_v34, 8.507059e+37  ;;  %v677_v61 = vld [vmem:[#allocation2 + $0x4] sm:$0xf] }
  0xde   :  { %v589_v0 = vadd.f32 %v3581_v58, %v588_v62 }
  0xe0   :  { %v593_v5 = vsel %vm592_vm5, %v3581_v58, %v589_v0 }
  0xe1   :  { %v598_v7 = vsel %vm595_vm6, %v597_v1, %v593_v5  ;;  %v3585_v13 = vpop.eup %3584 }
  0xe2   :  { %v606_v14 = vmul.f32 %v3585_v13, %v604_v3  ;;  %vm611_vm7 = vweird.f32 %v3585_v13  ;;  %v621_v40 = vmul.f32 0.0, %v598_v7 }
  0xe3   :  { %vm612_vm9 = vmor %vm610_vm8, %vm611_vm7 }
  0xe4   :  { %v4223_v50 = vld.sshfl [vmem:[#allocation1 + $0x8] sm:$0xff pattern:$0x73625140]  ;;  %v607_v19 = vsub.f32 1.0, %v606_v14 }
  0xe5   :  { %1280 = vst [vmem:[#allocation1] ss:$4 sm:$0xff] %v1278_v49 }
  0xe6   :  { %v608_v29 = vmul.f32 %v3585_v13, %v607_v19 }
  0xe8   :  { %v609_v30 = vadd.f32 %v3585_v13, %v608_v29 }
  0xea   :  { %v613_v35 = vsel %vm612_vm9, %v3585_v13, %v609_v30 }
  0xeb   :  { %v618_v37 = vsel %vm615_vm10, %v617_v36, %v613_v35 }
  0xec   :  { %v4225_v52 = vld.sshfl [vmem:[#allocation1 + $0x8] sm:$0xff pattern:$0x73625140]  ;;  %v632_v33 = vmul.f32 0.0, %v618_v37 }
  0xed   :  { %1430 = vst [vmem:[#allocation1] ss:$4 sm:$0xff] %v1428_v51 }
  0xf4   :  { %v4227_v54 = vld.sshfl [vmem:[#allocation1 + $0x8] sm:$0xff pattern:$0x73625140] }
  0xf5   :  { %1580 = vst [vmem:[#allocation1] ss:$4 sm:$0xff] %v1578_v53 }
 0x125   :  { %v624_v6 = vpop.permute.xlu0 %623 }
 0x126   :  { %v626_v8 = vmul.f32 %v624_v6, %v598_v7 }
 0x128   :  { %628 = vrot.lane.b32.xlu1 %v626_v8, %s3940_s2 }
 0x140   :  { %v635_v38 = vpop.permute.xlu0 %634 }
 0x141   :  { %v637_v39 = vmul.f32 %v635_v38, %v618_v37 }
 0x143   :  { %639 = vrot.lane.b32.xlu1 %v637_v39, %s3940_s2 }
 0x19a   :  { %v629_v41 = vpop.permute.xlu1 %628 }
 0x19b   :  { %v631_v42 = vadd.f32 %v629_v41, %v621_v40 }
 0x19d   :  { %3586 = vtanh.f32 %v631_v42 }
 0x1a3   :  { %v3587_v43 = vpop.eup %3586 }
 0x1a4   :  { %645 = vrot.lane.b32.xlu2 %v3587_v43, %s3939_s3 }
 0x1b5   :  { %v640_v44 = vpop.permute.xlu1 %639 }
 0x1b6   :  { %v642_v45 = vadd.f32 %v640_v44, %v632_v33 }
 0x1b8   :  { %3588 = vtanh.f32 %v642_v45 }
 0x1be   :  { %v3589_v47 = vpop.eup %3588 }
 0x1bf   :  { %651 = vrot.lane.b32.xlu2 %v3589_v47, %s3939_s3 }
 0x1c7   :  { %673 = vrot.lane.b32.xlu2 %v631_v42, %s3941_s25 }
 0x1fe   :  { %v646_v49 = vpop.permute.xlu2 %645 }
 0x1ff   :  { %v648_v51 = vmul.f32 %v646_v49, %v598_v7 }
 0x201   :  { %656 = vrot.lane.b32.xlu0 %v648_v51, %s3940_s2 }
 0x219   :  { %v652_v53 = vpop.permute.xlu2 %651 }
 0x21a   :  { %v4235_v55 = vmul.f32 %v652_v53, %v618_v37 }
 0x21c   :  { %667 = vrot.lane.b32.xlu1 %v4235_v55, %s3939_s3 }
 0x221   :  { %v674_v56 = vpop.permute.xlu2 %673 }
 0x222   :  { %v4240_v57 = vsel %vm670_vm11, %v674_v56, %v642_v45 }
 0x223   :  { %769 = vrot.lane.b32.xlu2 %v4240_v57, %s3940_s2 }
 0x273   :  { %v657_v58 = vpop.permute.xlu0 %656 }
 0x274   :  { %660 = vst.msk [vmem:[#allocation3] sm:$0x3] %vm659_vm12, %v657_v58 }
 0x28e   :  { %v668_v59 = vpop.permute.xlu1 %667 }
 0x28f   :  { %v671_v60 = vsel %vm670_vm11, %v657_v58, %v668_v59  ;;  %v770_v58 = vpop.permute.xlu2 %769 }
 0x290   :  { %3488 = vmatmul.msk.f32.vlgmr.msra.gmra.mxu2 %vm535_vm13, %v671_v60  ;;  %3489 = vmatmul.msk.f32.vlgmr.msra.gmra.mxu3 %vm535_vm13, %v671_v60 }
 0x291   :  { %1294 = vmatpush.msra.mxu2 %v4052_v9  ;;  %1314 = vmatpush.msra.mxu3 %v4107_v20 }
 0x293   :  { %1295 = vmatpush.msra.mxu2 %v4059_v10  ;;  %1315 = vmatpush.msra.mxu3 %v4118_v22 }
 0x295   :  { %1296 = vmatpush.msra.mxu2 %v4065_v11  ;;  %1316 = vmatpush.msra.mxu3 %v4123_v23 }
 0x297   :  { %1297 = vmatpush.msra.mxu2 %v4071_v12  ;;  %1317 = vmatpush.msra.mxu3 %v4128_v24 }
 0x299   :  { %1298 = vmatpush.msra.mxu2 %v4082_v15  ;;  %1318 = vmatpush.msra.mxu3 %v4134_v25 }
 0x29b   :  { %1299 = vmatpush.msra.mxu2 %v4091_v16  ;;  %1319 = vmatpush.msra.mxu3 %v4141_v26 }
 0x29d   :  { %1300 = vmatpush.msra.mxu2 %v4096_v17  ;;  %1320 = vmatpush.msra.mxu3 %v4146_v27 }
 0x29f   :  { %1301 = vmatpush.msra.mxu2 %v4100_v18  ;;  %1321 = vmatpush.msra.mxu3 %v4152_v28 }
 0x313   :  { %v703_v62 = vpop.f32.mrf.mxu2  ;;  %v723_v63 = vpop.f32.mrf.mxu3 }
 0x314   :  { %v726_v0 = vadd.f32 %v703_v62, %v677_v61  ;;  %v727_v2 = vadd.f32 %v723_v63, %v4216_v32 }
 0x316   :  { %3590 = vtanh.f32 %v726_v0  ;;  %v3490_v5 = vmul.f32 -1.442695, %v726_v0  ;;  %v3491_v1 = vmul.f32 -1.442695, %v727_v2 }
 0x317   :  { %3592 = vtanh.f32 %v727_v2 }
 0x318   :  { %3594 = vpow2.f32 %v3490_v5 }
 0x319   :  { %3596 = vpow2.f32 %v3491_v1 }
 0x31c   :  { %v3591_v3 = vpop.eup %3590 }
 0x31d   :  { %v3593_v4 = vpop.eup %3592  ;;  %774 = vrot.lane.b32.xlu0 %v3591_v3, %s3939_s3 }
 0x31e   :  { %785 = vrot.lane.b32.xlu1 %v3593_v4, %s3939_s3  ;;  %v3595_v6 = vpop.eup %3594 }
 0x31f   :  { %v3597_v7 = vpop.eup %3596  ;;  %v731_v8 = vadd.f32 1.0, %v3595_v6 }
 0x320   :  { %v751_v13 = vadd.f32 1.0, %v3597_v7 }
 0x321   :  { %3598 = vrcp.f32 %v731_v8  ;;  %v743_v38 = vand.u32 2147483648, %v731_v8  ;;  %vm737_vm0 = vweird.f32 %v731_v8  ;;  %v741_v40 = vand.u32 2147483647, %v731_v8 }
 0x322   :  { %3600 = vrcp.f32 %v751_v13  ;;  %v763_v39 = vand.u32 2147483648, %v751_v13  ;;  %vm757_vm1 = vweird.f32 %v751_v13  ;;  %v761_v41 = vand.u32 2147483647, %v751_v13 }
 0x323   :  { %v744_v33 = vor.u32 1.1754944e-38, %v743_v38  ;;  %vm742_vm5 = vcmp.eq.f32.partialorder %v741_v40, 8.507059e+37 }
 0x324   :  { %v764_v44 = vor.u32 1.1754944e-38, %v763_v39  ;;  %vm762_vm6 = vcmp.eq.f32.partialorder %v761_v41, 8.507059e+37 }
 0x327   :  { %v3599_v14 = vpop.eup %3598 }
 0x328   :  { %v3601_v32 = vpop.eup %3600  ;;  %v733_v19 = vmul.f32 %v3599_v14, %v731_v8  ;;  %vm738_vm14 = vweird.f32 %v3599_v14 }
 0x329   :  { %v753_v29 = vmul.f32 %v3601_v32, %v751_v13  ;;  %vm758_vm15 = vweird.f32 %v3601_v32  ;;  %vm739_vm3 = vmor %vm737_vm0, %vm738_vm14 }
 0x32a   :  { %v734_v30 = vsub.f32 1.0, %v733_v19  ;;  %vm759_vm4 = vmor %vm757_vm1, %vm758_vm15 }
 0x32b   :  { %v754_v31 = vsub.f32 1.0, %v753_v29 }
 0x32c   :  { %v735_v34 = vmul.f32 %v3599_v14, %v734_v30 }
 0x32d   :  { %v755_v35 = vmul.f32 %v3601_v32, %v754_v31 }
 0x32e   :  { %v736_v36 = vadd.f32 %v3599_v14, %v735_v34 }
 0x32f   :  { %v756_v37 = vadd.f32 %v3601_v32, %v755_v35 }
 0x330   :  { %v740_v42 = vsel %vm739_vm3, %v3599_v14, %v736_v36 }
 0x331   :  { %v760_v43 = vsel %vm759_vm4, %v3601_v32, %v756_v37  ;;  %v745_v47 = vsel %vm742_vm5, %v744_v33, %v740_v42  ;;  %v827_v32 = vld [vmem:[#allocation2 + $0x8] sm:$0xf] }
 0x332   :  { %v765_v51 = vsel %vm762_vm6, %v764_v44, %v760_v43  ;;  %v772_v59 = vmul.f32 %v770_v58, %v745_v47 }
 0x333   :  { %v783_v60 = vmul.f32 %v765_v51, %v4240_v57 }
 0x38f   :  { %v775_v45 = vpop.permute.xlu0 %774 }
 0x390   :  { %v786_v49 = vpop.permute.xlu1 %785  ;;  %v777_v53 = vmul.f32 %v775_v45, %v745_v47 }
 0x391   :  { %v788_v56 = vmul.f32 %v786_v49, %v765_v51 }
 0x392   :  { %779 = vrot.lane.b32.xlu0 %v777_v53, %s3940_s2 }
 0x393   :  { %790 = vrot.lane.b32.xlu1 %v788_v56, %s3940_s2 }
 0x404   :  { %v780_v61 = vpop.permute.xlu0 %779 }
 0x405   :  { %v791_v62 = vpop.permute.xlu1 %790  ;;  %v782_v63 = vadd.f32 %v780_v61, %v772_v59 }
 0x406   :  { %v793_v0 = vadd.f32 %v791_v62, %v783_v60 }
 0x407   :  { %3602 = vtanh.f32 %v782_v63 }
 0x408   :  { %3604 = vtanh.f32 %v793_v0 }
 0x40d   :  { %v3603_v2 = vpop.eup %3602 }
 0x40e   :  { %v3605_v3 = vpop.eup %3604  ;;  %796 = vrot.lane.b32.xlu2 %v3603_v2, %s3939_s3 }
 0x40f   :  { %802 = vrot.lane.b32.xlu0 %v3605_v3, %s3939_s3 }
 0x417   :  { %823 = vrot.lane.b32.xlu0 %v782_v63, %s3941_s25 }
 0x468   :  { %v797_v4 = vpop.permute.xlu2 %796 }
 0x469   :  { %v799_v5 = vmul.f32 %v797_v4, %v745_v47 }
 0x46b   :  { %807 = vrot.lane.b32.xlu1 %v799_v5, %s3940_s2 }
 0x481   :  { %v803_v1 = vpop.permute.xlu0 %802 }
 0x482   :  { %v4274_v57 = vmul.f32 %v803_v1, %v765_v51 }
 0x484   :  { %818 = vrot.lane.b32.xlu2 %v4274_v57, %s3939_s3 }
 0x489   :  { %v824_v6 = vpop.permute.xlu0 %823 }
 0x48a   :  { %v4279_v7 = vsel %vm670_vm11, %v824_v6, %v793_v0 }
 0x48b   :  { %919 = vrot.lane.b32.xlu0 %v4279_v7, %s3940_s2 }
 0x4dd   :  { %v808_v8 = vpop.permute.xlu1 %807 }
 0x4de   :  { %811 = vst.msk [vmem:[#allocation3 + $0x2] sm:$0x3] %vm659_vm12, %v808_v8  ;;  %v819_v13 = vpop.permute.xlu2 %818 }
 0x4df   :  { %v821_v14 = vsel %vm670_vm11, %v808_v8, %v819_v13 }
 0x4e0   :  { %3492 = vmatmul.msk.f32.vlgmr.msra.gmra.mxu0 %vm535_vm13, %v821_v14  ;;  %3493 = vmatmul.msk.f32.vlgmr.msra.gmra.mxu1 %vm535_vm13, %v821_v14 }
 0x4e1   :  { %1444 = vmatpush.msra.mxu0 %v4052_v9  ;;  %1464 = vmatpush.msra.mxu1 %v4107_v20 }
 0x4e3   :  { %1445 = vmatpush.msra.mxu0 %v4059_v10  ;;  %1465 = vmatpush.msra.mxu1 %v4118_v22 }
 0x4e5   :  { %1446 = vmatpush.msra.mxu0 %v4065_v11  ;;  %1466 = vmatpush.msra.mxu1 %v4123_v23 }
 0x4e7   :  { %1447 = vmatpush.msra.mxu0 %v4071_v12  ;;  %1467 = vmatpush.msra.mxu1 %v4128_v24 }
 0x4e9   :  { %1448 = vmatpush.msra.mxu0 %v4082_v15  ;;  %1468 = vmatpush.msra.mxu1 %v4134_v25 }
 0x4eb   :  { %1449 = vmatpush.msra.mxu0 %v4091_v16  ;;  %1469 = vmatpush.msra.mxu1 %v4141_v26 }
 0x4ed   :  { %1450 = vmatpush.msra.mxu0 %v4096_v17  ;;  %1470 = vmatpush.msra.mxu1 %v4146_v27 }
 0x4ef   :  { %1451 = vmatpush.msra.mxu0 %v4100_v18  ;;  %1471 = vmatpush.msra.mxu1 %v4152_v28 }
 0x55d   :  { %v853_v19 = vpop.f32.mrf.mxu0  ;;  %v873_v29 = vpop.f32.mrf.mxu1 }
 0x55e   :  { %v876_v30 = vadd.f32 %v853_v19, %v827_v32  ;;  %v877_v31 = vadd.f32 %v873_v29, %v4219_v46  ;;  %v920_v19 = vpop.permute.xlu0 %919 }
 0x560   :  { %3606 = vtanh.f32 %v876_v30  ;;  %v3495_v36 = vmul.f32 -1.442695, %v877_v31  ;;  %v3494_v40 = vmul.f32 -1.442695, %v876_v30 }
 0x561   :  { %3608 = vtanh.f32 %v877_v31 }
 0x562   :  { %3610 = vpow2.f32 %v3495_v36 }
 0x566   :  { %v3607_v34 = vpop.eup %3606 }
 0x567   :  { %v3609_v35 = vpop.eup %3608  ;;  %924 = vrot.lane.b32.xlu1 %v3607_v34, %s3939_s3 }
 0x568   :  { %935 = vrot.lane.b32.xlu2 %v3609_v35, %s3939_s3  ;;  %v3611_v37 = vpop.eup %3610 }
 0x569   :  { %v901_v38 = vadd.f32 1.0, %v3611_v37 }
 0x56b   :  { %3612 = vrcp.f32 %v901_v38  ;;  %v913_v45 = vand.u32 2147483648, %v901_v38  ;;  %vm907_vm8 = vweird.f32 %v901_v38  ;;  %v911_v47 = vand.u32 2147483647, %v901_v38 }
 0x56c   :  { %3614 = vpow2.f32 %v3494_v40 }
 0x56d   :  { %v914_v51 = vor.u32 1.1754944e-38, %v913_v45  ;;  %vm912_vm10 = vcmp.eq.f32.partialorder %v911_v47, 8.507059e+37 }
 0x571   :  { %v3613_v39 = vpop.eup %3612 }
 0x572   :  { %v903_v41 = vmul.f32 %v3613_v39, %v901_v38  ;;  %v3615_v43 = vpop.eup %3614  ;;  %vm908_vm7 = vweird.f32 %v3613_v39 }
 0x573   :  { %v881_v33 = vadd.f32 1.0, %v3615_v43  ;;  %vm909_vm9 = vmor %vm907_vm8, %vm908_vm7 }
 0x574   :  { %v904_v42 = vsub.f32 1.0, %v903_v41 }
 0x575   :  { %3616 = vrcp.f32 %v881_v33  ;;  %v893_v0 = vand.u32 2147483648, %v881_v33  ;;  %vm887_vm15 = vweird.f32 %v881_v33  ;;  %v891_v2 = vand.u32 2147483647, %v881_v33 }
 0x576   :  { %v905_v46 = vmul.f32 %v3613_v39, %v904_v42 }
 0x577   :  { %v894_v4 = vor.u32 1.1754944e-38, %v893_v0  ;;  %vm892_vm1 = vcmp.eq.f32.partialorder %v891_v2, 8.507059e+37 }
 0x578   :  { %v906_v44 = vadd.f32 %v3613_v39, %v905_v46 }
 0x57a   :  { %v910_v49 = vsel %vm909_vm9, %v3613_v39, %v906_v44 }
 0x57b   :  { %v915_v56 = vsel %vm912_vm10, %v914_v51, %v910_v49  ;;  %v3617_v58 = vpop.eup %3616 }
 0x57c   :  { %v883_v60 = vmul.f32 %v3617_v58, %v881_v33  ;;  %vm888_vm14 = vweird.f32 %v3617_v58  ;;  %v933_v8 = vmul.f32 %v915_v56, %v4279_v7 }
 0x57d   :  { %vm889_vm0 = vmor %vm887_vm15, %vm888_vm14 }
 0x57e   :  { %v884_v61 = vsub.f32 1.0, %v883_v60 }
 0x580   :  { %v885_v62 = vmul.f32 %v3617_v58, %v884_v61 }
 0x582   :  { %v886_v63 = vadd.f32 %v3617_v58, %v885_v62 }
 0x584   :  { %v890_v3 = vsel %vm889_vm0, %v3617_v58, %v886_v63 }
 0x585   :  { %v895_v1 = vsel %vm892_vm1, %v894_v4, %v890_v3 }
 0x586   :  { %v922_v29 = vmul.f32 %v920_v19, %v895_v1 }
 0x5c2   :  { %v936_v53 = vpop.permute.xlu2 %935 }
 0x5c3   :  { %v938_v59 = vmul.f32 %v936_v53, %v915_v56 }
 0x5c5   :  { %940 = vrot.lane.b32.xlu2 %v938_v59, %s3940_s2 }
 0x5d9   :  { %v925_v5 = vpop.permute.xlu1 %924 }
 0x5da   :  { %v927_v6 = vmul.f32 %v925_v5, %v895_v1 }
 0x5dc   :  { %929 = vrot.lane.b32.xlu1 %v927_v6, %s3940_s2 }
 0x61f   :  { %v941_v13 = vpop.permute.xlu2 %940 }
 0x620   :  { %v943_v14 = vadd.f32 %v941_v13, %v933_v8 }
 0x622   :  { %3618 = vtanh.f32 %v943_v14 }
 0x628   :  { %v3619_v32 = vpop.eup %3618 }
 0x629   :  { %952 = vrot.lane.b32.xlu1 %v3619_v32, %s3939_s3 }
 0x64e   :  { %v930_v30 = vpop.permute.xlu1 %929 }
 0x64f   :  { %v932_v31 = vadd.f32 %v930_v30, %v922_v29 }
 0x651   :  { %3620 = vtanh.f32 %v932_v31  ;;  %973 = vrot.lane.b32.xlu1 %v932_v31, %s3941_s25 }
 0x657   :  { %v3621_v34 = vpop.eup %3620 }
 0x658   :  { %946 = vrot.lane.b32.xlu0 %v3621_v34, %s3939_s3 }
 0x69b   :  { %v953_v35 = vpop.permute.xlu1 %952 }
 0x69c   :  { %v4312_v36 = vmul.f32 %v953_v35, %v915_v56 }
 0x69e   :  { %968 = vrot.lane.b32.xlu0 %v4312_v36, %s3939_s3 }
 0x6c3   :  { %v974_v7 = vpop.permute.xlu1 %973 }
 0x6c4   :  { %v4317_v37 = vsel %vm670_vm11, %v974_v7, %v943_v14 }
 0x6c5   :  { %1069 = vrot.lane.b32.xlu1 %v4317_v37, %s3940_s2 }
 0x6ca   :  { %v947_v38 = vpop.permute.xlu0 %946 }
 0x6cb   :  { %v949_v39 = vmul.f32 %v947_v38, %v895_v1 }
 0x6cd   :  { %957 = vrot.lane.b32.xlu2 %v949_v39, %s3940_s2 }
 0x710   :  { %v969_v40 = vpop.permute.xlu0 %968 }
 0x727   :  { %v958_v41 = vpop.permute.xlu2 %957 }
 0x728   :  { %961 = vst.msk [vmem:[#allocation3 + $0x4] sm:$0x3] %vm659_vm12, %v958_v41  ;;  %v971_v42 = vsel %vm670_vm11, %v958_v41, %v969_v40  ;;  %v1127_v41 = vld [vmem:[#allocation2 + $0x10] sm:$0xf] }
 0x729   :  { %3496 = vmatmul.msk.f32.vlgmr.msrb.gmra.mxu2 %vm535_vm13, %v971_v42  ;;  %3497 = vmatmul.msk.f32.vlgmr.msrb.gmra.mxu3 %vm535_vm13, %v971_v42 }
 0x72a   :  { %1594 = vmatpush.msrb.mxu2 %v4052_v9  ;;  %1614 = vmatpush.msrb.mxu3 %v4107_v20  ;;  %v977_v9 = vld [vmem:[#allocation2 + $0xc] sm:$0xf] }
 0x72c   :  { %1595 = vmatpush.msrb.mxu2 %v4059_v10  ;;  %1615 = vmatpush.msrb.mxu3 %v4118_v22 }
 0x72e   :  { %1596 = vmatpush.msrb.mxu2 %v4065_v11  ;;  %1616 = vmatpush.msrb.mxu3 %v4123_v23 }
 0x730   :  { %1597 = vmatpush.msrb.mxu2 %v4071_v12  ;;  %1617 = vmatpush.msrb.mxu3 %v4128_v24 }
 0x732   :  { %1598 = vmatpush.msrb.mxu2 %v4082_v15  ;;  %1618 = vmatpush.msrb.mxu3 %v4134_v25 }
 0x734   :  { %1599 = vmatpush.msrb.mxu2 %v4091_v16  ;;  %1619 = vmatpush.msrb.mxu3 %v4141_v26 }
 0x736   :  { %1600 = vmatpush.msrb.mxu2 %v4096_v17  ;;  %1620 = vmatpush.msrb.mxu3 %v4146_v27 }
 0x737   :  { %v1070_v5 = vpop.permute.xlu1 %1069 }
 0x738   :  { %1601 = vmatpush.msrb.mxu2 %v4100_v18  ;;  %1621 = vmatpush.msrb.mxu3 %v4152_v28 }
 0x7ac   :  { %v1003_v10 = vpop.f32.mrf.mxu2  ;;  %v1023_v11 = vpop.f32.mrf.mxu3 }
 0x7ad   :  { %v1026_v12 = vadd.f32 %v1003_v10, %v977_v9  ;;  %v1027_v15 = vadd.f32 %v1023_v11, %v4221_v48 }
 0x7af   :  { %3622 = vtanh.f32 %v1026_v12  ;;  %v3498_v17 = vmul.f32 -1.442695, %v1026_v12  ;;  %v3499_v24 = vmul.f32 -1.442695, %v1027_v15 }
 0x7b0   :  { %3624 = vtanh.f32 %v1027_v15 }
 0x7b1   :  { %3626 = vpow2.f32 %v3498_v17 }
 0x7b5   :  { %v3623_v20 = vpop.eup %3622 }
 0x7b6   :  { %v3625_v16 = vpop.eup %3624  ;;  %1074 = vrot.lane.b32.xlu2 %v3623_v20, %s3939_s3 }
 0x7b7   :  { %1085 = vrot.lane.b32.xlu0 %v3625_v16, %s3939_s3  ;;  %v3627_v22 = vpop.eup %3626 }
 0x7b8   :  { %v1031_v18 = vadd.f32 1.0, %v3627_v22 }
 0x7ba   :  { %3628 = vrcp.f32 %v1031_v18  ;;  %v1043_v46 = vand.u32 2147483648, %v1031_v18  ;;  %vm1037_vm4 = vweird.f32 %v1031_v18  ;;  %v1041_v33 = vand.u32 2147483647, %v1031_v18 }
 0x7bb   :  { %3630 = vpow2.f32 %v3499_v24 }
 0x7bc   :  { %v1044_v45 = vor.u32 1.1754944e-38, %v1043_v46  ;;  %vm1042_vm6 = vcmp.eq.f32.partialorder %v1041_v33, 8.507059e+37 }
 0x7c0   :  { %v3629_v23 = vpop.eup %3628 }
 0x7c1   :  { %v1033_v25 = vmul.f32 %v3629_v23, %v1031_v18  ;;  %v3631_v28 = vpop.eup %3630  ;;  %vm1038_vm3 = vweird.f32 %v3629_v23 }
 0x7c2   :  { %v1051_v48 = vadd.f32 1.0, %v3631_v28  ;;  %vm1039_vm5 = vmor %vm1037_vm4, %vm1038_vm3 }
 0x7c3   :  { %v1034_v26 = vsub.f32 1.0, %v1033_v25 }
 0x7c4   :  { %3632 = vrcp.f32 %v1051_v48  ;;  %v1063_v61 = vand.u32 2147483648, %v1051_v48  ;;  %vm1057_vm8 = vweird.f32 %v1051_v48  ;;  %v1061_v62 = vand.u32 2147483647, %v1051_v48 }
 0x7c5   :  { %v1035_v27 = vmul.f32 %v3629_v23, %v1034_v26 }
 0x7c6   :  { %v1064_v0 = vor.u32 1.1754944e-38, %v1063_v61  ;;  %vm1062_vm10 = vcmp.eq.f32.partialorder %v1061_v62, 8.507059e+37 }
 0x7c7   :  { %v1036_v43 = vadd.f32 %v3629_v23, %v1035_v27 }
 0x7c9   :  { %v1040_v44 = vsel %vm1039_vm5, %v3629_v23, %v1036_v43 }
 0x7ca   :  { %v1045_v49 = vsel %vm1042_vm6, %v1044_v45, %v1040_v44  ;;  %v3633_v53 = vpop.eup %3632 }
 0x7cb   :  { %v1053_v56 = vmul.f32 %v3633_v53, %v1051_v48  ;;  %vm1058_vm7 = vweird.f32 %v3633_v53  ;;  %v1072_v1 = vmul.f32 %v1070_v5, %v1045_v49 }
 0x7cc   :  { %vm1059_vm9 = vmor %vm1057_vm8, %vm1058_vm7 }
 0x7cd   :  { %v1054_v58 = vsub.f32 1.0, %v1053_v56 }
 0x7cf   :  { %v1055_v59 = vmul.f32 %v3633_v53, %v1054_v58 }
 0x7d1   :  { %v1056_v60 = vadd.f32 %v3633_v53, %v1055_v59 }
 0x7d3   :  { %v1060_v63 = vsel %vm1059_vm9, %v3633_v53, %v1056_v60 }
 0x7d4   :  { %v1065_v3 = vsel %vm1062_vm10, %v1064_v0, %v1060_v63 }
 0x7d5   :  { %v1083_v14 = vmul.f32 %v1065_v3, %v4317_v37 }
 0x810   :  { %v1075_v47 = vpop.permute.xlu2 %1074 }
 0x811   :  { %v1077_v51 = vmul.f32 %v1075_v47, %v1045_v49 }
 0x813   :  { %1079 = vrot.lane.b32.xlu2 %v1077_v51, %s3940_s2 }
 0x829   :  { %v1086_v2 = vpop.permute.xlu0 %1085 }
 0x82a   :  { %v1088_v4 = vmul.f32 %v1086_v2, %v1065_v3 }
 0x82c   :  { %1090 = vrot.lane.b32.xlu0 %v1088_v4, %s3940_s2 }
 0x86d   :  { %v1080_v6 = vpop.permute.xlu2 %1079 }
 0x86e   :  { %v1082_v8 = vadd.f32 %v1080_v6, %v1072_v1 }
 0x870   :  { %3634 = vtanh.f32 %v1082_v8 }
 0x876   :  { %v3635_v13 = vpop.eup %3634 }
 0x877   :  { %1096 = vrot.lane.b32.xlu1 %v3635_v13, %s3939_s3 }
 0x89e   :  { %v1091_v32 = vpop.permute.xlu0 %1090 }
 0x89f   :  { %v1093_v19 = vadd.f32 %v1091_v32, %v1083_v14 }
 0x8a1   :  { %3636 = vtanh.f32 %v1093_v19 }
 0x8a7   :  { %v3637_v29 = vpop.eup %3636 }
 0x8a8   :  { %1102 = vrot.lane.b32.xlu2 %v3637_v29, %s3939_s3 }
 0x8b0   :  { %1123 = vrot.lane.b32.xlu2 %v1082_v8, %s3941_s25 }
 0x8e9   :  { %v1097_v30 = vpop.permute.xlu1 %1096 }
 0x8ea   :  { %v1099_v31 = vmul.f32 %v1097_v30, %v1045_v49 }
 0x8ec   :  { %1107 = vrot.lane.b32.xlu0 %v1099_v31, %s3940_s2 }
 0x902   :  { %v1103_v34 = vpop.permute.xlu2 %1102 }
 0x903   :  { %v4352_v35 = vmul.f32 %v1103_v34, %v1065_v3 }
 0x905   :  { %1118 = vrot.lane.b32.xlu1 %v4352_v35, %s3939_s3 }
 0x90a   :  { %v1124_v7 = vpop.permute.xlu2 %1123 }
 0x90b   :  { %v4357_v37 = vsel %vm670_vm11, %v1124_v7, %v1093_v19 }
 0x90c   :  { %1219 = vrot.lane.b32.xlu2 %v4357_v37, %s3940_s2 }
 0x95e   :  { %v1108_v38 = vpop.permute.xlu0 %1107 }
 0x95f   :  { %1111 = vst.msk [vmem:[#allocation3 + $0x6] sm:$0x3] %vm659_vm12, %v1108_v38 }
 0x966   :  { %v1220_v2 = vpop.permute.xlu2 %1219 }
 0x977   :  { %v1119_v39 = vpop.permute.xlu1 %1118 }
 0x978   :  { %v1121_v40 = vsel %vm670_vm11, %v1108_v38, %v1119_v39  ;;  %v1277_v39 = vld [vmem:[#allocation2 + $0x14] sm:$0xf] }
 0x979   :  { %3500 = vmatmul.msk.f32.vlgmr.msrb.gmra.mxu0 %vm535_vm13, %v1121_v40  ;;  %3501 = vmatmul.msk.f32.vlgmr.msrb.gmra.mxu1 %vm535_vm13, %v1121_v40 }
 0x9f6   :  { %v1153_v42 = vpop.f32.mrf.mxu0  ;;  %v1173_v9 = vpop.f32.mrf.mxu1 }
 0x9f7   :  { %v1176_v10 = vadd.f32 %v1153_v42, %v1127_v41  ;;  %v1177_v11 = vadd.f32 %v1173_v9, %v4223_v50 }
 0x9f9   :  { %3638 = vtanh.f32 %v1176_v10  ;;  %v3502_v20 = vmul.f32 -1.442695, %v1176_v10  ;;  %v3503_v16 = vmul.f32 -1.442695, %v1177_v11 }
 0x9fa   :  { %3640 = vtanh.f32 %v1177_v11 }
 0x9fb   :  { %3642 = vpow2.f32 %v3502_v20 }
 0x9fc   :  { %3644 = vpow2.f32 %v3503_v16 }
 0x9ff   :  { %v3639_v12 = vpop.eup %3638 }
 0xa00   :  { %v3641_v15 = vpop.eup %3640  ;;  %1224 = vrot.lane.b32.xlu0 %v3639_v12, %s3939_s3 }
 0xa01   :  { %1235 = vrot.lane.b32.xlu1 %v3641_v15, %s3939_s3  ;;  %v3643_v17 = vpop.eup %3642 }
 0xa02   :  { %v3645_v22 = vpop.eup %3644  ;;  %v1181_v18 = vadd.f32 1.0, %v3643_v17 }
 0xa03   :  { %v1201_v23 = vadd.f32 1.0, %v3645_v22 }
 0xa04   :  { %3646 = vrcp.f32 %v1181_v18  ;;  %v1193_v44 = vand.u32 2147483648, %v1181_v18  ;;  %vm1187_vm0 = vweird.f32 %v1181_v18  ;;  %v1191_v47 = vand.u32 2147483647, %v1181_v18 }
 0xa05   :  { %3648 = vrcp.f32 %v1201_v23  ;;  %v1213_v45 = vand.u32 2147483648, %v1201_v23  ;;  %vm1207_vm1 = vweird.f32 %v1201_v23  ;;  %v1211_v49 = vand.u32 2147483647, %v1201_v23 }
 0xa06   :  { %v1194_v56 = vor.u32 1.1754944e-38, %v1193_v44  ;;  %vm1192_vm5 = vcmp.eq.f32.partialorder %v1191_v47, 8.507059e+37 }
 0xa07   :  { %v1214_v58 = vor.u32 1.1754944e-38, %v1213_v45  ;;  %vm1212_vm6 = vcmp.eq.f32.partialorder %v1211_v49, 8.507059e+37 }
 0xa0a   :  { %v3647_v24 = vpop.eup %3646 }
 0xa0b   :  { %v3649_v50 = vpop.eup %3648  ;;  %v1183_v25 = vmul.f32 %v3647_v24, %v1181_v18  ;;  %vm1188_vm14 = vweird.f32 %v3647_v24 }
 0xa0c   :  { %v1203_v26 = vmul.f32 %v3649_v50, %v1201_v23  ;;  %vm1208_vm15 = vweird.f32 %v3649_v50  ;;  %vm1189_vm3 = vmor %vm1187_vm0, %vm1188_vm14 }
 0xa0d   :  { %v1184_v27 = vsub.f32 1.0, %v1183_v25  ;;  %vm1209_vm4 = vmor %vm1207_vm1, %vm1208_vm15 }
 0xa0e   :  { %v1204_v28 = vsub.f32 1.0, %v1203_v26 }
 0xa0f   :  { %v1185_v48 = vmul.f32 %v3647_v24, %v1184_v27 }
 0xa10   :  { %v1205_v43 = vmul.f32 %v3649_v50, %v1204_v28 }
 0xa11   :  { %v1186_v46 = vadd.f32 %v3647_v24, %v1185_v48 }
 0xa12   :  { %v1206_v33 = vadd.f32 %v3649_v50, %v1205_v43 }
 0xa13   :  { %v1190_v51 = vsel %vm1189_vm3, %v3647_v24, %v1186_v46 }
 0xa14   :  { %v1210_v53 = vsel %vm1209_vm4, %v3649_v50, %v1206_v33  ;;  %v1195_v60 = vsel %vm1192_vm5, %v1194_v56, %v1190_v51 }
 0xa15   :  { %v1215_v62 = vsel %vm1212_vm6, %v1214_v58, %v1210_v53  ;;  %v1222_v3 = vmul.f32 %v1220_v2, %v1195_v60 }
 0xa16   :  { %v1233_v4 = vmul.f32 %v1215_v62, %v4357_v37 }
 0xa72   :  { %v1225_v59 = vpop.permute.xlu0 %1224 }
 0xa73   :  { %v1236_v61 = vpop.permute.xlu1 %1235  ;;  %v1227_v63 = vmul.f32 %v1225_v59, %v1195_v60 }
 0xa74   :  { %v1238_v0 = vmul.f32 %v1236_v61, %v1215_v62 }
 0xa75   :  { %1229 = vrot.lane.b32.xlu0 %v1227_v63, %s3940_s2 }
 0xa76   :  { %1240 = vrot.lane.b32.xlu1 %v1238_v0, %s3940_s2 }
 0xae7   :  { %v1230_v5 = vpop.permute.xlu0 %1229 }
 0xae8   :  { %v1241_v1 = vpop.permute.xlu1 %1240  ;;  %v1232_v6 = vadd.f32 %v1230_v5, %v1222_v3 }
 0xae9   :  { %v1243_v8 = vadd.f32 %v1241_v1, %v1233_v4 }
 0xaea   :  { %3650 = vtanh.f32 %v1232_v6 }
 0xaeb   :  { %3652 = vtanh.f32 %v1243_v8 }
 0xaf0   :  { %v3651_v13 = vpop.eup %3650 }
 0xaf1   :  { %v3653_v14 = vpop.eup %3652  ;;  %1246 = vrot.lane.b32.xlu2 %v3651_v13, %s3939_s3 }
 0xaf2   :  { %1252 = vrot.lane.b32.xlu0 %v3653_v14, %s3939_s3 }
 0xafa   :  { %1273 = vrot.lane.b32.xlu0 %v1232_v6, %s3941_s25 }
 0xb4b   :  { %v1247_v32 = vpop.permute.xlu2 %1246 }
 0xb4c   :  { %v1249_v19 = vmul.f32 %v1247_v32, %v1195_v60 }
 0xb4e   :  { %1257 = vrot.lane.b32.xlu1 %v1249_v19, %s3940_s2 }
 0xb64   :  { %v1253_v29 = vpop.permute.xlu0 %1252 }
 0xb65   :  { %v4375_v30 = vmul.f32 %v1253_v29, %v1215_v62 }
 0xb67   :  { %1268 = vrot.lane.b32.xlu2 %v4375_v30, %s3939_s3 }
 0xb6c   :  { %v1274_v31 = vpop.permute.xlu0 %1273 }
 0xb6d   :  { %v4380_v34 = vsel %vm670_vm11, %v1274_v31, %v1243_v8 }
 0xb6e   :  { %1369 = vrot.lane.b32.xlu0 %v4380_v34, %s3940_s2 }
 0xbc0   :  { %v1258_v7 = vpop.permute.xlu1 %1257 }
 0xbc1   :  { %1261 = vst.msk [vmem:[#allocation3 + $0x8] sm:$0x3] %vm659_vm12, %v1258_v7  ;;  %v1269_v37 = vpop.permute.xlu2 %1268 }
 0xbc2   :  { %v1271_v38 = vsel %vm670_vm11, %v1258_v7, %v1269_v37  ;;  %v1427_v37 = vld [vmem:[#allocation2 + $0x18] sm:$0xf] }
 0xbc3   :  { %3504 = vmatmul.msk.f32.vlgmr.msra.gmra.mxu2 %vm535_vm13, %v1271_v38  ;;  %3505 = vmatmul.msk.f32.vlgmr.msra.gmra.mxu3 %vm535_vm13, %v1271_v38 }
 0xbe0   :  { %v1370_v3 = vpop.permute.xlu0 %1369 }
 0xc46   :  { %v1303_v40 = vpop.f32.mrf.mxu2  ;;  %v1323_v41 = vpop.f32.mrf.mxu3 }
 0xc47   :  { %v1326_v42 = vadd.f32 %v1303_v40, %v1277_v39  ;;  %v1327_v9 = vadd.f32 %v1323_v41, %v4225_v52 }
 0xc49   :  { %3654 = vtanh.f32 %v1326_v42  ;;  %v3507_v12 = vmul.f32 -1.442695, %v1327_v9  ;;  %v3506_v17 = vmul.f32 -1.442695, %v1326_v42 }
 0xc4a   :  { %3656 = vtanh.f32 %v1327_v9 }
 0xc4b   :  { %3658 = vpow2.f32 %v3507_v12 }
 0xc4f   :  { %v3655_v10 = vpop.eup %3654 }
 0xc50   :  { %v3657_v11 = vpop.eup %3656  ;;  %1374 = vrot.lane.b32.xlu1 %v3655_v10, %s3939_s3 }
 0xc51   :  { %1385 = vrot.lane.b32.xlu2 %v3657_v11, %s3939_s3  ;;  %v3659_v15 = vpop.eup %3658 }
 0xc52   :  { %v1351_v20 = vadd.f32 1.0, %v3659_v15 }
 0xc54   :  { %3660 = vrcp.f32 %v1351_v20  ;;  %v1363_v25 = vand.u32 2147483648, %v1351_v20  ;;  %vm1357_vm8 = vweird.f32 %v1351_v20  ;;  %v1361_v26 = vand.u32 2147483647, %v1351_v20 }
 0xc55   :  { %3662 = vpow2.f32 %v3506_v17 }
 0xc56   :  { %v1364_v28 = vor.u32 1.1754944e-38, %v1363_v25  ;;  %vm1362_vm10 = vcmp.eq.f32.partialorder %v1361_v26, 8.507059e+37 }
 0xc5a   :  { %v3661_v16 = vpop.eup %3660 }
 0xc5b   :  { %v1353_v22 = vmul.f32 %v3661_v16, %v1351_v20  ;;  %v3663_v23 = vpop.eup %3662  ;;  %vm1358_vm7 = vweird.f32 %v3661_v16 }
 0xc5c   :  { %v1331_v24 = vadd.f32 1.0, %v3663_v23  ;;  %vm1359_vm9 = vmor %vm1357_vm8, %vm1358_vm7 }
 0xc5d   :  { %v1354_v18 = vsub.f32 1.0, %v1353_v22 }
 0xc5e   :  { %3664 = vrcp.f32 %v1331_v24  ;;  %v1343_v51 = vand.u32 2147483648, %v1331_v24  ;;  %vm1337_vm15 = vweird.f32 %v1331_v24  ;;  %v1341_v53 = vand.u32 2147483647, %v1331_v24 }
 0xc5f   :  { %v1355_v52 = vmul.f32 %v3661_v16, %v1354_v18 }
 0xc60   :  { %v1344_v58 = vor.u32 1.1754944e-38, %v1343_v51  ;;  %vm1342_vm1 = vcmp.eq.f32.partialorder %v1341_v53, 8.507059e+37 }
 0xc61   :  { %v1356_v50 = vadd.f32 %v3661_v16, %v1355_v52 }
 0xc63   :  { %v1360_v27 = vsel %vm1359_vm9, %v3661_v16, %v1356_v50 }
 0xc64   :  { %v1365_v43 = vsel %vm1362_vm10, %v1364_v28, %v1360_v27  ;;  %v3665_v46 = vpop.eup %3664 }
 0xc65   :  { %v1333_v44 = vmul.f32 %v3665_v46, %v1331_v24  ;;  %vm1338_vm14 = vweird.f32 %v3665_v46  ;;  %v1383_v62 = vmul.f32 %v1365_v43, %v4380_v34 }
 0xc66   :  { %vm1339_vm0 = vmor %vm1337_vm15, %vm1338_vm14 }
 0xc67   :  { %v1334_v45 = vsub.f32 1.0, %v1333_v44 }
 0xc69   :  { %v1335_v47 = vmul.f32 %v3665_v46, %v1334_v45 }
 0xc6b   :  { %v1336_v49 = vadd.f32 %v3665_v46, %v1335_v47 }
 0xc6d   :  { %v1340_v56 = vsel %vm1339_vm0, %v3665_v46, %v1336_v49 }
 0xc6e   :  { %v1345_v60 = vsel %vm1342_vm1, %v1344_v58, %v1340_v56 }
 0xc6f   :  { %v1372_v4 = vmul.f32 %v1370_v3, %v1345_v60 }
 0xcab   :  { %v1386_v48 = vpop.permute.xlu2 %1385 }
 0xcac   :  { %v1388_v33 = vmul.f32 %v1386_v48, %v1365_v43 }
 0xcae   :  { %1390 = vrot.lane.b32.xlu2 %v1388_v33, %s3940_s2 }
 0xcc2   :  { %v1375_v59 = vpop.permute.xlu1 %1374 }
 0xcc3   :  { %v1377_v61 = vmul.f32 %v1375_v59, %v1345_v60 }
 0xcc5   :  { %1379 = vrot.lane.b32.xlu1 %v1377_v61, %s3940_s2 }
 0xd08   :  { %v1391_v63 = vpop.permute.xlu2 %1390 }
 0xd09   :  { %v1393_v0 = vadd.f32 %v1391_v63, %v1383_v62 }
 0xd0b   :  { %3666 = vtanh.f32 %v1393_v0 }
 0xd11   :  { %v3667_v2 = vpop.eup %3666 }
 0xd12   :  { %1402 = vrot.lane.b32.xlu1 %v3667_v2, %s3939_s3 }
 0xd37   :  { %v1380_v5 = vpop.permute.xlu1 %1379 }
 0xd38   :  { %v1382_v1 = vadd.f32 %v1380_v5, %v1372_v4 }
 0xd3a   :  { %3668 = vtanh.f32 %v1382_v1  ;;  %1423 = vrot.lane.b32.xlu1 %v1382_v1, %s3941_s25 }
 0xd40   :  { %v3669_v6 = vpop.eup %3668 }
 0xd41   :  { %1396 = vrot.lane.b32.xlu0 %v3669_v6, %s3939_s3 }
 0xd84   :  { %v1403_v8 = vpop.permute.xlu1 %1402 }
 0xd85   :  { %v4397_v13 = vmul.f32 %v1403_v8, %v1365_v43 }
 0xd87   :  { %1418 = vrot.lane.b32.xlu0 %v4397_v13, %s3939_s3 }
 0xdac   :  { %v1424_v14 = vpop.permute.xlu1 %1423 }
 0xdad   :  { %v4402_v32 = vsel %vm670_vm11, %v1424_v14, %v1393_v0 }
 0xdae   :  { %1519 = vrot.lane.b32.xlu1 %v4402_v32, %s3940_s2 }
 0xdb3   :  { %v1397_v19 = vpop.permute.xlu0 %1396 }
 0xdb4   :  { %v1399_v29 = vmul.f32 %v1397_v19, %v1345_v60 }
 0xdb6   :  { %1407 = vrot.lane.b32.xlu2 %v1399_v29, %s3940_s2 }
 0xdf9   :  { %v1419_v31 = vpop.permute.xlu0 %1418 }
 0xe10   :  { %v1408_v34 = vpop.permute.xlu2 %1407 }
 0xe11   :  { %1411 = vst.msk [vmem:[#allocation3 + $0xa] sm:$0x3] %vm659_vm12, %v1408_v34  ;;  %v1421_v7 = vsel %vm670_vm11, %v1408_v34, %v1419_v31 }
 0xe12   :  { %3508 = vmatmul.msk.f32.vlgmr.msra.gmra.mxu0 %vm535_vm13, %v1421_v7  ;;  %3509 = vmatmul.msk.f32.vlgmr.msra.gmra.mxu1 %vm535_vm13, %v1421_v7 }
 0xe20   :  { %v1520_v59 = vpop.permute.xlu1 %1519 }
 0xe8f   :  { %v1453_v38 = vpop.f32.mrf.mxu0  ;;  %v1473_v39 = vpop.f32.mrf.mxu1 }
 0xe90   :  { %v1476_v40 = vadd.f32 %v1453_v38, %v1427_v37  ;;  %v1477_v41 = vadd.f32 %v1473_v39, %v4227_v54  ;;  %v1581_v37 = vld.sshfl [vmem:[#allocation1 + $0x8] sm:$0xff pattern:$0x73625140] }
 0xe92   :  { %3670 = vtanh.f32 %v1476_v40  ;;  %v3510_v10 = vmul.f32 -1.442695, %v1476_v40  ;;  %v3511_v20 = vmul.f32 -1.442695, %v1477_v41 }
 0xe93   :  { %3672 = vtanh.f32 %v1477_v41  ;;  %v1577_v41 = vld [vmem:[#allocation2 + $0x1c] sm:$0xf] }
 0xe94   :  { %3674 = vpow2.f32 %v3510_v10 }
 0xe98   :  { %v3671_v42 = vpop.eup %3670 }
 0xe99   :  { %v3673_v9 = vpop.eup %3672  ;;  %1524 = vrot.lane.b32.xlu2 %v3671_v42, %s3939_s3 }
 0xe9a   :  { %1535 = vrot.lane.b32.xlu0 %v3673_v9, %s3939_s3  ;;  %v3675_v11 = vpop.eup %3674 }
 0xe9b   :  { %v1481_v12 = vadd.f32 1.0, %v3675_v11 }
 0xe9d   :  { %3676 = vrcp.f32 %v1481_v12  ;;  %v1493_v52 = vand.u32 2147483648, %v1481_v12  ;;  %vm1487_vm4 = vweird.f32 %v1481_v12  ;;  %v1491_v24 = vand.u32 2147483647, %v1481_v12 }
 0xe9e   :  { %3678 = vpow2.f32 %v3511_v20 }
 0xe9f   :  { %v1494_v25 = vor.u32 1.1754944e-38, %v1493_v52  ;;  %vm1492_vm6 = vcmp.eq.f32.partialorder %v1491_v24, 8.507059e+37 }
 0xea3   :  { %v3677_v15 = vpop.eup %3676 }
 0xea4   :  { %v1483_v16 = vmul.f32 %v3677_v15, %v1481_v12  ;;  %v3679_v54 = vpop.eup %3678  ;;  %vm1488_vm3 = vweird.f32 %v3677_v15 }
 0xea5   :  { %v1501_v18 = vadd.f32 1.0, %v3679_v54  ;;  %vm1489_vm5 = vmor %vm1487_vm4, %vm1488_vm3 }
 0xea6   :  { %v1484_v17 = vsub.f32 1.0, %v1483_v16 }
 0xea7   :  { %3680 = vrcp.f32 %v1501_v18  ;;  %v1513_v45 = vand.u32 2147483648, %v1501_v18  ;;  %vm1507_vm8 = vweird.f32 %v1501_v18  ;;  %v1511_v47 = vand.u32 2147483647, %v1501_v18 }
 0xea8   :  { %v1485_v22 = vmul.f32 %v3677_v15, %v1484_v17 }
 0xea9   :  { %v1514_v51 = vor.u32 1.1754944e-38, %v1513_v45  ;;  %vm1512_vm10 = vcmp.eq.f32.partialorder %v1511_v47, 8.507059e+37 }
 0xeaa   :  { %v1486_v23 = vadd.f32 %v3677_v15, %v1485_v22 }
 0xeac   :  { %v1490_v50 = vsel %vm1489_vm5, %v3677_v15, %v1486_v23 }
 0xead   :  { %v1495_v27 = vsel %vm1492_vm6, %v1494_v25, %v1490_v50  ;;  %v3681_v48 = vpop.eup %3680 }
 0xeae   :  { %v1503_v43 = vmul.f32 %v3681_v48, %v1501_v18  ;;  %vm1508_vm7 = vweird.f32 %v3681_v48  ;;  %v1522_v60 = vmul.f32 %v1520_v59, %v1495_v27 }
 0xeaf   :  { %vm1509_vm9 = vmor %vm1507_vm8, %vm1508_vm7 }
 0xeb0   :  { %v1504_v46 = vsub.f32 1.0, %v1503_v43 }
 0xeb2   :  { %v1505_v33 = vmul.f32 %v3681_v48, %v1504_v46 }
 0xeb4   :  { %v1506_v44 = vadd.f32 %v3681_v48, %v1505_v33 }
 0xeb6   :  { %v1510_v49 = vsel %vm1509_vm9, %v3681_v48, %v1506_v44 }
 0xeb7   :  { %v1515_v56 = vsel %vm1512_vm10, %v1514_v51, %v1510_v49 }
 0xeb8   :  { %v1533_v0 = vmul.f32 %v1515_v56, %v4402_v32 }
 0xef3   :  { %v1525_v26 = vpop.permute.xlu2 %1524 }
 0xef4   :  { %v1527_v28 = vmul.f32 %v1525_v26, %v1495_v27 }
 0xef6   :  { %1529 = vrot.lane.b32.xlu2 %v1527_v28, %s3940_s2 }
 0xf0c   :  { %v1536_v53 = vpop.permute.xlu0 %1535 }
 0xf0d   :  { %v1538_v58 = vmul.f32 %v1536_v53, %v1515_v56 }
 0xf0f   :  { %1540 = vrot.lane.b32.xlu0 %v1538_v58, %s3940_s2 }
 0xf50   :  { %v1530_v61 = vpop.permute.xlu2 %1529 }
 0xf51   :  { %v1532_v62 = vadd.f32 %v1530_v61, %v1522_v60 }
 0xf53   :  { %3682 = vtanh.f32 %v1532_v62 }
 0xf59   :  { %v3683_v63 = vpop.eup %3682 }
 0xf5a   :  { %1546 = vrot.lane.b32.xlu1 %v3683_v63, %s3939_s3 }
 0xf81   :  { %v1541_v2 = vpop.permute.xlu0 %1540 }
 0xf82   :  { %v1543_v3 = vadd.f32 %v1541_v2, %v1533_v0 }
 0xf84   :  { %3684 = vtanh.f32 %v1543_v3 }
 0xf8a   :  { %v3685_v4 = vpop.eup %3684 }
 0xf8b   :  { %1552 = vrot.lane.b32.xlu2 %v3685_v4, %s3939_s3 }
 0xfcc   :  { %v1547_v5 = vpop.permute.xlu1 %1546 }
 0xfcd   :  { %v1549_v1 = vmul.f32 %v1547_v5, %v1495_v27 }
 0xfcf   :  { %1557 = vrot.lane.b32.xlu0 %v1549_v1, %s3940_s2 }
 0xfd7   :  { %1573 = vrot.lane.b32.xlu0 %v1532_v62, %s3941_s25 }
 0xfe5   :  { %v1553_v6 = vpop.permute.xlu2 %1552 }
 0xfe6   :  { %v1555_v8 = vmul.f32 %v1553_v6, %v1515_v56 }
 0xfe8   :  { %1568 = vrot.lane.b32.xlu1 %v1555_v8, %s3939_s3 }
0x1041   :  { %v1558_v14 = vpop.permute.xlu0 %1557 }
0x1042   :  { %1561 = vst.msk [vmem:[#allocation3 + $0xc] sm:$0x3] %vm659_vm12, %v1558_v14 }
0x1049   :  { %v1574_v32 = vpop.permute.xlu0 %1573 }
0x104a   :  { %v4424_v19 = vsel %vm670_vm11, %v1574_v32, %v1543_v3  ;;  %v4473_v32 = vld [vmem:[#allocation10 + $0x68] sm:$0xff] }
0x104b   :  { %1669 = vrot.lane.b32.xlu0 %v4424_v19, %s3940_s2 }
0x1053   :  { %1563 = vrot.lane.b32.xlu0 %v1555_v8, %s3940_s2 }
0x105a   :  { %v1569_v29 = vpop.permute.xlu1 %1568 }
0x105b   :  { %v1571_v31 = vsel %vm670_vm11, %v1558_v14, %v1569_v29  ;;  %v4469_v14 = vld [vmem:[#allocation10 + $0x60] sm:$0xff] }
0x105c   :  { %3512 = vmatmul.msk.f32.vlgmr.msrb.gmra.mxu2 %vm535_vm13, %v1571_v31  ;;  %3513 = vmatmul.msk.f32.vlgmr.msrb.gmra.mxu3 %vm535_vm13, %v1571_v31  ;;  %v4483_v29 = vld [vmem:[#allocation10 + $0x40] sm:$0xff]  ;;  %v4485_v31 = vld [vmem:[#allocation10 + $0x48] sm:$0xff] }
0x10bd   :  { %v4432_v34 = vpop.permute.xlu0 %1669 }
0x10c5   :  { %v1564_v7 = vpop.permute.xlu0 %1563 }
0x10c6   :  { %1567 = vst.msk [vmem:[#allocation4 + $0x2] sm:$0x3] %vm659_vm12, %v1564_v7  ;;  %v4492_v7 = vld [vmem:[#allocation10 + $0x30] sm:$0xff] }
0x10df   :  { %v1623_v38 = vpop.f32.mrf.mxu3  ;;  %v1603_v40 = vpop.f32.mrf.mxu2 }
0x10e0   :  { %v1627_v39 = vadd.f32 %v1623_v38, %v1581_v37  ;;  %v1626_v42 = vadd.f32 %v1603_v40, %v1577_v41  ;;  %v4494_v37 = vld [vmem:[#allocation10 + $0x38] sm:$0xff]  ;;  %v4503_v40 = vld [vmem:[#allocation10 + $0x28] sm:$0xff]  ;;  %v4508_v41 = vld [vmem:[#allocation10 + $0x10] sm:$0xff] }
0x10e2   :  { %3686 = vtanh.f32 %v1627_v39  ;;  %v3515_v11 = vmul.f32 -1.442695, %v1627_v39  ;;  %v3514_v12 = vmul.f32 -1.442695, %v1626_v42  ;;  %v4501_v39 = vld [vmem:[#allocation10 + $0x20] sm:$0xff] }
0x10e3   :  { %3688 = vtanh.f32 %v1626_v42  ;;  %v4510_v42 = vld [vmem:[#allocation10 + $0x18] sm:$0xff] }
0x10e4   :  { %3690 = vpow2.f32 %v3515_v11 }
0x10e5   :  { %3692 = vpow2.f32 %v3514_v12 }
0x10e8   :  { %v3687_v9 = vpop.eup %3686 }
0x10e9   :  { %1685 = vrot.lane.b32.xlu2 %v3687_v9, %s3939_s3  ;;  %v3689_v10 = vpop.eup %3688 }
0x10ea   :  { %v3691_v15 = vpop.eup %3690 }
0x10eb   :  { %v1651_v20 = vadd.f32 1.0, %v3691_v15  ;;  %v3693_v16 = vpop.eup %3692 }
0x10ec   :  { %v1631_v17 = vadd.f32 1.0, %v3693_v16  ;;  %v4530_v16 = vld [vmem:[#allocation10 + $0x8] sm:$0xff] }
0x10ed   :  { %3694 = vrcp.f32 %v1651_v20  ;;  %v1663_v26 = vand.u32 2147483648, %v1651_v20  ;;  %vm1657_vm15 = vweird.f32 %v1651_v20  ;;  %v1661_v27 = vand.u32 2147483647, %v1651_v20 }
0x10ee   :  { %3696 = vrcp.f32 %v1631_v17  ;;  %v1643_v47 = vand.u32 2147483648, %v1631_v17  ;;  %vm1637_vm4 = vweird.f32 %v1631_v17  ;;  %v1641_v49 = vand.u32 2147483647, %v1631_v17 }
0x10ef   :  { %v1664_v43 = vor.u32 1.1754944e-38, %v1663_v26  ;;  %vm1662_vm1 = vcmp.eq.f32.partialorder %v1661_v27, 8.507059e+37  ;;  %v1923_v27 = vld [vmem:[#allocation3 + $0x6] sm:$0x3] }
0x10f0   :  { %v1644_v53 = vor.u32 1.1754944e-38, %v1643_v47  ;;  %vm1642_vm6 = vcmp.eq.f32.partialorder %v1641_v49, 8.507059e+37  ;;  %v1755_v47 = vld [vmem:[#allocation3] sm:$0x3] }
0x10f1   :  { %1674 = vrot.lane.b32.xlu2 %v3689_v10, %s3939_s3 }
0x10f3   :  { %v3695_v22 = vpop.eup %3694 }
0x10f4   :  { %v1653_v54 = vmul.f32 %v3695_v22, %v1651_v20  ;;  %v3697_v23 = vpop.eup %3696  ;;  %vm1658_vm14 = vweird.f32 %v3695_v22  ;;  %v4528_v20 = vld [vmem:[#allocation10] sm:$0xff] }
0x10f5   :  { %v1633_v24 = vmul.f32 %v3697_v23, %v1631_v17  ;;  %vm1659_vm0 = vmor %vm1657_vm15, %vm1658_vm14  ;;  %vm1638_vm3 = vweird.f32 %v3697_v23 }
0x10f6   :  { %v1654_v18 = vsub.f32 1.0, %v1653_v54  ;;  %vm1639_vm5 = vmor %vm1637_vm4, %vm1638_vm3 }
0x10f7   :  { %v1634_v25 = vsub.f32 1.0, %v1633_v24 }
0x10f8   :  { %v1655_v52 = vmul.f32 %v3695_v22, %v1654_v18 }
0x10f9   :  { %v1635_v48 = vmul.f32 %v3697_v23, %v1634_v25 }
0x10fa   :  { %v1656_v50 = vadd.f32 %v3695_v22, %v1655_v52 }
0x10fb   :  { %v1636_v45 = vadd.f32 %v3697_v23, %v1635_v48 }
0x10fc   :  { %v1660_v28 = vsel %vm1659_vm0, %v3695_v22, %v1656_v50 }
0x10fd   :  { %v1665_v33 = vsel %vm1662_vm1, %v1664_v43, %v1660_v28  ;;  %v1640_v51 = vsel %vm1639_vm5, %v3697_v23, %v1636_v45  ;;  %v1811_v23 = vld [vmem:[#allocation3 + $0x2] sm:$0x3]  ;;  %v2035_v43 = vld [vmem:[#allocation3 + $0xa] sm:$0x3] }
0x10fe   :  { %v4438_v58 = vsel %vm1642_vm6, %v1644_v53, %v1640_v51  ;;  %v1683_v60 = vmul.f32 %v1665_v33, %v4424_v19  ;;  %v4475_v19 = vld [vmem:[#allocation10 + $0x50] sm:$0xff] }
0x10ff   :  { %v1672_v63 = vmul.f32 %v4432_v34, %v4438_v58  ;;  %v4618_v51 = vld [vmem:[#allocation12 + $0x70] sm:$0xff] }
0x1143   :  { %v1686_v46 = vpop.permute.xlu2 %1685 }
0x1144   :  { %v1688_v44 = vmul.f32 %v1686_v46, %v1665_v33 }
0x1146   :  { %1690 = vrot.lane.b32.xlu1 %v1688_v44, %s3940_s2 }
0x114b   :  { %v1675_v56 = vpop.permute.xlu2 %1674 }
0x114c   :  { %v1677_v59 = vmul.f32 %v1675_v56, %v4438_v58  ;;  %v4626_v56 = vld [vmem:[#allocation12 + $0x78] sm:$0xff] }
0x114e   :  { %1679 = vrot.lane.b32.xlu1 %v1677_v59, %s3940_s2  ;;  %v4634_v59 = vld [vmem:[#allocation12 + $0x68] sm:$0xff] }
0x1156   :  { %1263 = vrot.lane.b32.xlu1 %v4375_v30, %s3940_s2 }
0x11b8   :  { %v1691_v61 = vpop.permute.xlu1 %1690 }
0x11b9   :  { %v1693_v62 = vadd.f32 %v1691_v61, %v1683_v60  ;;  %v4636_v60 = vld [vmem:[#allocation12 + $0x50] sm:$0xff]  ;;  %v4642_v61 = vld [vmem:[#allocation12 + $0x58] sm:$0xff] }
0x11bb   :  { %3698 = vtanh.f32 %v1693_v62  ;;  %v4644_v62 = vld [vmem:[#allocation12 + $0x40] sm:$0xff] }
0x11c0   :  { %v1680_v0 = vpop.permute.xlu1 %1679 }
0x11c1   :  { %v3699_v2 = vpop.eup %3698  ;;  %v1682_v3 = vadd.f32 %v1680_v0, %v1672_v63  ;;  %v1867_v63 = vld [vmem:[#allocation3 + $0x4] sm:$0x3] }
0x11c2   :  { %1702 = vrot.lane.b32.xlu2 %v3699_v2, %s3939_s3 }
0x11c3   :  { %3700 = vtanh.f32 %v1682_v3  ;;  %v4655_v3 = vld [vmem:[#allocation12 + $0x48] sm:$0xff] }
0x11c8   :  { %v1264_v4 = vpop.permute.xlu1 %1263 }
0x11c9   :  { %v3701_v5 = vpop.eup %3700  ;;  %1267 = vst.msk [vmem:[#allocation4 + $0x6] sm:$0x3] %vm659_vm12, %v1264_v4  ;;  %v4657_v4 = vld [vmem:[#allocation12 + $0x30] sm:$0xff] }
0x11ca   :  { %963 = vrot.lane.b32.xlu2 %v4312_v36, %s3940_s2  ;;  %1696 = vrot.lane.b32.xlu1 %v3701_v5, %s3939_s3  ;;  %v1812_v36 = vld [vmem:[#allocation4 + $0x2] sm:$0x3]  ;;  %v4663_v5 = vld [vmem:[#allocation12 + $0x38] sm:$0xff] }
0x11d0   :  { %v1924_v30 = vld [vmem:[#allocation4 + $0x6] sm:$0x3] }
0x11d2   :  { %662 = vrot.lane.b32.xlu2 %v4235_v55, %s3940_s2  ;;  %1113 = vrot.lane.b32.xlu1 %v4352_v35, %s3940_s2  ;;  %v4465_v35 = vld [vmem:[#allocation10 + $0x70] sm:$0xff] }
0x11d3   :  { %1829 = vmatpush.msra.mxu2 %v4465_v35  ;;  %1773 = vmatpush.msrb.mxu0 %v4465_v35 }
0x11d5   :  { %1830 = vmatpush.msra.mxu2 %v4469_v14  ;;  %1774 = vmatpush.msrb.mxu0 %v4469_v14 }
0x11d7   :  { %1831 = vmatpush.msra.mxu2 %v4475_v19  ;;  %1775 = vmatpush.msrb.mxu0 %v4475_v19 }
0x11d9   :  { %1832 = vmatpush.msra.mxu2 %v4483_v29  ;;  %1776 = vmatpush.msrb.mxu0 %v4483_v29 }
0x11da   :  { %813 = vrot.lane.b32.xlu2 %v4274_v57, %s3940_s2  ;;  %1926 = vrot.lane.b32.xlu1 %v1924_v30, %s3940_s2  ;;  %v4467_v57 = vld [vmem:[#allocation10 + $0x78] sm:$0xff]  ;;  %v4665_v30 = vld [vmem:[#allocation12 + $0x20] sm:$0xff] }
0x11db   :  { %1849 = vmatpush.msra.mxu3 %v4467_v57  ;;  %1793 = vmatpush.msrb.mxu1 %v4467_v57 }
0x11dc   :  { %1833 = vmatpush.msra.mxu2 %v4492_v7  ;;  %1777 = vmatpush.msrb.mxu0 %v4492_v7 }
0x11dd   :  { %1850 = vmatpush.msra.mxu3 %v4473_v32  ;;  %1794 = vmatpush.msrb.mxu1 %v4473_v32 }
0x11de   :  { %1834 = vmatpush.msra.mxu2 %v4501_v39  ;;  %1778 = vmatpush.msrb.mxu0 %v4501_v39 }
0x11e0   :  { %1835 = vmatpush.msra.mxu2 %v4508_v41  ;;  %1779 = vmatpush.msrb.mxu0 %v4508_v41 }
0x11e2   :  { %1836 = vmatpush.msra.mxu2 %v4528_v20  ;;  %1780 = vmatpush.msrb.mxu0 %v4528_v20 }
0x11e4   :  { %1941 = vmatpush.msrb.mxu2 %v4465_v35  ;;  %1885 = vmatpush.msra.mxu0 %v4465_v35 }
0x11e6   :  { %1942 = vmatpush.msrb.mxu2 %v4469_v14  ;;  %1886 = vmatpush.msra.mxu0 %v4469_v14 }
0x11e8   :  { %1943 = vmatpush.msrb.mxu2 %v4475_v19  ;;  %1887 = vmatpush.msra.mxu0 %v4475_v19 }
0x11ea   :  { %1944 = vmatpush.msrb.mxu2 %v4483_v29  ;;  %1888 = vmatpush.msra.mxu0 %v4483_v29 }
0x11ec   :  { %1945 = vmatpush.msrb.mxu2 %v4492_v7  ;;  %1889 = vmatpush.msra.mxu0 %v4492_v7 }
0x11ee   :  { %1946 = vmatpush.msrb.mxu2 %v4501_v39  ;;  %1890 = vmatpush.msra.mxu0 %v4501_v39 }
0x11f0   :  { %1947 = vmatpush.msrb.mxu2 %v4508_v41  ;;  %1891 = vmatpush.msra.mxu0 %v4508_v41 }
0x11f2   :  { %1948 = vmatpush.msrb.mxu2 %v4528_v20  ;;  %1892 = vmatpush.msra.mxu0 %v4528_v20 }
0x121c   :  { %v1703_v1 = vpop.permute.xlu2 %1702 }
0x121d   :  { %v1705_v6 = vmul.f32 %v1703_v1, %v1665_v33 }
0x121f   :  { %1713 = vrot.lane.b32.xlu0 %v1705_v6, %s3940_s2  ;;  %v4671_v6 = vld [vmem:[#allocation12 + $0x28] sm:$0xff] }
0x1224   :  { %v964_v8 = vpop.permute.xlu2 %963 }
0x1225   :  { %967 = vst.msk [vmem:[#allocation4 + $0xa] sm:$0x3] %vm659_vm12, %v964_v8  ;;  %v4673_v8 = vld [vmem:[#allocation12 + $0x10] sm:$0xff] }
0x1227   :  { %1413 = vrot.lane.b32.xlu0 %v4397_v13, %s3940_s2  ;;  %v4477_v13 = vld [vmem:[#allocation10 + $0x58] sm:$0xff] }
0x1228   :  { %1851 = vmatpush.msra.mxu3 %v4477_v13  ;;  %1795 = vmatpush.msrb.mxu1 %v4477_v13 }
0x122a   :  { %1852 = vmatpush.msra.mxu3 %v4485_v31  ;;  %1796 = vmatpush.msrb.mxu1 %v4485_v31 }
0x122c   :  { %v663_v55 = vpop.permute.xlu2 %662  ;;  %v2036_v38 = vld [vmem:[#allocation4 + $0xa] sm:$0x3]  ;;  %1853 = vmatpush.msra.mxu3 %v4494_v37  ;;  %1797 = vmatpush.msrb.mxu1 %v4494_v37 }
0x122d   :  { %666 = vst.msk [vmem:[#allocation4 + $0xe] sm:$0x3] %vm659_vm12, %v663_v55  ;;  %v1979_v55 = vld [vmem:[#allocation3 + $0x8] sm:$0x3] }
0x122e   :  { %1854 = vmatpush.msra.mxu3 %v4503_v40  ;;  %1798 = vmatpush.msrb.mxu1 %v4503_v40 }
0x122f   :  { %1814 = vrot.lane.b32.xlu0 %v1812_v36, %s3940_s2 }
0x1230   :  { %1855 = vmatpush.msra.mxu3 %v4510_v42  ;;  %1799 = vmatpush.msrb.mxu1 %v4510_v42 }
0x1232   :  { %1856 = vmatpush.msra.mxu3 %v4530_v16  ;;  %1800 = vmatpush.msrb.mxu1 %v4530_v16 }
0x1234   :  { %v814_v34 = vpop.permute.xlu2 %813  ;;  %v2148_v12 = vld [vmem:[#allocation4 + $0xe] sm:$0x3]  ;;  %1961 = vmatpush.msrb.mxu3 %v4467_v57  ;;  %1905 = vmatpush.msra.mxu1 %v4467_v57 }
0x1235   :  { %817 = vst.msk [vmem:[#allocation4 + $0xc] sm:$0x3] %vm659_vm12, %v814_v34  ;;  %v1749_v34 = vld [vmem:[%s5081_s6] sm:$0x3] }
0x1236   :  { %1962 = vmatpush.msrb.mxu3 %v4473_v32  ;;  %1906 = vmatpush.msra.mxu1 %v4473_v32 }
0x1237   :  { %2038 = vrot.lane.b32.xlu0 %v2036_v38, %s3940_s2  ;;  %v4689_v38 = vld [vmem:[#allocation12 + $0x18] sm:$0xff] }
0x1238   :  { %1963 = vmatpush.msrb.mxu3 %v4477_v13  ;;  %1907 = vmatpush.msra.mxu1 %v4477_v13 }
0x123a   :  { %1964 = vmatpush.msrb.mxu3 %v4485_v31  ;;  %1908 = vmatpush.msra.mxu1 %v4485_v31 }
0x123c   :  { %v1697_v9 = vpop.permute.xlu1 %1696  ;;  %v2092_v15 = vld [vmem:[#allocation4 + $0xc] sm:$0x3]  ;;  %1965 = vmatpush.msrb.mxu3 %v4494_v37  ;;  %1909 = vmatpush.msra.mxu1 %v4494_v37 }
0x123d   :  { %v1699_v10 = vmul.f32 %v1697_v9, %v4438_v58  ;;  %v4628_v58 = vld [vmem:[#allocation12 + $0x60] sm:$0xff] }
0x123e   :  { %1966 = vmatpush.msrb.mxu3 %v4503_v40  ;;  %1910 = vmatpush.msra.mxu1 %v4503_v40  ;;  %v4691_v9 = vld [vmem:[#allocation12] sm:$0xff] }
0x123f   :  { %1707 = vrot.lane.b32.xlu2 %v1699_v10, %s3940_s2 }
0x1240   :  { %1967 = vmatpush.msrb.mxu3 %v4510_v42  ;;  %1911 = vmatpush.msra.mxu1 %v4510_v42 }
0x1242   :  { %1968 = vmatpush.msrb.mxu3 %v4530_v16  ;;  %1912 = vmatpush.msra.mxu1 %v4530_v16 }
0x1244   :  { %v1114_v11 = vpop.permute.xlu1 %1113 }
0x1245   :  { %1117 = vst.msk [vmem:[#allocation4 + $0x8] sm:$0x3] %vm659_vm12, %v1114_v11 }
0x1247   :  { %2150 = vrot.lane.b32.xlu2 %v2148_v12, %s3940_s2 }
0x124c   :  { %v1980_v50 = vld [vmem:[#allocation4 + $0x8] sm:$0x3]  ;;  %v1927_v26 = vpop.permute.xlu1 %1926 }
0x124d   :  { %v1929_v28 = vsel %vm670_vm11, %v1923_v27, %v1927_v26 }
0x124f   :  { %2094 = vrot.lane.b32.xlu2 %v2092_v15, %s3940_s2 }
0x1291   :  { %v1714_v17 = vpop.permute.xlu0 %1713 }
0x1292   :  { %1716 = vst.msk [vmem:[#allocation4] sm:$0x3] %vm659_vm12, %v1714_v17 }
0x1299   :  { %v1414_v22 = vpop.permute.xlu0 %1413  ;;  %v1708_v54 = vpop.permute.xlu2 %1707  ;;  %v1756_v18 = vld [vmem:[#allocation4] sm:$0x3] }
0x129a   :  { %1417 = vst.msk [vmem:[#allocation4 + $0x4] sm:$0x3] %vm659_vm12, %v1414_v22  ;;  %1758 = vrot.lane.b32.xlu1 %v1756_v18, %s3940_s2 }
0x129b   :  { %1711 = vst.msk [vmem:[#allocation3 + $0xe] sm:$0x3] %vm659_vm12, %v1708_v54 }
0x12a1   :  { %v1815_v52 = vpop.permute.xlu0 %1814  ;;  %v1868_v24 = vld [vmem:[#allocation4 + $0x4] sm:$0x3]  ;;  %v2151_v44 = vpop.permute.xlu2 %2150 }
0x12a2   :  { %v1817_v25 = vsel %vm670_vm11, %v1811_v23, %v1815_v52  ;;  %1870 = vrot.lane.b32.xlu0 %v1868_v24, %s3940_s2  ;;  %1982 = vrot.lane.b32.xlu1 %v1980_v50, %s3940_s2  ;;  %v2147_v33 = vld [vmem:[#allocation3 + $0xe] sm:$0x3] }
0x12a3   :  { %3518 = vmatmul.msk.f32.vlgmr.msra.gmra.mxu2 %vm535_vm13, %v1817_v25  ;;  %3519 = vmatmul.msk.f32.vlgmr.msra.gmra.mxu3 %vm535_vm13, %v1817_v25  ;;  %v2153_v45 = vsel %vm670_vm11, %v2147_v33, %v2151_v44 }
0x12a4   :  { %2053 = vmatpush.msra.mxu2 %v4465_v35  ;;  %2073 = vmatpush.msra.mxu3 %v4467_v57 }
0x12a6   :  { %2054 = vmatpush.msra.mxu2 %v4469_v14  ;;  %2074 = vmatpush.msra.mxu3 %v4473_v32 }
0x12a8   :  { %2055 = vmatpush.msra.mxu2 %v4475_v19  ;;  %2075 = vmatpush.msra.mxu3 %v4477_v13 }
0x12a9   :  { %v2039_v48 = vpop.permute.xlu0 %2038 }
0x12aa   :  { %2056 = vmatpush.msra.mxu2 %v4483_v29  ;;  %2076 = vmatpush.msra.mxu3 %v4485_v31  ;;  %v2041_v46 = vsel %vm670_vm11, %v2035_v43, %v2039_v48 }
0x12ab   :  { %3522 = vmatmul.msk.f32.vlgmr.msrb.gmra.mxu2 %vm535_vm13, %v1929_v28  ;;  %3523 = vmatmul.msk.f32.vlgmr.msrb.gmra.mxu3 %vm535_vm13, %v1929_v28 }
0x12ac   :  { %2057 = vmatpush.msra.mxu2 %v4492_v7  ;;  %2077 = vmatpush.msra.mxu3 %v4494_v37 }
0x12ae   :  { %2058 = vmatpush.msra.mxu2 %v4501_v39  ;;  %2078 = vmatpush.msra.mxu3 %v4503_v40 }
0x12b0   :  { %2059 = vmatpush.msra.mxu2 %v4508_v41  ;;  %2079 = vmatpush.msra.mxu3 %v4510_v42 }
0x12b2   :  { %2060 = vmatpush.msra.mxu2 %v4528_v20  ;;  %2080 = vmatpush.msra.mxu3 %v4530_v16 }
0x12b3   :  { %3526 = vmatmul.msk.f32.vlgmr.msra.gmra.mxu2 %vm535_vm13, %v2041_v46  ;;  %3527 = vmatmul.msk.f32.vlgmr.msra.gmra.mxu3 %vm535_vm13, %v2041_v46 }
0x12b4   :  { %2165 = vmatpush.msrb.mxu2 %v4465_v35  ;;  %2185 = vmatpush.msrb.mxu3 %v4467_v57 }
0x12b6   :  { %2166 = vmatpush.msrb.mxu2 %v4469_v14  ;;  %2186 = vmatpush.msrb.mxu3 %v4473_v32 }
0x12b8   :  { %2167 = vmatpush.msrb.mxu2 %v4475_v19  ;;  %2187 = vmatpush.msrb.mxu3 %v4477_v13 }
0x12ba   :  { %2168 = vmatpush.msrb.mxu2 %v4483_v29  ;;  %2188 = vmatpush.msrb.mxu3 %v4485_v31 }
0x12bc   :  { %2169 = vmatpush.msrb.mxu2 %v4492_v7  ;;  %2189 = vmatpush.msrb.mxu3 %v4494_v37 }
0x12be   :  { %2170 = vmatpush.msrb.mxu2 %v4501_v39  ;;  %2190 = vmatpush.msrb.mxu3 %v4503_v40 }
0x12c0   :  { %2171 = vmatpush.msrb.mxu2 %v4508_v41  ;;  %2191 = vmatpush.msrb.mxu3 %v4510_v42 }
0x12c2   :  { %2172 = vmatpush.msrb.mxu2 %v4528_v20  ;;  %2192 = vmatpush.msrb.mxu3 %v4530_v16 }
0x12c3   :  { %3530 = vmatmul.msk.f32.vlgmr.msrb.gmra.mxu2 %vm535_vm13, %v2153_v45  ;;  %3531 = vmatmul.msk.f32.vlgmr.msrb.gmra.mxu3 %vm535_vm13, %v2153_v45 }
0x12c4   :  { %2362 = vmatpush.msra.mxu2 %v4618_v51  ;;  %2382 = vmatpush.msra.mxu3 %v4626_v56 }
0x12c6   :  { %2363 = vmatpush.msra.mxu2 %v4628_v58  ;;  %2383 = vmatpush.msra.mxu3 %v4634_v59 }
0x12c8   :  { %2364 = vmatpush.msra.mxu2 %v4636_v60  ;;  %2384 = vmatpush.msra.mxu3 %v4642_v61 }
0x12ca   :  { %2365 = vmatpush.msra.mxu2 %v4644_v62  ;;  %2385 = vmatpush.msra.mxu3 %v4655_v3 }
0x12cc   :  { %2366 = vmatpush.msra.mxu2 %v4657_v4  ;;  %2386 = vmatpush.msra.mxu3 %v4663_v5 }
0x12ce   :  { %2367 = vmatpush.msra.mxu2 %v4665_v30  ;;  %2387 = vmatpush.msra.mxu3 %v4671_v6 }
0x12d0   :  { %2368 = vmatpush.msra.mxu2 %v4673_v8  ;;  %2388 = vmatpush.msra.mxu3 %v4689_v38 }
0x12d2   :  { %2369 = vmatpush.msra.mxu2 %v4691_v9 }
0x12d4   :  { %2662 = vmatpush.msrb.mxu2 %v4618_v51 }
0x12d6   :  { %2663 = vmatpush.msrb.mxu2 %v4628_v58 }
0x12d8   :  { %2664 = vmatpush.msrb.mxu2 %v4636_v60 }
0x12da   :  { %2665 = vmatpush.msrb.mxu2 %v4644_v62 }
0x12dc   :  { %2666 = vmatpush.msrb.mxu2 %v4657_v4 }
0x12de   :  { %2667 = vmatpush.msrb.mxu2 %v4665_v30 }
0x12e0   :  { %2668 = vmatpush.msrb.mxu2 %v4673_v8 }
0x12e2   :  { %2669 = vmatpush.msrb.mxu2 %v4691_v9 }
0x130c   :  { %v1759_v49 = vpop.permute.xlu1 %1758 }
0x130d   :  { %v1761_v53 = vsel %vm670_vm11, %v1755_v47, %v1759_v49 }
0x130e   :  { %3516 = vmatmul.msk.f32.vlgmr.msrb.gmra.mxu0 %vm535_vm13, %v1761_v53  ;;  %3517 = vmatmul.msk.f32.vlgmr.msrb.gmra.mxu1 %vm535_vm13, %v1761_v53 }
0x130f   :  { %1997 = vmatpush.msrb.mxu0 %v4465_v35  ;;  %2017 = vmatpush.msrb.mxu1 %v4467_v57 }
0x1311   :  { %1998 = vmatpush.msrb.mxu0 %v4469_v14  ;;  %2018 = vmatpush.msrb.mxu1 %v4473_v32 }
0x1313   :  { %1999 = vmatpush.msrb.mxu0 %v4475_v19  ;;  %2019 = vmatpush.msrb.mxu1 %v4477_v13 }
0x1314   :  { %v1871_v0 = vpop.permute.xlu0 %1870  ;;  %v1983_v1 = vpop.permute.xlu1 %1982 }
0x1315   :  { %v1873_v2 = vsel %vm670_vm11, %v1867_v63, %v1871_v0  ;;  %2000 = vmatpush.msrb.mxu0 %v4483_v29  ;;  %2020 = vmatpush.msrb.mxu1 %v4485_v31  ;;  %v1985_v36 = vsel %vm670_vm11, %v1979_v55, %v1983_v1 }
0x1316   :  { %3520 = vmatmul.msk.f32.vlgmr.msra.gmra.mxu0 %vm535_vm13, %v1873_v2  ;;  %3521 = vmatmul.msk.f32.vlgmr.msra.gmra.mxu1 %vm535_vm13, %v1873_v2 }
0x1317   :  { %2001 = vmatpush.msrb.mxu0 %v4492_v7  ;;  %2021 = vmatpush.msrb.mxu1 %v4494_v37 }
0x1319   :  { %2002 = vmatpush.msrb.mxu0 %v4501_v39  ;;  %2022 = vmatpush.msrb.mxu1 %v4503_v40 }
0x131b   :  { %2003 = vmatpush.msrb.mxu0 %v4508_v41  ;;  %2023 = vmatpush.msrb.mxu1 %v4510_v42 }
0x131d   :  { %2004 = vmatpush.msrb.mxu0 %v4528_v20  ;;  %2024 = vmatpush.msrb.mxu1 %v4530_v16 }
0x131e   :  { %3524 = vmatmul.msk.f32.vlgmr.msrb.gmra.mxu0 %vm535_vm13, %v1985_v36  ;;  %3525 = vmatmul.msk.f32.vlgmr.msrb.gmra.mxu1 %vm535_vm13, %v1985_v36 }
0x131f   :  { %2109 = vmatpush.msra.mxu0 %v4465_v35  ;;  %2129 = vmatpush.msra.mxu1 %v4467_v57  ;;  %v4697_v35 = vld [vmem:[#allocation12 + $0x8] sm:$0xff]  ;;  %v4699_v57 = vperm.slane %v1749_v34, 1 }
0x1320   :  { %2389 = vmatpush.msra.mxu3 %v4697_v35 }
0x1321   :  { %2110 = vmatpush.msra.mxu0 %v4469_v14  ;;  %2130 = vmatpush.msra.mxu1 %v4473_v32  ;;  %v4705_v14 = vperm.slane %v1749_v34, 0 }
0x1322   :  { %2682 = vmatpush.msrb.mxu3 %v4626_v56 }
0x1323   :  { %2111 = vmatpush.msra.mxu0 %v4475_v19  ;;  %2131 = vmatpush.msra.mxu1 %v4477_v13 }
0x1324   :  { %2683 = vmatpush.msrb.mxu3 %v4634_v59 }
0x1325   :  { %2112 = vmatpush.msra.mxu0 %v4483_v29  ;;  %2132 = vmatpush.msra.mxu1 %v4485_v31  ;;  %v2095_v29 = vpop.permute.xlu2 %2094 }
0x1326   :  { %v1838_v32 = vpop.f32.mrf.mxu2  ;;  %v1858_v19 = vpop.f32.mrf.mxu3  ;;  %2684 = vmatpush.msrb.mxu3 %v4642_v61 }
0x1327   :  { %2113 = vmatpush.msra.mxu0 %v4492_v7  ;;  %2133 = vmatpush.msra.mxu1 %v4494_v37  ;;  %v1859_v13 = vadd.f32 %v1858_v19, %v4699_v57  ;;  %v1839_v31 = vadd.f32 %v1838_v32, %v4705_v14  ;;  %v2091_v7 = vld [vmem:[#allocation3 + $0xc] sm:$0x3] }
0x1328   :  { %2685 = vmatpush.msrb.mxu3 %v4655_v3 }
0x1329   :  { %2114 = vmatpush.msra.mxu0 %v4501_v39  ;;  %2134 = vmatpush.msra.mxu1 %v4503_v40  ;;  %v1863_v10 = vrot.slane %v1859_v13, 6  ;;  %v2097_v39 = vsel %vm670_vm11, %v2091_v7, %v2095_v29 }
0x132a   :  { %2686 = vmatpush.msrb.mxu3 %v4663_v5 }
0x132b   :  { %2115 = vmatpush.msra.mxu0 %v4508_v41  ;;  %2135 = vmatpush.msra.mxu1 %v4510_v42  ;;  %v1864_v37 = vsel %vm161_vm2, %v1839_v31, %v1863_v10 }
0x132c   :  { %1866 = vst [vmem:[#allocation2 + $0x4] sm:$0xf] %v1864_v37  ;;  %2687 = vmatpush.msrb.mxu3 %v4671_v6 }
0x132d   :  { %2116 = vmatpush.msra.mxu0 %v4528_v20  ;;  %2136 = vmatpush.msra.mxu1 %v4530_v16 }
0x132e   :  { %3528 = vmatmul.msk.f32.vlgmr.msra.gmra.mxu0 %vm535_vm13, %v2097_v39  ;;  %3529 = vmatmul.msk.f32.vlgmr.msra.gmra.mxu1 %vm535_vm13, %v2097_v39  ;;  %v1950_v40 = vpop.f32.mrf.mxu2  ;;  %v1970_v41 = vpop.f32.mrf.mxu3 }
0x132f   :  { %2217 = vmatpush.msrb.mxu0 %v4618_v51  ;;  %2237 = vmatpush.msrb.mxu1 %v4626_v56  ;;  %v1971_v42 = vadd.f32 %v1970_v41, %v4699_v57  ;;  %v1951_v11 = vadd.f32 %v1950_v40, %v4705_v14 }
0x1330   :  { %2688 = vmatpush.msrb.mxu3 %v4689_v38 }
0x1331   :  { %2218 = vmatpush.msrb.mxu0 %v4628_v58  ;;  %2238 = vmatpush.msrb.mxu1 %v4634_v59  ;;  %v1975_v12 = vrot.slane %v1971_v42, 6 }
0x1332   :  { %2689 = vmatpush.msrb.mxu3 %v4697_v35 }
0x1333   :  { %2219 = vmatpush.msrb.mxu0 %v4636_v60  ;;  %2239 = vmatpush.msrb.mxu1 %v4642_v61  ;;  %v1976_v15 = vsel %vm161_vm2, %v1951_v11, %v1975_v12 }
0x1334   :  { %1978 = vst [vmem:[#allocation2 + $0xc] sm:$0xf] %v1976_v15 }
0x1335   :  { %2220 = vmatpush.msrb.mxu0 %v4644_v62  ;;  %2240 = vmatpush.msrb.mxu1 %v4655_v3 }
0x1336   :  { %v2062_v20 = vpop.f32.mrf.mxu2  ;;  %v2082_v16 = vpop.f32.mrf.mxu3 }
0x1337   :  { %2221 = vmatpush.msrb.mxu0 %v4657_v4  ;;  %2241 = vmatpush.msrb.mxu1 %v4663_v5  ;;  %v2083_v17 = vadd.f32 %v2082_v16, %v4699_v57  ;;  %v2063_v22 = vadd.f32 %v2062_v20, %v4705_v14 }
0x1339   :  { %2222 = vmatpush.msrb.mxu0 %v4665_v30  ;;  %2242 = vmatpush.msrb.mxu1 %v4671_v6  ;;  %v2087_v54 = vrot.slane %v2083_v17, 6 }
0x133b   :  { %2223 = vmatpush.msrb.mxu0 %v4673_v8  ;;  %2243 = vmatpush.msrb.mxu1 %v4689_v38  ;;  %v2088_v18 = vsel %vm161_vm2, %v2063_v22, %v2087_v54  ;;  %v2796_v17 = vld [vmem:[#allocation2 + $0xc] sm:$0xf] }
0x133c   :  { %2090 = vst [vmem:[#allocation2 + $0x14] sm:$0xf] %v2088_v18 }
0x133d   :  { %2224 = vmatpush.msrb.mxu0 %v4691_v9  ;;  %2244 = vmatpush.msrb.mxu1 %v4697_v35 }
0x133e   :  { %2225 = vmatmul.f32.vlgmr.msrb.gmra.mxu0 %v3938_v21  ;;  %2245 = vmatmul.f32.vlgmr.msrb.gmra.mxu1 %v3938_v21 }
0x133f   :  { %2512 = vmatpush.msra.mxu0 %v4618_v51  ;;  %2532 = vmatpush.msra.mxu1 %v4626_v56 }
0x1341   :  { %2513 = vmatpush.msra.mxu0 %v4628_v58  ;;  %2533 = vmatpush.msra.mxu1 %v4634_v59 }
0x1343   :  { %2514 = vmatpush.msra.mxu0 %v4636_v60  ;;  %2534 = vmatpush.msra.mxu1 %v4642_v61  ;;  %v2496_v12 = vld [vmem:[#allocation2 + $0x14] sm:$0xf] }
0x1345   :  { %2515 = vmatpush.msra.mxu0 %v4644_v62  ;;  %2535 = vmatpush.msra.mxu1 %v4655_v3 }
0x1346   :  { %v2174_v23 = vpop.f32.mrf.mxu2  ;;  %v2194_v52 = vpop.f32.mrf.mxu3 }
0x1347   :  { %v2195_v21 = vadd.f32 %v2194_v52, %v4699_v57  ;;  %2516 = vmatpush.msra.mxu0 %v4657_v4  ;;  %2536 = vmatpush.msra.mxu1 %v4663_v5  ;;  %v2175_v24 = vadd.f32 %v2174_v23, %v4705_v14  ;;  %v3096_v23 = vld [vmem:[#allocation2 + $0x4] sm:$0xf] }
0x1349   :  { %v2199_v50 = vrot.slane %v2195_v21, 6  ;;  %2517 = vmatpush.msra.mxu0 %v4665_v30  ;;  %2537 = vmatpush.msra.mxu1 %v4671_v6 }
0x134b   :  { %v2200_v25 = vsel %vm161_vm2, %v2175_v24, %v2199_v50  ;;  %2518 = vmatpush.msra.mxu0 %v4673_v8  ;;  %2538 = vmatpush.msra.mxu1 %v4689_v38 }
0x134c   :  { %2202 = vst [vmem:[#allocation2 + $0x1c] sm:$0xf] %v2200_v25 }
0x134d   :  { %2519 = vmatpush.msra.mxu0 %v4691_v9  ;;  %2539 = vmatpush.msra.mxu1 %v4697_v35 }
0x134f   :  { %2812 = vmatpush.msrb.mxu0 %v4618_v51  ;;  %2832 = vmatpush.msrb.mxu1 %v4626_v56 }
0x1351   :  { %2813 = vmatpush.msrb.mxu0 %v4628_v58  ;;  %2833 = vmatpush.msrb.mxu1 %v4634_v59 }
0x1353   :  { %2814 = vmatpush.msrb.mxu0 %v4636_v60  ;;  %2834 = vmatpush.msrb.mxu1 %v4642_v61  ;;  %v2204_v26 = vld [vmem:[#allocation2 + $0x1c] sm:$0xf] }
0x1354   :  { %2206 = vst [vmem:[#allocation1] ss:$4 sm:$0xff] %v2204_v26 }
0x1355   :  { %2815 = vmatpush.msrb.mxu0 %v4644_v62  ;;  %2835 = vmatpush.msrb.mxu1 %v4655_v3 }
0x1357   :  { %2816 = vmatpush.msrb.mxu0 %v4657_v4  ;;  %2836 = vmatpush.msrb.mxu1 %v4663_v5 }
0x1359   :  { %2817 = vmatpush.msrb.mxu0 %v4665_v30  ;;  %2837 = vmatpush.msrb.mxu1 %v4671_v6 }
0x135b   :  { %2818 = vmatpush.msrb.mxu0 %v4673_v8  ;;  %2838 = vmatpush.msrb.mxu1 %v4689_v38  ;;  %v2207_v37 = vld.sshfl [vmem:[#allocation1 + $0x8] sm:$0xff pattern:$0x73625140] }
0x135d   :  { %2819 = vmatpush.msrb.mxu0 %v4691_v9  ;;  %2839 = vmatpush.msrb.mxu1 %v4697_v35 }
0x138b   :  { %v1782_v27 = vpop.f32.mrf.mxu0  ;;  %v1802_v28 = vpop.f32.mrf.mxu1 }
0x138c   :  { %v1803_v48 = vadd.f32 %v1802_v28, %v4699_v57  ;;  %v1783_v43 = vadd.f32 %v1782_v27, %v4705_v14 }
0x138e   :  { %v1807_v46 = vrot.slane %v1803_v48, 6 }
0x1390   :  { %v1808_v33 = vsel %vm161_vm2, %v1783_v43, %v1807_v46 }
0x1391   :  { %1810 = vst [vmem:[#allocation2] sm:$0xf] %v1808_v33 }
0x1393   :  { %v1894_v44 = vpop.f32.mrf.mxu0  ;;  %v1914_v45 = vpop.f32.mrf.mxu1 }
0x1394   :  { %v1915_v47 = vadd.f32 %v1914_v45, %v4699_v57  ;;  %v1895_v49 = vadd.f32 %v1894_v44, %v4705_v14 }
0x1396   :  { %v1919_v53 = vrot.slane %v1915_v47, 6 }
0x1398   :  { %v1920_v63 = vsel %vm161_vm2, %v1895_v49, %v1919_v53  ;;  %v2203_v39 = vld [vmem:[#allocation2] sm:$0xf] }
0x1399   :  { %1922 = vst [vmem:[#allocation2 + $0x8] sm:$0xf] %v1920_v63  ;;  %v3246_v21 = vld [vmem:[#allocation2] sm:$0xf] }
0x139b   :  { %v2006_v0 = vpop.f32.mrf.mxu0  ;;  %v2026_v2 = vpop.f32.mrf.mxu1 }
0x139c   :  { %v2027_v1 = vadd.f32 %v2026_v2, %v4699_v57  ;;  %v2007_v55 = vadd.f32 %v2006_v0, %v4705_v14 }
0x139e   :  { %v2031_v36 = vrot.slane %v2027_v1, 6 }
0x13a0   :  { %v2032_v34 = vsel %vm161_vm2, %v2007_v55, %v2031_v36  ;;  %v2946_v54 = vld [vmem:[#allocation2 + $0x8] sm:$0xf] }
0x13a1   :  { %2034 = vst [vmem:[#allocation2 + $0x10] sm:$0xf] %v2032_v34 }
0x13a8   :  { %v2646_v20 = vld [vmem:[#allocation2 + $0x10] sm:$0xf] }
0x13ab   :  { %v2118_v32 = vpop.f32.mrf.mxu0  ;;  %v2138_v19 = vpop.f32.mrf.mxu1 }
0x13ac   :  { %v2139_v13 = vadd.f32 %v2138_v19, %v4699_v57  ;;  %v2119_v29 = vadd.f32 %v2118_v32, %v4705_v14 }
0x13ae   :  { %v2143_v31 = vrot.slane %v2139_v13, 6 }
0x13b0   :  { %v2144_v10 = vsel %vm161_vm2, %v2119_v29, %v2143_v31 }
0x13b1   :  { %2146 = vst [vmem:[#allocation2 + $0x18] sm:$0xf] %v2144_v10 }
0x13b8   :  { %v2346_v7 = vld [vmem:[#allocation2 + $0x18] sm:$0xf] }
0x13b9   :  { %2348 = vst [vmem:[#allocation1] ss:$4 sm:$0xff] %v2346_v7 }
0x13bb   :  { %v2226_v40 = vpop.f32.mrf.mxu0  ;;  %v2246_v41 = vpop.f32.mrf.mxu1 }
0x13bc   :  { %v2249_v42 = vadd.f32 %v2226_v40, %v2203_v39  ;;  %v2250_v11 = vadd.f32 %v2246_v41, %v2207_v37 }
0x13be   :  { %3702 = vtanh.f32 %v2249_v42  ;;  %v3532_v50 = vmul.f32 -1.442695, %v2249_v42  ;;  %v3533_v25 = vmul.f32 -1.442695, %v2250_v11 }
0x13bf   :  { %3704 = vtanh.f32 %v2250_v11 }
0x13c0   :  { %v4807_v15 = vld.sshfl [vmem:[#allocation1 + $0x8] sm:$0xff pattern:$0x73625140]  ;;  %3706 = vpow2.f32 %v3532_v50 }
0x13c1   :  { %2498 = vst [vmem:[#allocation1] ss:$4 sm:$0xff] %v2496_v12  ;;  %3708 = vpow2.f32 %v3533_v25 }
0x13c4   :  { %v3703_v57 = vpop.eup %3702 }
0x13c5   :  { %v3705_v14 = vpop.eup %3704  ;;  %2293 = vrot.lane.b32.xlu0 %v3703_v57, %s3939_s3 }
0x13c6   :  { %2304 = vrot.lane.b32.xlu1 %v3705_v14, %s3939_s3  ;;  %v3707_v26 = vpop.eup %3706 }
0x13c7   :  { %v3709_v27 = vpop.eup %3708  ;;  %v2254_v28 = vadd.f32 1.0, %v3707_v26 }
0x13c8   :  { %v4811_v16 = vld.sshfl [vmem:[#allocation1 + $0x8] sm:$0xff pattern:$0x73625140]  ;;  %v2274_v48 = vadd.f32 1.0, %v3709_v27 }
0x13c9   :  { %2648 = vst [vmem:[#allocation1] ss:$4 sm:$0xff] %v2646_v20  ;;  %3710 = vrcp.f32 %v2254_v28  ;;  %v2266_v2 = vand.u32 2147483648, %v2254_v28  ;;  %vm2260_vm8 = vweird.f32 %v2254_v28  ;;  %v2264_v55 = vand.u32 2147483647, %v2254_v28 }
0x13ca   :  { %3712 = vrcp.f32 %v2274_v48  ;;  %v2286_v1 = vand.u32 2147483648, %v2274_v48  ;;  %vm2280_vm9 = vweird.f32 %v2274_v48  ;;  %v2284_v36 = vand.u32 2147483647, %v2274_v48 }
0x13cb   :  { %v2267_v19 = vor.u32 1.1754944e-38, %v2266_v2  ;;  %vm2265_vm15 = vcmp.eq.f32.partialorder %v2264_v55, 8.507059e+37 }
0x13cc   :  { %v2287_v13 = vor.u32 1.1754944e-38, %v2286_v1  ;;  %vm2285_vm0 = vcmp.eq.f32.partialorder %v2284_v36, 8.507059e+37 }
0x13cf   :  { %v3711_v43 = vpop.eup %3710 }
0x13d0   :  { %v4813_v22 = vld.sshfl [vmem:[#allocation1 + $0x8] sm:$0xff pattern:$0x73625140]  ;;  %v3713_v46 = vpop.eup %3712  ;;  %v2256_v33 = vmul.f32 %v3711_v43, %v2254_v28  ;;  %vm2261_vm2 = vweird.f32 %v3711_v43 }
0x13d1   :  { %2798 = vst [vmem:[#allocation1] ss:$4 sm:$0xff] %v2796_v17  ;;  %v2276_v44 = vmul.f32 %v3713_v46, %v2274_v48  ;;  %vm2281_vm7 = vweird.f32 %v3713_v46  ;;  %vm2262_vm10 = vmor %vm2260_vm8, %vm2261_vm2  ;;  %v2345_v48 = vld [vmem:[#allocation2 + $0x4] sm:$0xf] }
0x13d2   :  { %v2257_v45 = vsub.f32 1.0, %v2256_v33  ;;  %vm2282_vm14 = vmor %vm2280_vm9, %vm2281_vm7 }
0x13d3   :  { %v2277_v47 = vsub.f32 1.0, %v2276_v44 }
0x13d4   :  { %v2258_v49 = vmul.f32 %v3711_v43, %v2257_v45 }
0x13d5   :  { %v2278_v53 = vmul.f32 %v3713_v46, %v2277_v47 }
0x13d6   :  { %v2259_v63 = vadd.f32 %v3711_v43, %v2258_v49 }
0x13d7   :  { %v2279_v0 = vadd.f32 %v3713_v46, %v2278_v53 }
0x13d8   :  { %v4815_v18 = vld.sshfl [vmem:[#allocation1 + $0x8] sm:$0xff pattern:$0x73625140]  ;;  %v2263_v34 = vsel %vm2262_vm10, %v3711_v43, %v2259_v63 }
0x13d9   :  { %2948 = vst [vmem:[#allocation1] ss:$4 sm:$0xff] %v2946_v54  ;;  %v2283_v32 = vsel %vm2282_vm14, %v3713_v46, %v2279_v0  ;;  %v2268_v31 = vsel %vm2265_vm15, %v2267_v19, %v2263_v34 }
0x13da   :  { %v2288_v7 = vsel %vm2285_vm0, %v2287_v13, %v2283_v32  ;;  %v2291_v40 = vmul.f32 0.0, %v2268_v31 }
0x13db   :  { %v2302_v12 = vmul.f32 0.0, %v2288_v7 }
0x13e0   :  { %v4817_v52 = vld.sshfl [vmem:[#allocation1 + $0x8] sm:$0xff pattern:$0x73625140] }
0x13e1   :  { %3098 = vst [vmem:[#allocation1] ss:$4 sm:$0xff] %v3096_v23 }
0x13e8   :  { %v4819_v24 = vld.sshfl [vmem:[#allocation1 + $0x8] sm:$0xff pattern:$0x73625140] }
0x13e9   :  { %3248 = vst [vmem:[#allocation1] ss:$4 sm:$0xff] %v3246_v21 }
0x1437   :  { %v2294_v29 = vpop.permute.xlu0 %2293 }
0x1438   :  { %v2305_v10 = vpop.permute.xlu1 %2304  ;;  %v2296_v37 = vmul.f32 %v2294_v29, %v2268_v31 }
0x1439   :  { %v2307_v39 = vmul.f32 %v2305_v10, %v2288_v7 }
0x143a   :  { %2298 = vrot.lane.b32.xlu2 %v2296_v37, %s3940_s2 }
0x143b   :  { %2309 = vrot.lane.b32.xlu0 %v2307_v39, %s3940_s2 }
0x1494   :  { %v2299_v41 = vpop.permute.xlu2 %2298 }
0x1495   :  { %v2301_v42 = vadd.f32 %v2299_v41, %v2291_v40 }
0x1497   :  { %3714 = vtanh.f32 %v2301_v42 }
0x149d   :  { %v3715_v11 = vpop.eup %3714 }
0x149e   :  { %2315 = vrot.lane.b32.xlu1 %v3715_v11, %s3939_s3 }
0x14ad   :  { %v2310_v57 = vpop.permute.xlu0 %2309 }
0x14ae   :  { %v2312_v14 = vadd.f32 %v2310_v57, %v2302_v12 }
0x14b0   :  { %3716 = vtanh.f32 %v2312_v14 }
0x14b6   :  { %v3717_v20 = vpop.eup %3716 }
0x14b7   :  { %2321 = vrot.lane.b32.xlu2 %v3717_v20, %s3939_s3 }
0x14bf   :  { %2341 = vrot.lane.b32.xlu2 %v2301_v42, %s3941_s25 }
0x1510   :  { %v2316_v17 = vpop.permute.xlu1 %2315 }
0x1511   :  { %v2322_v54 = vpop.permute.xlu2 %2321  ;;  %v2318_v23 = vmul.f32 %v2316_v17, %v2268_v31 }
0x1512   :  { %v4826_v21 = vmul.f32 %v2322_v54, %v2288_v7 }
0x1513   :  { %2326 = vrot.lane.b32.xlu0 %v2318_v23, %s3940_s2 }
0x1514   :  { %2336 = vrot.lane.b32.xlu1 %v4826_v21, %s3939_s3 }
0x1519   :  { %v2342_v50 = vpop.permute.xlu2 %2341 }
0x151a   :  { %v4832_v25 = vsel %vm670_vm11, %v2342_v50, %v2312_v14 }
0x151b   :  { %2437 = vrot.lane.b32.xlu2 %v4832_v25, %s3940_s2 }
0x1575   :  { %v2438_v50 = vpop.permute.xlu2 %2437 }
0x1585   :  { %v2327_v26 = vpop.permute.xlu0 %2326 }
0x1586   :  { %v2337_v27 = vpop.permute.xlu1 %2336 }
0x1587   :  { %v2339_v28 = vsel %vm670_vm11, %v2327_v26, %v2337_v27 }
0x1588   :  { %3534 = vmatmul.msk.f32.vlgmr.msra.gmra.mxu2 %vm535_vm13, %v2339_v28  ;;  %3535 = vmatmul.msk.f32.vlgmr.msra.gmra.mxu3 %vm535_vm13, %v2339_v28 }
0x1589   :  { %2962 = vmatpush.msra.mxu2 %v4618_v51  ;;  %2982 = vmatpush.msra.mxu3 %v4626_v56 }
0x158b   :  { %2963 = vmatpush.msra.mxu2 %v4628_v58  ;;  %2983 = vmatpush.msra.mxu3 %v4634_v59 }
0x158d   :  { %2964 = vmatpush.msra.mxu2 %v4636_v60  ;;  %2984 = vmatpush.msra.mxu3 %v4642_v61 }
0x158f   :  { %2965 = vmatpush.msra.mxu2 %v4644_v62  ;;  %2985 = vmatpush.msra.mxu3 %v4655_v3 }
0x1591   :  { %2966 = vmatpush.msra.mxu2 %v4657_v4  ;;  %2986 = vmatpush.msra.mxu3 %v4663_v5 }
0x1593   :  { %2967 = vmatpush.msra.mxu2 %v4665_v30  ;;  %2987 = vmatpush.msra.mxu3 %v4671_v6 }
0x1595   :  { %2968 = vmatpush.msra.mxu2 %v4673_v8  ;;  %2988 = vmatpush.msra.mxu3 %v4689_v38 }
0x1597   :  { %2969 = vmatpush.msra.mxu2 %v4691_v9  ;;  %2989 = vmatpush.msra.mxu3 %v4697_v35 }
0x160b   :  { %v2371_v43 = vpop.f32.mrf.mxu2  ;;  %v2391_v46 = vpop.f32.mrf.mxu3 }
0x160c   :  { %v2394_v33 = vadd.f32 %v2371_v43, %v2345_v48  ;;  %v2395_v44 = vadd.f32 %v2391_v46, %v4807_v15 }
0x160e   :  { %3718 = vtanh.f32 %v2394_v33  ;;  %v3536_v49 = vmul.f32 -1.442695, %v2394_v33  ;;  %v3537_v53 = vmul.f32 -1.442695, %v2395_v44 }
0x160f   :  { %3720 = vtanh.f32 %v2395_v44 }
0x1610   :  { %3722 = vpow2.f32 %v3536_v49 }
0x1611   :  { %3724 = vpow2.f32 %v3537_v53 }
0x1614   :  { %v3719_v45 = vpop.eup %3718 }
0x1615   :  { %v3721_v47 = vpop.eup %3720  ;;  %2442 = vrot.lane.b32.xlu0 %v3719_v45, %s3939_s3 }
0x1616   :  { %2453 = vrot.lane.b32.xlu1 %v3721_v47, %s3939_s3  ;;  %v3723_v63 = vpop.eup %3722 }
0x1617   :  { %v3725_v0 = vpop.eup %3724  ;;  %v2399_v2 = vadd.f32 1.0, %v3723_v63 }
0x1618   :  { %v2419_v1 = vadd.f32 1.0, %v3725_v0 }
0x1619   :  { %3726 = vrcp.f32 %v2399_v2  ;;  %v2411_v10 = vand.u32 2147483648, %v2399_v2  ;;  %vm2405_vm4 = vweird.f32 %v2399_v2  ;;  %v2409_v37 = vand.u32 2147483647, %v2399_v2 }
0x161a   :  { %3728 = vrcp.f32 %v2419_v1  ;;  %v2431_v39 = vand.u32 2147483648, %v2419_v1  ;;  %vm2425_vm6 = vweird.f32 %v2419_v1  ;;  %v2429_v40 = vand.u32 2147483647, %v2419_v1 }
0x161b   :  { %v2412_v42 = vor.u32 1.1754944e-38, %v2411_v10  ;;  %vm2410_vm7 = vcmp.eq.f32.partialorder %v2409_v37, 8.507059e+37 }
0x161c   :  { %v2432_v12 = vor.u32 1.1754944e-38, %v2431_v39  ;;  %vm2430_vm8 = vcmp.eq.f32.partialorder %v2429_v40, 8.507059e+37 }
0x161f   :  { %v3727_v55 = vpop.eup %3726 }
0x1620   :  { %v3729_v15 = vpop.eup %3728  ;;  %v2401_v36 = vmul.f32 %v3727_v55, %v2399_v2  ;;  %vm2406_vm1 = vweird.f32 %v3727_v55 }
0x1621   :  { %v2421_v34 = vmul.f32 %v3729_v15, %v2419_v1  ;;  %vm2426_vm3 = vweird.f32 %v3729_v15  ;;  %vm2407_vm5 = vmor %vm2405_vm4, %vm2406_vm1 }
0x1622   :  { %v2402_v32 = vsub.f32 1.0, %v2401_v36  ;;  %vm2427_vm2 = vmor %vm2425_vm6, %vm2426_vm3 }
0x1623   :  { %v2422_v19 = vsub.f32 1.0, %v2421_v34 }
0x1624   :  { %v2403_v13 = vmul.f32 %v3727_v55, %v2402_v32 }
0x1625   :  { %v2423_v29 = vmul.f32 %v3729_v15, %v2422_v19 }
0x1626   :  { %v2404_v31 = vadd.f32 %v3727_v55, %v2403_v13 }
0x1627   :  { %v2424_v7 = vadd.f32 %v3729_v15, %v2423_v29 }
0x1628   :  { %v2408_v41 = vsel %vm2407_vm5, %v3727_v55, %v2404_v31 }
0x1629   :  { %v2428_v11 = vsel %vm2427_vm2, %v3729_v15, %v2424_v7  ;;  %v2413_v14 = vsel %vm2410_vm7, %v2412_v42, %v2408_v41 }
0x162a   :  { %v2433_v54 = vsel %vm2430_vm8, %v2432_v12, %v2428_v11  ;;  %v2440_v26 = vmul.f32 %v2438_v50, %v2413_v14 }
0x162b   :  { %v2451_v28 = vmul.f32 %v2433_v54, %v4832_v25 }
0x1687   :  { %v2443_v57 = vpop.permute.xlu0 %2442 }
0x1688   :  { %v2445_v20 = vmul.f32 %v2443_v57, %v2413_v14  ;;  %v2454_v17 = vpop.permute.xlu1 %2453 }
0x1689   :  { %v2456_v23 = vmul.f32 %v2454_v17, %v2433_v54 }
0x168a   :  { %2447 = vrot.lane.b32.xlu0 %v2445_v20, %s3940_s2 }
0x168b   :  { %2458 = vrot.lane.b32.xlu1 %v2456_v23, %s3940_s2 }
0x16fc   :  { %v2448_v27 = vpop.permute.xlu0 %2447 }
0x16fd   :  { %v2450_v48 = vadd.f32 %v2448_v27, %v2440_v26  ;;  %v2459_v43 = vpop.permute.xlu1 %2458 }
0x16fe   :  { %v2461_v46 = vadd.f32 %v2459_v43, %v2451_v28 }
0x16ff   :  { %3730 = vtanh.f32 %v2450_v48 }
0x1700   :  { %3732 = vtanh.f32 %v2461_v46 }
0x1705   :  { %v3731_v33 = vpop.eup %3730 }
0x1706   :  { %v3733_v44 = vpop.eup %3732  ;;  %2464 = vrot.lane.b32.xlu2 %v3731_v33, %s3939_s3 }
0x1707   :  { %2470 = vrot.lane.b32.xlu0 %v3733_v44, %s3939_s3 }
0x170f   :  { %2491 = vrot.lane.b32.xlu0 %v2450_v48, %s3941_s25 }
0x1760   :  { %v2465_v45 = vpop.permute.xlu2 %2464 }
0x1761   :  { %v2467_v47 = vmul.f32 %v2465_v45, %v2413_v14 }
0x1763   :  { %2475 = vrot.lane.b32.xlu1 %v2467_v47, %s3940_s2 }
0x1779   :  { %v2471_v49 = vpop.permute.xlu0 %2470 }
0x177a   :  { %v4865_v53 = vmul.f32 %v2471_v49, %v2433_v54 }
0x177c   :  { %2486 = vrot.lane.b32.xlu2 %v4865_v53, %s3939_s3 }
0x1781   :  { %v2492_v25 = vpop.permute.xlu0 %2491 }
0x1782   :  { %v4870_v63 = vsel %vm670_vm11, %v2492_v25, %v2461_v46 }
0x1783   :  { %2587 = vrot.lane.b32.xlu0 %v4870_v63, %s3940_s2 }
0x17d5   :  { %v2476_v0 = vpop.permute.xlu1 %2475 }
0x17d6   :  { %v2487_v2 = vpop.permute.xlu2 %2486 }
0x17d7   :  { %v2489_v1 = vsel %vm670_vm11, %v2476_v0, %v2487_v2 }
0x17d8   :  { %3538 = vmatmul.msk.f32.vlgmr.msra.gmra.mxu0 %vm535_vm13, %v2489_v1  ;;  %3539 = vmatmul.msk.f32.vlgmr.msra.gmra.mxu1 %vm535_vm13, %v2489_v1 }
0x17d9   :  { %3112 = vmatpush.msra.mxu0 %v4618_v51  ;;  %3132 = vmatpush.msra.mxu1 %v4626_v56  ;;  %v2495_v51 = vld [vmem:[#allocation2 + $0x8] sm:$0xf] }
0x17db   :  { %3113 = vmatpush.msra.mxu0 %v4628_v58  ;;  %3133 = vmatpush.msra.mxu1 %v4634_v59 }
0x17dd   :  { %3114 = vmatpush.msra.mxu0 %v4636_v60  ;;  %3134 = vmatpush.msra.mxu1 %v4642_v61 }
0x17df   :  { %3115 = vmatpush.msra.mxu0 %v4644_v62  ;;  %3135 = vmatpush.msra.mxu1 %v4655_v3 }
0x17e1   :  { %3116 = vmatpush.msra.mxu0 %v4657_v4  ;;  %3136 = vmatpush.msra.mxu1 %v4663_v5 }
0x17e3   :  { %3117 = vmatpush.msra.mxu0 %v4665_v30  ;;  %3137 = vmatpush.msra.mxu1 %v4671_v6 }
0x17e5   :  { %3118 = vmatpush.msra.mxu0 %v4673_v8  ;;  %3138 = vmatpush.msra.mxu1 %v4689_v38 }
0x17e7   :  { %3119 = vmatpush.msra.mxu0 %v4691_v9  ;;  %3139 = vmatpush.msra.mxu1 %v4697_v35 }
0x17f5   :  { %v2588_v1 = vpop.permute.xlu0 %2587 }
0x1855   :  { %v2521_v55 = vpop.f32.mrf.mxu0  ;;  %v2541_v15 = vpop.f32.mrf.mxu1 }
0x1856   :  { %v2544_v36 = vadd.f32 %v2521_v55, %v2495_v51  ;;  %v2545_v34 = vadd.f32 %v2541_v15, %v4811_v16 }
0x1858   :  { %3734 = vtanh.f32 %v2544_v36  ;;  %v3541_v13 = vmul.f32 -1.442695, %v2545_v34  ;;  %v3540_v7 = vmul.f32 -1.442695, %v2544_v36 }
0x1859   :  { %3736 = vtanh.f32 %v2545_v34 }
0x185a   :  { %3738 = vpow2.f32 %v3541_v13 }
0x185e   :  { %v3735_v32 = vpop.eup %3734 }
0x185f   :  { %v3737_v19 = vpop.eup %3736  ;;  %2592 = vrot.lane.b32.xlu1 %v3735_v32, %s3939_s3 }
0x1860   :  { %2603 = vrot.lane.b32.xlu2 %v3737_v19, %s3939_s3  ;;  %v3739_v29 = vpop.eup %3738 }
0x1861   :  { %v2569_v31 = vadd.f32 1.0, %v3739_v29 }
0x1863   :  { %3740 = vrcp.f32 %v2569_v31  ;;  %v2581_v11 = vand.u32 2147483648, %v2569_v31  ;;  %vm2575_vm10 = vweird.f32 %v2569_v31  ;;  %v2579_v12 = vand.u32 2147483647, %v2569_v31 }
0x1864   :  { %3742 = vpow2.f32 %v3540_v7 }
0x1865   :  { %v2582_v14 = vor.u32 1.1754944e-38, %v2581_v11  ;;  %vm2580_vm15 = vcmp.eq.f32.partialorder %v2579_v12, 8.507059e+37 }
0x1869   :  { %v3741_v10 = vpop.eup %3740 }
0x186a   :  { %v2571_v37 = vmul.f32 %v3741_v10, %v2569_v31  ;;  %v3743_v40 = vpop.eup %3742  ;;  %vm2576_vm9 = vweird.f32 %v3741_v10 }
0x186b   :  { %v2549_v41 = vadd.f32 1.0, %v3743_v40  ;;  %vm2577_vm14 = vmor %vm2575_vm10, %vm2576_vm9 }
0x186c   :  { %v2572_v39 = vsub.f32 1.0, %v2571_v37  ;;  %v3830_v37 = vld [vmem:[#allocation12 + $0x70] sm:$0xff] }
0x186d   :  { %3744 = vrcp.f32 %v2549_v41  ;;  %v2561_v48 = vand.u32 2147483648, %v2549_v41  ;;  %vm2555_vm1 = vweird.f32 %v2549_v41  ;;  %v2559_v43 = vand.u32 2147483647, %v2549_v41 }
0x186e   :  { %v2573_v16 = vmul.f32 %v3741_v10, %v2572_v39 }
0x186f   :  { %v2562_v33 = vor.u32 1.1754944e-38, %v2561_v48  ;;  %vm2560_vm4 = vcmp.eq.f32.partialorder %v2559_v43, 8.507059e+37 }
0x1870   :  { %v2574_v42 = vadd.f32 %v3741_v10, %v2573_v16 }
0x1872   :  { %v2578_v57 = vsel %vm2577_vm14, %v3741_v10, %v2574_v42 }
0x1873   :  { %v2583_v17 = vsel %vm2580_vm15, %v2582_v14, %v2578_v57  ;;  %v3745_v54 = vpop.eup %3744 }
0x1874   :  { %v2551_v50 = vmul.f32 %v3745_v54, %v2549_v41  ;;  %vm2556_vm0 = vweird.f32 %v3745_v54  ;;  %v2601_v49 = vmul.f32 %v2583_v17, %v4870_v63 }
0x1875   :  { %vm2557_vm3 = vmor %vm2555_vm1, %vm2556_vm0 }
0x1876   :  { %v2552_v26 = vsub.f32 1.0, %v2551_v50 }
0x1878   :  { %v2553_v27 = vmul.f32 %v3745_v54, %v2552_v26 }
0x187a   :  { %v2554_v28 = vadd.f32 %v3745_v54, %v2553_v27 }
0x187c   :  { %v2558_v46 = vsel %vm2557_vm3, %v3745_v54, %v2554_v28 }
0x187d   :  { %v2563_v45 = vsel %vm2560_vm4, %v2562_v33, %v2558_v46 }
0x187e   :  { %v2590_v51 = vmul.f32 %v2588_v1, %v2563_v45 }
0x18ba   :  { %v2604_v20 = vpop.permute.xlu2 %2603 }
0x18bb   :  { %v2606_v23 = vmul.f32 %v2604_v20, %v2583_v17 }
0x18bd   :  { %2608 = vrot.lane.b32.xlu2 %v2606_v23, %s3940_s2 }
0x18d1   :  { %v2593_v44 = vpop.permute.xlu1 %2592 }
0x18d2   :  { %v2595_v47 = vmul.f32 %v2593_v44, %v2563_v45 }
0x18d4   :  { %2597 = vrot.lane.b32.xlu1 %v2595_v47, %s3940_s2 }
0x1917   :  { %v2609_v25 = vpop.permute.xlu2 %2608 }
0x1918   :  { %v2611_v0 = vadd.f32 %v2609_v25, %v2601_v49 }
0x191a   :  { %3746 = vtanh.f32 %v2611_v0 }
0x1920   :  { %v3747_v2 = vpop.eup %3746 }
0x1921   :  { %2620 = vrot.lane.b32.xlu1 %v3747_v2, %s3939_s3 }
0x1946   :  { %v2598_v55 = vpop.permute.xlu1 %2597 }
0x1947   :  { %v2600_v15 = vadd.f32 %v2598_v55, %v2590_v51 }
0x1949   :  { %3748 = vtanh.f32 %v2600_v15  ;;  %2641 = vrot.lane.b32.xlu1 %v2600_v15, %s3941_s25 }
0x194f   :  { %v3749_v36 = vpop.eup %3748 }
0x1950   :  { %2614 = vrot.lane.b32.xlu0 %v3749_v36, %s3939_s3 }
0x1993   :  { %v2621_v34 = vpop.permute.xlu1 %2620 }
0x1994   :  { %v4902_v32 = vmul.f32 %v2621_v34, %v2583_v17 }
0x1996   :  { %2636 = vrot.lane.b32.xlu0 %v4902_v32, %s3939_s3 }
0x19bb   :  { %v2642_v63 = vpop.permute.xlu1 %2641 }
0x19bc   :  { %v4907_v19 = vsel %vm670_vm11, %v2642_v63, %v2611_v0 }
0x19bd   :  { %2737 = vrot.lane.b32.xlu1 %v4907_v19, %s3940_s2 }
0x19c2   :  { %v2615_v13 = vpop.permute.xlu0 %2614 }
0x19c3   :  { %v2617_v29 = vmul.f32 %v2615_v13, %v2563_v45 }
0x19c5   :  { %2625 = vrot.lane.b32.xlu2 %v2617_v29, %s3940_s2 }
0x1a08   :  { %v2637_v31 = vpop.permute.xlu0 %2636 }
0x1a1f   :  { %v2626_v10 = vpop.permute.xlu2 %2625 }
0x1a20   :  { %v2639_v7 = vsel %vm670_vm11, %v2626_v10, %v2637_v31  ;;  %v2795_v10 = vld [vmem:[#allocation2 + $0x10] sm:$0xf] }
0x1a21   :  { %3542 = vmatmul.msk.f32.vlgmr.msrb.gmra.mxu2 %vm535_vm13, %v2639_v7  ;;  %3543 = vmatmul.msk.f32.vlgmr.msrb.gmra.mxu3 %vm535_vm13, %v2639_v7 }
0x1a22   :  { %3262 = vmatpush.msrb.mxu2 %v3830_v37  ;;  %3282 = vmatpush.msrb.mxu3 %v4626_v56  ;;  %v2645_v56 = vld [vmem:[#allocation2 + $0xc] sm:$0xf] }
0x1a24   :  { %3263 = vmatpush.msrb.mxu2 %v4628_v58  ;;  %3283 = vmatpush.msrb.mxu3 %v4634_v59 }
0x1a26   :  { %3264 = vmatpush.msrb.mxu2 %v4636_v60  ;;  %3284 = vmatpush.msrb.mxu3 %v4642_v61 }
0x1a28   :  { %3265 = vmatpush.msrb.mxu2 %v4644_v62  ;;  %3285 = vmatpush.msrb.mxu3 %v4655_v3 }
0x1a2a   :  { %3266 = vmatpush.msrb.mxu2 %v4657_v4  ;;  %3286 = vmatpush.msrb.mxu3 %v4663_v5 }
0x1a2c   :  { %3267 = vmatpush.msrb.mxu2 %v4665_v30  ;;  %3287 = vmatpush.msrb.mxu3 %v4671_v6 }
0x1a2e   :  { %3268 = vmatpush.msrb.mxu2 %v4673_v8  ;;  %3288 = vmatpush.msrb.mxu3 %v4689_v38 }
0x1a2f   :  { %v2738_v44 = vpop.permute.xlu1 %2737 }
0x1a30   :  { %3269 = vmatpush.msrb.mxu2 %v4691_v9  ;;  %3289 = vmatpush.msrb.mxu3 %v4697_v35 }
0x1aa4   :  { %v2671_v58 = vpop.f32.mrf.mxu2  ;;  %v2691_v59 = vpop.f32.mrf.mxu3 }
0x1aa5   :  { %v2694_v60 = vadd.f32 %v2671_v58, %v2645_v56  ;;  %v2695_v61 = vadd.f32 %v2691_v59, %v4813_v22 }
0x1aa7   :  { %3750 = vtanh.f32 %v2694_v60  ;;  %v3544_v4 = vmul.f32 -1.442695, %v2694_v60  ;;  %v3545_v8 = vmul.f32 -1.442695, %v2695_v61 }
0x1aa8   :  { %3752 = vtanh.f32 %v2695_v61 }
0x1aa9   :  { %3754 = vpow2.f32 %v3544_v4 }
0x1aad   :  { %v3751_v62 = vpop.eup %3750 }
0x1aae   :  { %v3753_v3 = vpop.eup %3752  ;;  %2742 = vrot.lane.b32.xlu2 %v3751_v62, %s3939_s3 }
0x1aaf   :  { %2753 = vrot.lane.b32.xlu0 %v3753_v3, %s3939_s3  ;;  %v3755_v5 = vpop.eup %3754 }
0x1ab0   :  { %v2699_v30 = vadd.f32 1.0, %v3755_v5 }
0x1ab2   :  { %3756 = vrcp.f32 %v2699_v30  ;;  %v2711_v16 = vand.u32 2147483648, %v2699_v30  ;;  %vm2705_vm6 = vweird.f32 %v2699_v30  ;;  %v2709_v41 = vand.u32 2147483647, %v2699_v30 }
0x1ab3   :  { %3758 = vpow2.f32 %v3545_v8 }
0x1ab4   :  { %v2712_v11 = vor.u32 1.1754944e-38, %v2711_v16  ;;  %vm2710_vm7 = vcmp.eq.f32.partialorder %v2709_v41, 8.507059e+37 }
0x1ab8   :  { %v3757_v6 = vpop.eup %3756 }
0x1ab9   :  { %v2701_v38 = vmul.f32 %v3757_v6, %v2699_v30  ;;  %v3759_v22 = vpop.eup %3758  ;;  %vm2706_vm5 = vweird.f32 %v3757_v6 }
0x1aba   :  { %v2719_v39 = vadd.f32 1.0, %v3759_v22  ;;  %vm2707_vm2 = vmor %vm2705_vm6, %vm2706_vm5 }
0x1abb   :  { %v2702_v9 = vsub.f32 1.0, %v2701_v38 }
0x1abc   :  { %3760 = vrcp.f32 %v2719_v39  ;;  %v2731_v26 = vand.u32 2147483648, %v2719_v39  ;;  %vm2725_vm9 = vweird.f32 %v2719_v39  ;;  %v2729_v27 = vand.u32 2147483647, %v2719_v39 }
0x1abd   :  { %v2703_v35 = vmul.f32 %v3757_v6, %v2702_v9 }
0x1abe   :  { %v2732_v48 = vor.u32 1.1754944e-38, %v2731_v26  ;;  %vm2730_vm14 = vcmp.eq.f32.partialorder %v2729_v27, 8.507059e+37 }
0x1abf   :  { %v2704_v40 = vadd.f32 %v3757_v6, %v2703_v35 }
0x1ac1   :  { %v2708_v42 = vsel %vm2707_vm2, %v3757_v6, %v2704_v40 }
0x1ac2   :  { %v2713_v57 = vsel %vm2710_vm7, %v2712_v11, %v2708_v42  ;;  %v3761_v20 = vpop.eup %3760 }
0x1ac3   :  { %v2721_v17 = vmul.f32 %v3761_v20, %v2719_v39  ;;  %vm2726_vm8 = vweird.f32 %v3761_v20  ;;  %v2740_v45 = vmul.f32 %v2738_v44, %v2713_v57 }
0x1ac4   :  { %vm2727_vm10 = vmor %vm2725_vm9, %vm2726_vm8 }
0x1ac5   :  { %v2722_v54 = vsub.f32 1.0, %v2721_v17 }
0x1ac7   :  { %v2723_v23 = vmul.f32 %v3761_v20, %v2722_v54 }
0x1ac9   :  { %v2724_v50 = vadd.f32 %v3761_v20, %v2723_v23 }
0x1acb   :  { %v2728_v28 = vsel %vm2727_vm10, %v3761_v20, %v2724_v50 }
0x1acc   :  { %v2733_v46 = vsel %vm2730_vm14, %v2732_v48, %v2728_v28 }
0x1acd   :  { %v2751_v0 = vmul.f32 %v2733_v46, %v4907_v19 }
0x1b08   :  { %v2743_v12 = vpop.permute.xlu2 %2742 }
0x1b09   :  { %v2745_v14 = vmul.f32 %v2743_v12, %v2713_v57 }
0x1b0b   :  { %2747 = vrot.lane.b32.xlu2 %v2745_v14, %s3940_s2 }
0x1b21   :  { %v2754_v43 = vpop.permute.xlu0 %2753 }
0x1b22   :  { %v2756_v33 = vmul.f32 %v2754_v43, %v2733_v46 }
0x1b24   :  { %2758 = vrot.lane.b32.xlu0 %v2756_v33, %s3940_s2 }
0x1b65   :  { %v2748_v47 = vpop.permute.xlu2 %2747 }
0x1b66   :  { %v2750_v49 = vadd.f32 %v2748_v47, %v2740_v45 }
0x1b68   :  { %3762 = vtanh.f32 %v2750_v49 }
0x1b6e   :  { %v3763_v25 = vpop.eup %3762 }
0x1b6f   :  { %2764 = vrot.lane.b32.xlu1 %v3763_v25, %s3939_s3 }
0x1b96   :  { %v2759_v2 = vpop.permute.xlu0 %2758 }
0x1b97   :  { %v2761_v1 = vadd.f32 %v2759_v2, %v2751_v0 }
0x1b99   :  { %3764 = vtanh.f32 %v2761_v1 }
0x1b9f   :  { %v3765_v51 = vpop.eup %3764 }
0x1ba0   :  { %2770 = vrot.lane.b32.xlu2 %v3765_v51, %s3939_s3 }
0x1ba8   :  { %2791 = vrot.lane.b32.xlu2 %v2750_v49, %s3941_s25 }
0x1be1   :  { %v2765_v55 = vpop.permute.xlu1 %2764 }
0x1be2   :  { %v2767_v15 = vmul.f32 %v2765_v55, %v2713_v57 }
0x1be4   :  { %2775 = vrot.lane.b32.xlu0 %v2767_v15, %s3940_s2 }
0x1bfa   :  { %v2771_v36 = vpop.permute.xlu2 %2770 }
0x1bfb   :  { %v4940_v34 = vmul.f32 %v2771_v36, %v2733_v46 }
0x1bfd   :  { %2786 = vrot.lane.b32.xlu1 %v4940_v34, %s3939_s3 }
0x1c02   :  { %v2792_v63 = vpop.permute.xlu2 %2791 }
0x1c03   :  { %v4945_v19 = vsel %vm670_vm11, %v2792_v63, %v2761_v1 }
0x1c04   :  { %2887 = vrot.lane.b32.xlu2 %v4945_v19, %s3940_s2 }
0x1c56   :  { %v2776_v13 = vpop.permute.xlu0 %2775 }
0x1c5e   :  { %v2888_v48 = vpop.permute.xlu2 %2887 }
0x1c6f   :  { %v2787_v29 = vpop.permute.xlu1 %2786 }
0x1c70   :  { %v2789_v31 = vsel %vm670_vm11, %v2776_v13, %v2787_v29  ;;  %v2945_v13 = vld [vmem:[#allocation2 + $0x14] sm:$0xf] }
0x1c71   :  { %3546 = vmatmul.msk.f32.vlgmr.msrb.gmra.mxu0 %vm535_vm13, %v2789_v31  ;;  %3547 = vmatmul.msk.f32.vlgmr.msrb.gmra.mxu1 %vm535_vm13, %v2789_v31 }
0x1cee   :  { %v2821_v7 = vpop.f32.mrf.mxu0  ;;  %v2841_v37 = vpop.f32.mrf.mxu1 }
0x1cef   :  { %v2844_v56 = vadd.f32 %v2821_v7, %v2795_v10  ;;  %v2845_v58 = vadd.f32 %v2841_v37, %v4815_v18 }
0x1cf1   :  { %3766 = vtanh.f32 %v2844_v56  ;;  %v3548_v61 = vmul.f32 -1.442695, %v2844_v56  ;;  %v3549_v62 = vmul.f32 -1.442695, %v2845_v58 }
0x1cf2   :  { %3768 = vtanh.f32 %v2845_v58 }
0x1cf3   :  { %3770 = vpow2.f32 %v3548_v61 }
0x1cf4   :  { %3772 = vpow2.f32 %v3549_v62 }
0x1cf7   :  { %v3767_v59 = vpop.eup %3766 }
0x1cf8   :  { %v3769_v60 = vpop.eup %3768  ;;  %2892 = vrot.lane.b32.xlu0 %v3767_v59, %s3939_s3 }
0x1cf9   :  { %2903 = vrot.lane.b32.xlu1 %v3769_v60, %s3939_s3  ;;  %v3771_v3 = vpop.eup %3770 }
0x1cfa   :  { %v3773_v4 = vpop.eup %3772  ;;  %v2849_v5 = vadd.f32 1.0, %v3771_v3 }
0x1cfb   :  { %v2869_v30 = vadd.f32 1.0, %v3773_v4 }
0x1cfc   :  { %3774 = vrcp.f32 %v2849_v5  ;;  %v2861_v41 = vand.u32 2147483648, %v2849_v5  ;;  %vm2855_vm1 = vweird.f32 %v2849_v5  ;;  %v2859_v11 = vand.u32 2147483647, %v2849_v5 }
0x1cfd   :  { %3776 = vrcp.f32 %v2869_v30  ;;  %v2881_v42 = vand.u32 2147483648, %v2869_v30  ;;  %vm2875_vm3 = vweird.f32 %v2869_v30  ;;  %v2879_v12 = vand.u32 2147483647, %v2869_v30 }
0x1cfe   :  { %v2862_v20 = vor.u32 1.1754944e-38, %v2861_v41  ;;  %vm2860_vm6 = vcmp.eq.f32.partialorder %v2859_v11, 8.507059e+37 }
0x1cff   :  { %v2882_v17 = vor.u32 1.1754944e-38, %v2881_v42  ;;  %vm2880_vm2 = vcmp.eq.f32.partialorder %v2879_v12, 8.507059e+37 }
0x1d02   :  { %v3775_v6 = vpop.eup %3774 }
0x1d03   :  { %v3777_v18 = vpop.eup %3776  ;;  %v2851_v8 = vmul.f32 %v3775_v6, %v2849_v5  ;;  %vm2856_vm15 = vweird.f32 %v3775_v6 }
0x1d04   :  { %v2871_v38 = vmul.f32 %v3777_v18, %v2869_v30  ;;  %vm2876_vm0 = vweird.f32 %v3777_v18  ;;  %vm2857_vm4 = vmor %vm2855_vm1, %vm2856_vm15 }
0x1d05   :  { %v2852_v9 = vsub.f32 1.0, %v2851_v8  ;;  %vm2877_vm5 = vmor %vm2875_vm3, %vm2876_vm0 }
0x1d06   :  { %v2872_v35 = vsub.f32 1.0, %v2871_v38 }
0x1d07   :  { %v2853_v22 = vmul.f32 %v3775_v6, %v2852_v9 }
0x1d08   :  { %v2873_v39 = vmul.f32 %v3777_v18, %v2872_v35 }
0x1d09   :  { %v2854_v40 = vadd.f32 %v3775_v6, %v2853_v22 }
0x1d0a   :  { %v2874_v16 = vadd.f32 %v3777_v18, %v2873_v39 }
0x1d0b   :  { %v2858_v57 = vsel %vm2857_vm4, %v3775_v6, %v2854_v40 }
0x1d0c   :  { %v2878_v14 = vsel %vm2877_vm5, %v3777_v18, %v2874_v16  ;;  %v2863_v23 = vsel %vm2860_vm6, %v2862_v20, %v2858_v57 }
0x1d0d   :  { %v2883_v26 = vsel %vm2880_vm2, %v2882_v17, %v2878_v14  ;;  %v2890_v43 = vmul.f32 %v2888_v48, %v2863_v23 }
0x1d0e   :  { %v2901_v46 = vmul.f32 %v2883_v26, %v4945_v19 }
0x1d6a   :  { %v2893_v54 = vpop.permute.xlu0 %2892 }
0x1d6b   :  { %v2904_v50 = vpop.permute.xlu1 %2903  ;;  %v2895_v27 = vmul.f32 %v2893_v54, %v2863_v23 }
0x1d6c   :  { %v2906_v28 = vmul.f32 %v2904_v50, %v2883_v26 }
0x1d6d   :  { %2897 = vrot.lane.b32.xlu0 %v2895_v27, %s3940_s2 }
0x1d6e   :  { %2908 = vrot.lane.b32.xlu1 %v2906_v28, %s3940_s2 }
0x1ddf   :  { %v2898_v33 = vpop.permute.xlu0 %2897 }
0x1de0   :  { %v2909_v44 = vpop.permute.xlu1 %2908  ;;  %v2900_v45 = vadd.f32 %v2898_v33, %v2890_v43 }
0x1de1   :  { %v2911_v47 = vadd.f32 %v2909_v44, %v2901_v46 }
0x1de2   :  { %3778 = vtanh.f32 %v2900_v45 }
0x1de3   :  { %3780 = vtanh.f32 %v2911_v47 }
0x1de8   :  { %v3779_v49 = vpop.eup %3778 }
0x1de9   :  { %v3781_v25 = vpop.eup %3780  ;;  %2914 = vrot.lane.b32.xlu2 %v3779_v49, %s3939_s3 }
0x1dea   :  { %2920 = vrot.lane.b32.xlu0 %v3781_v25, %s3939_s3 }
0x1df2   :  { %2941 = vrot.lane.b32.xlu0 %v2900_v45, %s3941_s25 }
0x1e43   :  { %v2915_v0 = vpop.permute.xlu2 %2914 }
0x1e44   :  { %v2917_v2 = vmul.f32 %v2915_v0, %v2863_v23 }
0x1e46   :  { %2925 = vrot.lane.b32.xlu1 %v2917_v2, %s3940_s2 }
0x1e5c   :  { %v2921_v1 = vpop.permute.xlu0 %2920 }
0x1e5d   :  { %v4962_v51 = vmul.f32 %v2921_v1, %v2883_v26 }
0x1e5f   :  { %2936 = vrot.lane.b32.xlu2 %v4962_v51, %s3939_s3 }
0x1e64   :  { %v2942_v55 = vpop.permute.xlu0 %2941 }
0x1e65   :  { %v2944_v15 = vsel %vm670_vm11, %v2942_v55, %v2911_v47 }
0x1e66   :  { %3037 = vrot.lane.b32.xlu0 %v2944_v15, %s3940_s2 }
0x1eb8   :  { %v2926_v36 = vpop.permute.xlu1 %2925 }
0x1eb9   :  { %v2937_v63 = vpop.permute.xlu2 %2936 }
0x1eba   :  { %v2939_v19 = vsel %vm670_vm11, %v2926_v36, %v2937_v63  ;;  %v3095_v36 = vld [vmem:[#allocation2 + $0x18] sm:$0xf] }
0x1ebb   :  { %3550 = vmatmul.msk.f32.vlgmr.msra.gmra.mxu2 %vm535_vm13, %v2939_v19  ;;  %3551 = vmatmul.msk.f32.vlgmr.msra.gmra.mxu3 %vm535_vm13, %v2939_v19 }
0x1ed8   :  { %v3038_v48 = vpop.permute.xlu0 %3037 }
0x1f3e   :  { %v2971_v29 = vpop.f32.mrf.mxu2  ;;  %v2991_v31 = vpop.f32.mrf.mxu3 }
0x1f3f   :  { %v2994_v10 = vadd.f32 %v2971_v29, %v2945_v13  ;;  %v2995_v7 = vadd.f32 %v2991_v31, %v4817_v52 }
0x1f41   :  { %3782 = vtanh.f32 %v2994_v10  ;;  %v3553_v58 = vmul.f32 -1.442695, %v2995_v7  ;;  %v3552_v62 = vmul.f32 -1.442695, %v2994_v10 }
0x1f42   :  { %3784 = vtanh.f32 %v2995_v7 }
0x1f43   :  { %3786 = vpow2.f32 %v3553_v58 }
0x1f47   :  { %v3783_v37 = vpop.eup %3782 }
0x1f48   :  { %v3785_v56 = vpop.eup %3784  ;;  %3042 = vrot.lane.b32.xlu1 %v3783_v37, %s3939_s3 }
0x1f49   :  { %3053 = vrot.lane.b32.xlu2 %v3785_v56, %s3939_s3  ;;  %v3787_v59 = vpop.eup %3786 }
0x1f4a   :  { %v3019_v60 = vadd.f32 1.0, %v3787_v59 }
0x1f4c   :  { %3788 = vrcp.f32 %v3019_v60  ;;  %v3031_v18 = vand.u32 2147483648, %v3019_v60  ;;  %vm3025_vm8 = vweird.f32 %v3019_v60  ;;  %v3029_v8 = vand.u32 2147483647, %v3019_v60 }
0x1f4d   :  { %3790 = vpow2.f32 %v3552_v62 }
0x1f4e   :  { %v3032_v9 = vor.u32 1.1754944e-38, %v3031_v18  ;;  %vm3030_vm10 = vcmp.eq.f32.partialorder %v3029_v8, 8.507059e+37 }
0x1f52   :  { %v3789_v61 = vpop.eup %3788 }
0x1f53   :  { %v3021_v3 = vmul.f32 %v3789_v61, %v3019_v60  ;;  %v3791_v5 = vpop.eup %3790  ;;  %vm3026_vm7 = vweird.f32 %v3789_v61 }
0x1f54   :  { %v2999_v30 = vadd.f32 1.0, %v3791_v5  ;;  %vm3027_vm9 = vmor %vm3025_vm8, %vm3026_vm7 }
0x1f55   :  { %v3022_v4 = vsub.f32 1.0, %v3021_v3 }
0x1f56   :  { %3792 = vrcp.f32 %v2999_v30  ;;  %v3011_v12 = vand.u32 2147483648, %v2999_v30  ;;  %vm3005_vm15 = vweird.f32 %v2999_v30  ;;  %v3009_v57 = vand.u32 2147483647, %v2999_v30 }
0x1f57   :  { %v3023_v52 = vmul.f32 %v3789_v61, %v3022_v4 }
0x1f58   :  { %v3012_v20 = vor.u32 1.1754944e-38, %v3011_v12  ;;  %vm3010_vm1 = vcmp.eq.f32.partialorder %v3009_v57, 8.507059e+37 }
0x1f59   :  { %v3024_v6 = vadd.f32 %v3789_v61, %v3023_v52 }
0x1f5b   :  { %v3028_v38 = vsel %vm3027_vm9, %v3789_v61, %v3024_v6 }
0x1f5c   :  { %v3033_v22 = vsel %vm3030_vm10, %v3032_v9, %v3028_v38  ;;  %v3793_v39 = vpop.eup %3792 }
0x1f5d   :  { %v3001_v16 = vmul.f32 %v3793_v39, %v2999_v30  ;;  %vm3006_vm14 = vweird.f32 %v3793_v39  ;;  %v3051_v50 = vmul.f32 %v3033_v22, %v2944_v15 }
0x1f5e   :  { %vm3007_vm0 = vmor %vm3005_vm15, %vm3006_vm14 }
0x1f5f   :  { %v3002_v41 = vsub.f32 1.0, %v3001_v16 }
0x1f61   :  { %v3003_v42 = vmul.f32 %v3793_v39, %v3002_v41 }
0x1f63   :  { %v3004_v11 = vadd.f32 %v3793_v39, %v3003_v42 }
0x1f65   :  { %v3008_v14 = vsel %vm3007_vm0, %v3793_v39, %v3004_v11 }
0x1f66   :  { %v3013_v54 = vsel %vm3010_vm1, %v3012_v20, %v3008_v14 }
0x1f67   :  { %v3040_v43 = vmul.f32 %v3038_v48, %v3013_v54 }
0x1fa3   :  { %v3054_v35 = vpop.permute.xlu2 %3053 }
0x1fa4   :  { %v3056_v40 = vmul.f32 %v3054_v35, %v3033_v22 }
0x1fa6   :  { %3058 = vrot.lane.b32.xlu2 %v3056_v40, %s3940_s2 }
0x1fba   :  { %v3043_v17 = vpop.permute.xlu1 %3042 }
0x1fbb   :  { %v3045_v23 = vmul.f32 %v3043_v17, %v3013_v54 }
0x1fbd   :  { %3047 = vrot.lane.b32.xlu1 %v3045_v23, %s3940_s2 }
0x2000   :  { %v3059_v26 = vpop.permute.xlu2 %3058 }
0x2001   :  { %v3061_v27 = vadd.f32 %v3059_v26, %v3051_v50 }
0x2003   :  { %3794 = vtanh.f32 %v3061_v27 }
0x2009   :  { %v3795_v28 = vpop.eup %3794 }
0x200a   :  { %3070 = vrot.lane.b32.xlu1 %v3795_v28, %s3939_s3 }
0x202f   :  { %v3048_v46 = vpop.permute.xlu1 %3047 }
0x2030   :  { %v3050_v33 = vadd.f32 %v3048_v46, %v3040_v43 }
0x2032   :  { %3796 = vtanh.f32 %v3050_v33  ;;  %3091 = vrot.lane.b32.xlu1 %v3050_v33, %s3941_s25 }
0x2038   :  { %v3797_v44 = vpop.eup %3796 }
0x2039   :  { %3064 = vrot.lane.b32.xlu0 %v3797_v44, %s3939_s3 }
0x207c   :  { %v3071_v45 = vpop.permute.xlu1 %3070 }
0x207d   :  { %v4979_v47 = vmul.f32 %v3071_v45, %v3033_v22 }
0x207f   :  { %3086 = vrot.lane.b32.xlu0 %v4979_v47, %s3939_s3 }
0x20a4   :  { %v3092_v49 = vpop.permute.xlu1 %3091 }
0x20a5   :  { %v4984_v25 = vsel %vm670_vm11, %v3092_v49, %v3061_v27 }
0x20a6   :  { %3187 = vrot.lane.b32.xlu1 %v4984_v25, %s3940_s2 }
0x20ab   :  { %v3065_v0 = vpop.permute.xlu0 %3064 }
0x20ac   :  { %v3067_v2 = vmul.f32 %v3065_v0, %v3013_v54 }
0x20ae   :  { %3075 = vrot.lane.b32.xlu2 %v3067_v2, %s3940_s2 }
0x20f1   :  { %v3087_v1 = vpop.permute.xlu0 %3086 }
0x2108   :  { %v3076_v55 = vpop.permute.xlu2 %3075 }
0x2109   :  { %v3089_v15 = vsel %vm670_vm11, %v3076_v55, %v3087_v1 }
0x210a   :  { %3554 = vmatmul.msk.f32.vlgmr.msra.gmra.mxu0 %vm535_vm13, %v3089_v15  ;;  %3555 = vmatmul.msk.f32.vlgmr.msra.gmra.mxu1 %vm535_vm13, %v3089_v15 }
0x2118   :  { %v3188_v20 = vpop.permute.xlu1 %3187 }
0x2187   :  { %v3121_v63 = vpop.f32.mrf.mxu0  ;;  %v3141_v19 = vpop.f32.mrf.mxu1 }
0x2188   :  { %v3144_v13 = vadd.f32 %v3121_v63, %v3095_v36  ;;  %v3145_v29 = vadd.f32 %v3141_v19, %v4819_v24 }
0x218a   :  { %3798 = vtanh.f32 %v3144_v13  ;;  %v3556_v7 = vmul.f32 -1.442695, %v3144_v13  ;;  %v3557_v59 = vmul.f32 -1.442695, %v3145_v29 }
0x218b   :  { %3800 = vtanh.f32 %v3145_v29 }
0x218c   :  { %3802 = vpow2.f32 %v3556_v7 }
0x2190   :  { %v3799_v31 = vpop.eup %3798 }
0x2191   :  { %v3801_v10 = vpop.eup %3800  ;;  %3192 = vrot.lane.b32.xlu2 %v3799_v31, %s3939_s3 }
0x2192   :  { %3203 = vrot.lane.b32.xlu0 %v3801_v10, %s3939_s3  ;;  %v3803_v37 = vpop.eup %3802 }
0x2193   :  { %v3149_v56 = vadd.f32 1.0, %v3803_v37 }
0x2195   :  { %3804 = vrcp.f32 %v3149_v56  ;;  %v3161_v5 = vand.u32 2147483648, %v3149_v56  ;;  %vm3155_vm4 = vweird.f32 %v3149_v56  ;;  %v3159_v52 = vand.u32 2147483647, %v3149_v56 }
0x2196   :  { %3806 = vpow2.f32 %v3557_v59 }
0x2197   :  { %v3162_v6 = vor.u32 1.1754944e-38, %v3161_v5  ;;  %vm3160_vm6 = vcmp.eq.f32.partialorder %v3159_v52, 8.507059e+37 }
0x219b   :  { %v3805_v58 = vpop.eup %3804 }
0x219c   :  { %v3151_v60 = vmul.f32 %v3805_v58, %v3149_v56  ;;  %v3807_v24 = vpop.eup %3806  ;;  %vm3156_vm3 = vweird.f32 %v3805_v58 }
0x219d   :  { %v3169_v3 = vadd.f32 1.0, %v3807_v24  ;;  %vm3157_vm5 = vmor %vm3155_vm4, %vm3156_vm3 }
0x219e   :  { %v3152_v61 = vsub.f32 1.0, %v3151_v60 }
0x219f   :  { %3808 = vrcp.f32 %v3169_v3  ;;  %v3181_v16 = vand.u32 2147483648, %v3169_v3  ;;  %vm3175_vm7 = vweird.f32 %v3169_v3  ;;  %v3179_v41 = vand.u32 2147483647, %v3169_v3 }
0x21a0   :  { %v3153_v62 = vmul.f32 %v3805_v58, %v3152_v61 }
0x21a1   :  { %v3182_v11 = vor.u32 1.1754944e-38, %v3181_v16  ;;  %vm3180_vm9 = vcmp.eq.f32.partialorder %v3179_v41, 8.507059e+37 }
0x21a2   :  { %v3154_v4 = vadd.f32 %v3805_v58, %v3153_v62 }
0x21a4   :  { %v3158_v30 = vsel %vm3157_vm5, %v3805_v58, %v3154_v4 }
0x21a5   :  { %v3163_v8 = vsel %vm3160_vm6, %v3162_v6, %v3158_v30  ;;  %v3809_v9 = vpop.eup %3808 }
0x21a6   :  { %v3171_v35 = vmul.f32 %v3809_v9, %v3169_v3  ;;  %vm3176_vm2 = vweird.f32 %v3809_v9  ;;  %v3190_v17 = vmul.f32 %v3188_v20, %v3163_v8 }
0x21a7   :  { %vm3177_vm8 = vmor %vm3175_vm7, %vm3176_vm2 }
0x21a8   :  { %v3172_v22 = vsub.f32 1.0, %v3171_v35 }
0x21aa   :  { %v3173_v39 = vmul.f32 %v3809_v9, %v3172_v22 }
0x21ac   :  { %v3174_v40 = vadd.f32 %v3809_v9, %v3173_v39 }
0x21ae   :  { %v3178_v42 = vsel %vm3177_vm8, %v3809_v9, %v3174_v40 }
0x21af   :  { %v3183_v57 = vsel %vm3180_vm9, %v3182_v11, %v3178_v42  ;;  %v3399_v11 = vld [vmem:[%s5082_s7 + $0x38] sm:$0xff] }
0x21b0   :  { %v3201_v26 = vmul.f32 %v3183_v57, %v4984_v25  ;;  %3415 = vmatpush.msrb.mxu0 %v3399_v11 }
0x21eb   :  { %v3193_v18 = vpop.permute.xlu2 %3192 }
0x21ec   :  { %v3195_v38 = vmul.f32 %v3193_v18, %v3163_v8 }
0x21ee   :  { %3197 = vrot.lane.b32.xlu2 %v3195_v38, %s3940_s2 }
0x2204   :  { %v3204_v12 = vpop.permute.xlu0 %3203 }
0x2205   :  { %v3206_v14 = vmul.f32 %v3204_v12, %v3183_v57  ;;  %v3398_v12 = vld [vmem:[%s5082_s7 + $0x30] sm:$0xff] }
0x2206   :  { %3416 = vmatpush.msrb.mxu0 %v3398_v12 }
0x2207   :  { %3208 = vrot.lane.b32.xlu0 %v3206_v14, %s3940_s2  ;;  %v3397_v14 = vld [vmem:[%s5082_s7 + $0x28] sm:$0xff] }
0x2208   :  { %3417 = vmatpush.msrb.mxu0 %v3397_v14 }
0x2248   :  { %v3198_v54 = vpop.permute.xlu2 %3197 }
0x2249   :  { %v3200_v23 = vadd.f32 %v3198_v54, %v3190_v17 }
0x224b   :  { %3810 = vtanh.f32 %v3200_v23 }
0x2251   :  { %v3811_v50 = vpop.eup %3810 }
0x2252   :  { %3214 = vrot.lane.b32.xlu1 %v3811_v50, %s3939_s3 }
0x2279   :  { %v3209_v27 = vpop.permute.xlu0 %3208 }
0x227a   :  { %v3211_v28 = vadd.f32 %v3209_v27, %v3201_v26 }
0x227c   :  { %3812 = vtanh.f32 %v3211_v28 }
0x2282   :  { %v3813_v48 = vpop.eup %3812 }
0x2283   :  { %3220 = vrot.lane.b32.xlu2 %v3813_v48, %s3939_s3 }
0x228b   :  { %3241 = vrot.lane.b32.xlu2 %v3200_v23, %s3941_s25 }
0x22c4   :  { %v3215_v43 = vpop.permute.xlu1 %3214 }
0x22c5   :  { %v3217_v46 = vmul.f32 %v3215_v43, %v3163_v8  ;;  %v3249_v8 = vld.sshfl [vmem:[#allocation1 + $0x8] sm:$0xff pattern:$0x73625140] }
0x22c7   :  { %3225 = vrot.lane.b32.xlu0 %v3217_v46, %s3940_s2  ;;  %v3396_v46 = vld [vmem:[%s5082_s7 + $0x20] sm:$0xff] }
0x22c8   :  { %3418 = vmatpush.msrb.mxu0 %v3396_v46 }
0x22dd   :  { %v3221_v33 = vpop.permute.xlu2 %3220 }
0x22de   :  { %v5002_v44 = vmul.f32 %v3221_v33, %v3183_v57  ;;  %v3395_v33 = vld [vmem:[%s5082_s7 + $0x18] sm:$0xff] }
0x22df   :  { %3419 = vmatpush.msrb.mxu0 %v3395_v33 }
0x22e0   :  { %3236 = vrot.lane.b32.xlu1 %v5002_v44, %s3939_s3 }
0x22e5   :  { %v3242_v45 = vpop.permute.xlu2 %3241 }
0x22e6   :  { %v5007_v49 = vsel %vm670_vm11, %v3242_v45, %v3211_v28  ;;  %v3394_v45 = vld [vmem:[%s5082_s7 + $0x10] sm:$0xff] }
0x22e7   :  { %3420 = vmatpush.msrb.mxu0 %v3394_v45 }
0x22e8   :  { %3337 = vrot.lane.b32.xlu1 %v5007_v49, %s3940_s2 }
0x22f0   :  { %2331 = vrot.lane.b32.xlu1 %v4826_v21, %s3940_s2  ;;  %v3245_v21 = vld [vmem:[#allocation2 + $0x1c] sm:$0xf] }
0x2339   :  { %v3226_v25 = vpop.permute.xlu0 %3225 }
0x2352   :  { %v3237_v0 = vpop.permute.xlu1 %3236 }
0x2353   :  { %v3239_v2 = vsel %vm670_vm11, %v3226_v25, %v3237_v0 }
0x2354   :  { %3558 = vmatmul.msk.f32.vlgmr.msrb.gmra.mxu2 %vm535_vm13, %v3239_v2  ;;  %3559 = vmatmul.msk.f32.vlgmr.msrb.gmra.mxu3 %vm535_vm13, %v3239_v2 }
0x235a   :  { %v3338_v1 = vpop.permute.xlu1 %3337 }
0x2362   :  { %v2332_v55 = vpop.permute.xlu1 %2331 }
0x2363   :  { %2335 = vst.msk [vmem:[#allocation6 + $0xe] sm:$0x3] %vm659_vm12, %v2332_v55 }
0x236a   :  { %v3386_v15 = vld [vmem:[#allocation6 + $0xe] sm:$0x3] }
0x236b   :  { %3388 = vrot.lane.b32.xlu1 %v3386_v15, %s3940_s2 }
0x2373   :  { %2481 = vrot.lane.b32.xlu1 %v4865_v53, %s3940_s2 }
0x237b   :  { %2931 = vrot.lane.b32.xlu1 %v4962_v51, %s3940_s2 }
0x23d7   :  { %v3271_v36 = vpop.f32.mrf.mxu2  ;;  %v3291_v18 = vpop.f32.mrf.mxu3 }
0x23d8   :  { %v3294_v63 = vadd.f32 %v3271_v36, %v3245_v21  ;;  %v3295_v38 = vadd.f32 %v3291_v18, %v3249_v8 }
0x23da   :  { %3814 = vtanh.f32 %v3294_v63  ;;  %v3560_v10 = vmul.f32 -1.442695, %v3294_v63  ;;  %v3561_v22 = vmul.f32 -1.442695, %v3295_v38 }
0x23dc   :  { %3816 = vpow2.f32 %v3560_v10 }
0x23dd   :  { %v5022_v19 = vpop.permute.xlu1 %3388 }
0x23e0   :  { %v3815_v13 = vpop.eup %3814 }
0x23e1   :  { %3342 = vrot.lane.b32.xlu0 %v3815_v13, %s3939_s3  ;;  %v3573_v13 = vld [vmem:[%s5083_s8] ss:$0 sm:$0xff] }
0x23e2   :  { %v3817_v7 = vpop.eup %3816 }
0x23e3   :  { %v3299_v37 = vadd.f32 1.0, %v3817_v7 }
0x23e5   :  { %v2482_v29 = vpop.permute.xlu1 %2481  ;;  %3818 = vrcp.f32 %v3299_v37  ;;  %v3311_v60 = vand.u32 2147483648, %v3299_v37  ;;  %vm3305_vm14 = vweird.f32 %v3299_v37  ;;  %v3309_v61 = vand.u32 2147483647, %v3299_v37 }
0x23e7   :  { %v3312_v24 = vor.u32 1.1754944e-38, %v3311_v60  ;;  %vm3310_vm0 = vcmp.eq.f32.partialorder %v3309_v61, 8.507059e+37 }
0x23eb   :  { %v3819_v53 = vpop.eup %3818 }
0x23ec   :  { %v3301_v56 = vmul.f32 %v3819_v53, %v3299_v37  ;;  %vm3306_vm10 = vweird.f32 %v3819_v53 }
0x23ed   :  { %v2932_v31 = vpop.permute.xlu1 %2931  ;;  %vm3307_vm15 = vmor %vm3305_vm14, %vm3306_vm10 }
0x23ee   :  { %v3302_v58 = vsub.f32 1.0, %v3301_v56 }
0x23f0   :  { %v3303_v51 = vmul.f32 %v3819_v53, %v3302_v58 }
0x23f2   :  { %v3304_v59 = vadd.f32 %v3819_v53, %v3303_v51 }
0x23f4   :  { %v3308_v62 = vsel %vm3307_vm15, %v3819_v53, %v3304_v59 }
0x23f5   :  { %v3313_v4 = vsel %vm3310_vm0, %v3312_v24, %v3308_v62 }
0x23f6   :  { %v3340_v52 = vmul.f32 %v3338_v1, %v3313_v4 }
0x2453   :  { %v3343_v3 = vpop.permute.xlu0 %3342 }
0x2454   :  { %v3345_v5 = vmul.f32 %v3343_v3, %v3313_v4 }
0x2456   :  { %3347 = vrot.lane.b32.xlu2 %v3345_v5, %s3940_s2 }
0x24b0   :  { %v3348_v30 = vpop.permute.xlu2 %3347 }
0x24b1   :  { %v3350_v6 = vadd.f32 %v3348_v30, %v3340_v52 }
0x24b3   :  { %3820 = vtanh.f32 %v3350_v6 }
0x24b4   :  { %3822 = vtanh.f32 %v3295_v38 }
0x24b5   :  { %3824 = vpow2.f32 %v3561_v22 }
0x24b9   :  { %v3821_v9 = vpop.eup %3820 }
0x24ba   :  { %3364 = vrot.lane.b32.xlu0 %v3821_v9, %s3939_s3  ;;  %v3823_v35 = vpop.eup %3822 }
0x24bb   :  { %v3825_v39 = vpop.eup %3824 }
0x24bc   :  { %v3319_v40 = vadd.f32 1.0, %v3825_v39 }
0x24be   :  { %3826 = vrcp.f32 %v3319_v40  ;;  %v3331_v23 = vand.u32 2147483648, %v3319_v40  ;;  %vm3325_vm3 = vweird.f32 %v3319_v40  ;;  %v3329_v50 = vand.u32 2147483647, %v3319_v40 }
0x24c0   :  { %v3332_v27 = vor.u32 1.1754944e-38, %v3331_v23  ;;  %vm3330_vm5 = vcmp.eq.f32.partialorder %v3329_v50, 8.507059e+37 }
0x24c2   :  { %3353 = vrot.lane.b32.xlu0 %v3823_v35, %s3939_s3 }
0x24c4   :  { %v3827_v16 = vpop.eup %3826 }
0x24c5   :  { %v3321_v41 = vmul.f32 %v3827_v16, %v3319_v40  ;;  %vm3326_vm1 = vweird.f32 %v3827_v16 }
0x24c6   :  { %vm3327_vm4 = vmor %vm3325_vm3, %vm3326_vm1 }
0x24c7   :  { %v3322_v42 = vsub.f32 1.0, %v3321_v41 }
0x24c9   :  { %v3323_v57 = vmul.f32 %v3827_v16, %v3322_v42 }
0x24cb   :  { %v3324_v54 = vadd.f32 %v3827_v16, %v3323_v57 }
0x24cd   :  { %v3328_v26 = vsel %vm3327_vm4, %v3827_v16, %v3324_v54 }
0x24ce   :  { %v3333_v28 = vsel %vm3330_vm5, %v3332_v27, %v3328_v26 }
0x24cf   :  { %v3351_v0 = vmul.f32 %v3333_v28, %v5007_v49 }
0x252c   :  { %v3365_v20 = vpop.permute.xlu0 %3364 }
0x252d   :  { %v3367_v17 = vmul.f32 %v3365_v20, %v3313_v4 }
0x252f   :  { %3375 = vrot.lane.b32.xlu2 %v3367_v17, %s3940_s2 }
0x2534   :  { %v3354_v48 = vpop.permute.xlu0 %3353 }
0x2535   :  { %v3356_v43 = vmul.f32 %v3354_v48, %v3333_v28 }
0x2537   :  { %3358 = vrot.lane.b32.xlu2 %v3356_v43, %s3940_s2 }
0x253f   :  { %2631 = vrot.lane.b32.xlu2 %v4902_v32, %s3940_s2  ;;  %v3393_v32 = vld [vmem:[%s5082_s7 + $0x8] sm:$0xff] }
0x2540   :  { %3421 = vmatpush.msrb.mxu0 %v3393_v32 }
0x2547   :  { %3081 = vrot.lane.b32.xlu2 %v4979_v47, %s3940_s2  ;;  %v3392_v47 = vld [vmem:[%s5082_s7] sm:$0xff] }
0x2548   :  { %3422 = vmatpush.msrb.mxu0 %v3392_v47 }
0x2589   :  { %v3376_v25 = vpop.permute.xlu2 %3375 }
0x258a   :  { %3379 = vst.msk [vmem:[#allocation5 + $0xe] sm:$0x3] %vm659_vm12, %v3376_v25 }
0x2591   :  { %v3359_v2 = vpop.permute.xlu2 %3358  ;;  %v3385_v1 = vld [vmem:[#allocation5 + $0xe] sm:$0x3] }
0x2592   :  { %v3361_v55 = vadd.f32 %v3359_v2, %v3351_v0  ;;  %v3391_v15 = vsel %vm670_vm11, %v3385_v1, %v5022_v19  ;;  %vm3427_vm11 = vcmask 25600  }
0x2593   :  { %3562 = vmatmul.msk.f32.vlgmr.msrb.gmra.mxu0 %vm535_vm13, %v3391_v15 }
0x2594   :  { %3828 = vtanh.f32 %v3361_v55 }
0x2599   :  { %v2632_v21 = vpop.permute.xlu2 %2631 }
0x259a   :  { %v3829_v36 = vpop.eup %3828 }
0x259b   :  { %3370 = vrot.lane.b32.xlu0 %v3829_v36, %s3939_s3 }
0x25a1   :  { %v3082_v63 = vpop.permute.xlu2 %3081 }
0x25a3   :  { %2781 = vrot.lane.b32.xlu0 %v4940_v34, %s3940_s2 }
0x25ab   :  { %3231 = vrot.lane.b32.xlu0 %v5002_v44, %s3940_s2 }
0x260d   :  { %v3371_v49 = vpop.permute.xlu0 %3370 }
0x260e   :  { %v3373_v19 = vmul.f32 %v3371_v49, %v3333_v28 }
0x2610   :  { %v3424_v29 = vpop.f32.mrf.mxu0  ;;  %3381 = vrot.lane.b32.xlu1 %v3373_v19, %s3940_s2 }
0x2611   :  { %v3425_v34 = vadd.f32 %v3573_v13, %v3424_v29 }
0x2613   :  { %3428 = vst.msk [vmem:[#allocation13] sm:$0x3] %vm3427_vm11, %v3425_v34 }
0x2614   :  { %3439 = dma.vmem_to_hbm [thread:$0]  %s3435_s22, 32, %s3437_s0, [#allocation9]  }
0x2615   :  { %v2782_v44 = vpop.permute.xlu0 %2781 }
0x261d   :  { %v3232_v31 = vpop.permute.xlu0 %3231 }
0x2682   :  { %v3382_v10 = vpop.permute.xlu1 %3381 }
0x2683   :  { %3931 = dma.done.wait [#allocation9], 32  }
0x2684   :  { %3932 = vsyncadd [#allocation9], 4294967264 }
0x2685   :  { %3444 = vsyncpa [#allocation8], 1 }
0x2686   :  { %3445 = vsyncpa [#allocation11], 1 }
0x2687   :  { %3446 = vsyncpa [#allocation9], 1 }

</bundles_post_ra>
